<compile_context>
chip_gen: v7x
topology: tpu7x:2x2x1
jax: 0.10.0
libtpu: 0.0.40
codegen_flags: <defaults>
</compile_context>

<pallas_src>
import functools

import jax
import jax.numpy as jnp
from jax.experimental import pallas as pl
from jax.experimental.pallas import tpu as pltpu

VMEM_SPEC = pl.BlockSpec(memory_space=pltpu.MemorySpace.VMEM)
LANE = 128
GATES = 3                     # GRU gates r, z, n (PyTorch order)
GW = GATES * LANE             # per-direction gate slab width (3 x 128 lanes)


# ------------------------------ fused kernel --------------------------------
def _fused_kernel(t_len, bpad, h_e, h_g,
                  x_ref, idp_ref,
                  ew0_ref, eb0_ref, ew1_ref, eb1_ref, wp_ref, pb_ref,
                  wih0a_ref, wih0b_ref, bih0_ref, whh0_ref, bhn0f_ref, bhn0b_ref,
                  wih1f_ref, wih1b_ref, bih1_ref, whh1_ref, bhn1f_ref, bhn1b_ref,
                  woutf_ref, woutb_ref, bout_ref,
                  o_ref,
                  gi_ref, of_ref, ob_ref):
    f32 = jnp.float32

    # ---- ELMo encoder: per-row biLSTM (seq_len==1, zero state) x 2 layers ----
    def lstm_h(g):                      # gate order i, g, o (forget dropped: c0 == 0)
        i = jax.nn.sigmoid(g[:, 0:h_e])
        c = i * jnp.tanh(g[:, h_e:2 * h_e])
        return jax.nn.sigmoid(g[:, 2 * h_e:3 * h_e]) * jnp.tanh(c)

    x = x_ref[...]
    g0 = jnp.dot(x, ew0_ref[...], preferred_element_type=f32) + eb0_ref[...]
    h0f = lstm_h(g0[:, 0:3 * h_e])
    h0b = lstm_h(g0[:, 3 * h_e:6 * h_e])
    in1 = jnp.concatenate([h0f, h0b], axis=-1)
    g1 = jnp.dot(in1, ew1_ref[...], preferred_element_type=f32) + eb1_ref[...]
    h1f = lstm_h(g1[:, 0:3 * h_e])
    h1b = lstm_h(g1[:, 3 * h_e:6 * h_e])
    feat = jnp.concatenate([x, h0f, h0b, h1f, h1b], axis=-1)
    # wp already carries gamma * softmax(task_tensor) and the [x, x] duplication.
    proj = jnp.dot(feat, wp_ref[...], preferred_element_type=f32) + pb_ref[...]

    # ---- GRU layer-0 input projection, hoisted out of the recurrence --------
    gi_ref[...] = (jnp.dot(proj, wih0a_ref[...], preferred_element_type=f32)
                   + jnp.dot(idp_ref[...], wih0b_ref[...], preferred_element_type=f32)
                   + bih0_ref[...])

    # gate layout: per-direction slab [ r | z | n ], each 128 lanes wide.
    def gru_cell(gi, gh, h, bhn):
        r = jax.nn.sigmoid(gi[:, 0:h_g] + gh[:, 0:h_g])
        z = jax.nn.sigmoid(gi[:, LANE:LANE + h_g] + gh[:, LANE:LANE + h_g])
        n = jnp.tanh(gi[:, 2 * LANE:2 * LANE + h_g]
                     + r * (gh[:, 2 * LANE:2 * LANE + h_g] + bhn))
        return (1.0 - z) * n + z * h

    def bigru_layer(whh, bhnf, bhnb, out_f_ref, out_b_ref):
        hf = jnp.zeros((bpad, h_g), f32)
        hb = jnp.zeros((bpad, h_g), f32)
        for t in range(t_len):          # fully unrolled: t_len static & small
            rb = t_len - 1 - t
            # one fused recurrent matmul for BOTH directions per step
            hcat = jnp.concatenate([hf, hb], axis=0)                 # (2*bpad, h_g)
            gh = jnp.dot(hcat, whh, preferred_element_type=f32)      # (2*bpad, 2*GW)
            hf = gru_cell(gi_ref[t * bpad:(t + 1) * bpad, 0:GW],
                          gh[0:bpad, 0:GW], hf, bhnf)
            hb = gru_cell(gi_ref[rb * bpad:(rb + 1) * bpad, GW:2 * GW],
                          gh[bpad:2 * bpad, GW:2 * GW], hb, bhnb)
            if out_f_ref is not None:                  # tile-aligned scratch slabs
                out_f_ref[t * bpad:(t + 1) * bpad, :] = hf
                out_b_ref[rb * bpad:(rb + 1) * bpad, :] = hb
        return hf, hb

    # hoist b_hn broadcasts (JAX does not CSE broadcast_in_dim)
    bhn0f = jnp.broadcast_to(bhn0f_ref[...], (bpad, h_g))
    bhn0b = jnp.broadcast_to(bhn0b_ref[...], (bpad, h_g))
    bhn1f = jnp.broadcast_to(bhn1f_ref[...], (bpad, h_g))
    bhn1b = jnp.broadcast_to(bhn1b_ref[...], (bpad, h_g))

    bigru_layer(whh0_ref[...], bhn0f, bhn0b, of_ref, ob_ref)

    # ---- GRU layer-1 input projection (hoisted), reusing the gi scratch -----
    gi_ref[...] = (jnp.dot(of_ref[...], wih1f_ref[...], preferred_element_type=f32)
                   + jnp.dot(ob_ref[...], wih1b_ref[...], preferred_element_type=f32)
                   + bih1_ref[...])

    hf1, hb1 = bigru_layer(whh1_ref[...], bhn1f, bhn1b, None, None)

    # ---- classifier FC on cat(hidden[-2], hidden[-1]); lane-padded output ---
    o_ref[...] = (jnp.dot(hf1, woutf_ref[...], preferred_element_type=f32)
                  + jnp.dot(hb1, woutb_ref[...], preferred_element_type=f32)
                  + bout_ref[...])


def _pallas_fused_forward(x, idp, *weights, t_len, bpad, h_e, h_g):
    return pl.pallas_call(
        functools.partial(_fused_kernel, t_len, bpad, h_e, h_g),
        out_shape=jax.ShapeDtypeStruct((bpad, LANE), jnp.float32),
        in_specs=[VMEM_SPEC] * (2 + len(weights)),
        out_specs=VMEM_SPEC,
        scratch_shapes=[
            pltpu.VMEM((t_len * bpad, 2 * GW), jnp.float32),   # gi (both layers reuse)
            pltpu.VMEM((t_len * bpad, h_g), jnp.float32),      # layer-0 fwd outputs
            pltpu.VMEM((t_len * bpad, h_g), jnp.float32),      # layer-0 bwd outputs
        ],
        compiler_params=pltpu.CompilerParams(vmem_limit_bytes=32 * 1024 * 1024),
    )(x, idp, *weights)


# ---------------------- trace-time weight preparation -----------------------
def _pad_lanes(w, width=LANE):
    return jnp.pad(w, [(0, 0)] * (w.ndim - 1) + [(0, width - w.shape[-1])])


def _gate_blocks(w_f, w_b, h):
    """(In,3h) fwd/bwd -> (In, 6*128): per-gate 128-lane blocks [fr fz fn br bz bn]."""
    blocks = []
    for w in (w_f, w_b):
        for g in range(GATES):
            blocks.append(_pad_lanes(w[:, g * h:(g + 1) * h]))
    return jnp.concatenate(blocks, axis=-1)


def _gru_input_bias(b_ih_f, b_hh_f, b_ih_b, b_hh_b, h):
    """Fold b_hr/b_hz into the input bias; b_hn stays inside the r* term."""
    def fold(b_ih, b_hh):
        return jnp.concatenate([b_ih[:, 0:2 * h] + b_hh[:, 0:2 * h],
                                b_ih[:, 2 * h:3 * h]], axis=-1)
    return _gate_blocks(fold(b_ih_f, b_hh_f), fold(b_ih_b, b_hh_b), h)


def _igo_cols(w, h):
    # PyTorch LSTM gate order i,f,g,o; forget columns multiply c_prev == 0 -> drop.
    return jnp.concatenate([w[:, 0:h], w[:, 2 * h:4 * h]], axis=1)


def gru_classifier_forward_fused(params, elmo_chars, idp_tokens):
    B, S, _ = elmo_chars.shape
    H = params["elmo_w_ih_l0_t"].shape[1] // 4        # ELMo hidden (== ELMo emb dim)
    E = params["elmo_char_emb"].shape[1]
    assert E == H, "get_hiddens concat requires ELMo emb dim == ELMo hidden dim"
    HID = params["gru_w_hh_l0_t"].shape[0]
    P = params["task_fc_w_t"].shape[1]
    OUT = params["out_fc_w_t"].shape[1]
    BP = max(8, ((B + 7) // 8) * 8)                   # sublane-aligned batch pad

    # ---- embedding gathers stay in XLA ----
    # TODO(synk): real ELMo char-CNN embedding is model-specific; synthesized as a
    # sum of character embeddings (identical to the reference path).
    x_all = jnp.sum(params["elmo_char_emb"][elmo_chars], axis=2)        # (B, S, E)
    x_sb = jnp.pad(x_all.transpose(1, 0, 2), ((0, 0), (0, BP - B), (0, 0)))
    x_sb = x_sb.reshape(S * BP, E)                                      # seq-major rows
    idp = jnp.pad(params["idp_emb"][idp_tokens], ((0, 0), (0, BP - B), (0, 0)))
    idp = idp.reshape(S * BP, -1)

    # ---- ELMo biLSTM weights: concat fwd+bwd, drop forget gate ----
    ew0 = jnp.concatenate([_igo_cols(params["elmo_w_ih_l0_t"], H),
                           _igo_cols(params["elmo_w_ih_l0r_t"], H)], axis=1)   # (E, 6H)
    eb0 = jnp.concatenate([_igo_cols(params["elmo_b_l0"], H),
                           _igo_cols(params["elmo_b_l0r"], H)], axis=1)
    ew1 = jnp.concatenate([_igo_cols(params["elmo_w_ih_l1_t"], H),
                           _igo_cols(params["elmo_w_ih_l1r_t"], H)], axis=1)   # (2H, 6H)
    eb1 = jnp.concatenate([_igo_cols(params["elmo_b_l1"], H),
                           _igo_cols(params["elmo_b_l1r"], H)], axis=1)

    # ---- fold gamma * softmax(task_tensor) layer-mix into the task FC ----
    s = jax.nn.softmax(params["task_tensor"], axis=0)[:, 0]             # (3,)
    g = params["task_gamma"][0]
    W = params["task_fc_w_t"]                                           # (2H, P)
    Wt, Wb = W[:H], W[H:]
    wp = jnp.concatenate([
        g * s[0] * (Wt + Wb),     # rows for x   ([x, x] duplication folded, E == H)
        g * s[1] * Wt,            # rows for h_l0f
        g * s[2] * Wt,            # rows for h_l0b
        g * s[1] * Wb,            # rows for h_l1f
        g * s[2] * Wb,            # rows for h_l1b
    ], axis=0)                                                          # (E+4H, P)
    pb = params["task_fc_b"]

    # ---- GRU: fused directions, per-gate 128-lane blocks, folded r/z biases ----
    wih0a = _gate_blocks(params["gru_w_ih_l0_t"][:P], params["gru_w_ih_l0r_t"][:P], HID)
    wih0b = _gate_blocks(params["gru_w_ih_l0_t"][P:], params["gru_w_ih_l0r_t"][P:], HID)
    bih0 = _gru_input_bias(params["gru_b_ih_l0"], params["gru_b_hh_l0"],
                           params["gru_b_ih_l0r"], params["gru_b_hh_l0r"], HID)
    whh0 = _gate_blocks(params["gru_w_hh_l0_t"], params["gru_w_hh_l0r_t"], HID)
    bhn0f = params["gru_b_hh_l0"][:, 2 * HID:3 * HID]
    bhn0b = params["gru_b_hh_l0r"][:, 2 * HID:3 * HID]

    wih1f = _gate_blocks(params["gru_w_ih_l1_t"][:HID], params["gru_w_ih_l1r_t"][:HID], HID)
    wih1b = _gate_blocks(params["gru_w_ih_l1_t"][HID:], params["gru_w_ih_l1r_t"][HID:], HID)
    bih1 = _gru_input_bias(params["gru_b_ih_l1"], params["gru_b_hh_l1"],
                           params["gru_b_ih_l1r"], params["gru_b_hh_l1r"], HID)
    whh1 = _gate_blocks(params["gru_w_hh_l1_t"], params["gru_w_hh_l1r_t"], HID)
    bhn1f = params["gru_b_hh_l1"][:, 2 * HID:3 * HID]
    bhn1b = params["gru_b_hh_l1r"][:, 2 * HID:3 * HID]

    woutf = _pad_lanes(params["out_fc_w_t"][:HID])                      # (HID, 128)
    woutb = _pad_lanes(params["out_fc_w_t"][HID:])
    bout = _pad_lanes(params["out_fc_b"])                               # (1, 128)

    out_pad = _pallas_fused_forward(
        x_sb, idp,
        ew0, eb0, ew1, eb1, wp, pb,
        wih0a, wih0b, bih0, whh0, bhn0f, bhn0b,
        wih1f, wih1b, bih1, whh1, bhn1f, bhn1b,
        woutf, woutb, bout,
        t_len=S, bpad=BP, h_e=H, h_g=HID)
    return out_pad[:B, :OUT]


# ------------------------ pure-JAX reference path ---------------------------
def ref_lstm_cell0(x, w_t, b_row, hidden):
    gates = x @ w_t + b_row
    h = hidden
    i = jax.nn.sigmoid(gates[:, 0:h])
    gg = jnp.tanh(gates[:, 2 * h:3 * h])
    o = jax.nn.sigmoid(gates[:, 3 * h:4 * h])
    return o * jnp.tanh(i * gg)


def ref_gru_dir(x, w_ih_t, w_hh_t, b_ih, b_hh):
    _, b, _ = x.shape
    h_dim = w_hh_t.shape[0]

    def step(h, x_t):
        gi = x_t @ w_ih_t + b_ih
        gh = h @ w_hh_t + b_hh
        r = jax.nn.sigmoid(gi[:, 0:h_dim] + gh[:, 0:h_dim])
        z = jax.nn.sigmoid(gi[:, h_dim:2 * h_dim] + gh[:, h_dim:2 * h_dim])
        n = jnp.tanh(gi[:, 2 * h_dim:3 * h_dim] + r * gh[:, 2 * h_dim:3 * h_dim])
        h2 = (1.0 - z) * n + z * h
        return h2, h2

    h_last, outs = jax.lax.scan(step, jnp.zeros((b, h_dim), jnp.float32), x)
    return outs, h_last


def gru_classifier_forward_ref(params, elmo_chars, idp_tokens):
    B, S, _ = elmo_chars.shape
    H = params["elmo_w_ih_l0_t"].shape[1] // 4

    x_all = jnp.sum(params["elmo_char_emb"][elmo_chars], axis=2)        # (B, S, E)
    x_flat = x_all.reshape(B * S, -1)
    h_l0f = ref_lstm_cell0(x_flat, params["elmo_w_ih_l0_t"], params["elmo_b_l0"], H)
    h_l0b = ref_lstm_cell0(x_flat, params["elmo_w_ih_l0r_t"], params["elmo_b_l0r"], H)
    in_l1 = jnp.concatenate([h_l0f, h_l0b], axis=-1)
    h_l1f = ref_lstm_cell0(in_l1, params["elmo_w_ih_l1_t"], params["elmo_b_l1"], H)
    h_l1b = ref_lstm_cell0(in_l1, params["elmo_w_ih_l1r_t"], params["elmo_b_l1r"], H)
    hiddens = jnp.stack([h_l0f, h_l0b, h_l1f, h_l1b], axis=1).reshape(B, S, 4, H)
    fh, bh = hiddens[:, :, :2, :], hiddens[:, :, 2:, :]
    s_lstm = jnp.concatenate([fh, bh], axis=3)                          # (B,S,2,2H)
    embs = x_all[:, :, None, :]
    s_embs = jnp.concatenate([embs, embs], axis=3)                      # (B,S,1,2E)
    elmo_hiddens = jnp.concatenate([s_embs, s_lstm], axis=2)            # (B,S,3,2H)

    task_s = jax.nn.softmax(params["task_tensor"], axis=0)[:, 0]        # (3,)
    mixed = params["task_gamma"][0] * jnp.einsum(
        "l,nle->ne", task_s, elmo_hiddens.reshape(B * S, 3, 2 * H))
    proj = mixed @ params["task_fc_w_t"] + params["task_fc_b"]
    elmo_emb = proj.reshape(B, S, -1).transpose(1, 0, 2)                # (S, B, P)

    idp = params["idp_emb"][idp_tokens]
    layer_in = jnp.concatenate([elmo_emb, idp], axis=-1)

    h_finals = []
    for l in range(2):
        of, hf = ref_gru_dir(layer_in,
                             params[f"gru_w_ih_l{l}_t"], params[f"gru_w_hh_l{l}_t"],
                             params[f"gru_b_ih_l{l}"], params[f"gru_b_hh_l{l}"])
        ob_rev, hb = ref_gru_dir(layer_in[::-1],
                                 params[f"gru_w_ih_l{l}r_t"], params[f"gru_w_hh_l{l}r_t"],
                                 params[f"gru_b_ih_l{l}r"], params[f"gru_b_hh_l{l}r"])
        ob = ob_rev[::-1]
        layer_in = jnp.concatenate([of, ob], axis=-1)
        h_finals.extend([hf, hb])

    last_hiddens = jnp.concatenate([h_finals[-2], h_finals[-1]], axis=-1)
    return last_hiddens @ params["out_fc_w_t"] + params["out_fc_b"]


# ------------------------------- parameters ---------------------------------
def init_params(key):
    E = H_ELMO = 16      # ELMo emb dim == ELMo LSTM hidden (required by get_hiddens concat)
    P = 32               # elmo_projection_dim
    EMB = 16             # idp word-embedding dim
    HID = 32             # GRU hidden
    OUT = 4              # output_dim
    CHAR_V, TOK_V = 30, 40

    keys = iter(jax.random.split(key, 64))

    def W(shape, scale=0.1):
        return jax.random.normal(next(keys), shape, jnp.float32) * scale

    p = {}
    p["elmo_char_emb"] = W((CHAR_V, E), 0.3)
    for name, in_dim in [("l0", E), ("l0r", E), ("l1", 2 * H_ELMO), ("l1r", 2 * H_ELMO)]:
        p[f"elmo_w_ih_{name}_t"] = W((in_dim, 4 * H_ELMO))
        p[f"elmo_b_{name}"] = W((1, 4 * H_ELMO))          # b_ih + b_hh combined (h0=c0=0)

    p["task_gamma"] = jnp.ones((1,), jnp.float32)
    p["task_tensor"] = jnp.ones((3, 1), jnp.float32)
    p["task_fc_w_t"] = W((2 * H_ELMO, P))
    p["task_fc_b"] = W((1, P))

    idp = W((TOK_V, EMB), 0.3)
    p["idp_emb"] = idp.at[0].set(0.0)                     # padding_idx = 0

    gru_in = [P + EMB, 2 * HID]
    for l in range(2):
        for suf in ["", "r"]:
            p[f"gru_w_ih_l{l}{suf}_t"] = W((gru_in[l], 3 * HID))
            p[f"gru_w_hh_l{l}{suf}_t"] = W((HID, 3 * HID))
            p[f"gru_b_ih_l{l}{suf}"] = W((1, 3 * HID))
            p[f"gru_b_hh_l{l}{suf}"] = W((1, 3 * HID))

    p["out_fc_w_t"] = W((2 * HID, OUT))
    p["out_fc_b"] = W((1, OUT))
    return p


# ---------------------------------- main -------------------------------------
if __name__ == "__main__":
    key = jax.random.PRNGKey(0)
    kp, k1, k2 = jax.random.split(key, 3)
    params = init_params(kp)

    B, S, C = 2, 8, 5
    elmo_character_input = jax.random.randint(k1, (B, S, C), 1, 30)   # (batch, steps, chars)
    independent_input = jax.random.randint(k2, (S, B), 0, 40)         # (steps, batch)

    fused = jax.jit(gru_classifier_forward_fused)
    out = jax.block_until_ready(fused(params, elmo_character_input, independent_input))
    ref = jax.block_until_ready(
        gru_classifier_forward_ref(params, elmo_character_input, independent_input))

    assert out.shape == (B, 4), out.shape
    assert bool(jnp.all(jnp.isfinite(out)))
    assert bool(jnp.allclose(out, ref, atol=1e-3, rtol=1e-3)), (out, ref)
    print("KERNEL_OK")
</pallas_src>

<mosaic_0001>
module attributes {stable_mosaic.version = 11 : i64} {
  func.func @_fused_kernel(%arg0: memref<64x16xf32, #tpu.memory_space<vmem>>, %arg1: memref<64x16xf32, #tpu.memory_space<vmem>>, %arg2: memref<16x96xf32, #tpu.memory_space<vmem>>, %arg3: memref<1x96xf32, #tpu.memory_space<vmem>>, %arg4: memref<32x96xf32, #tpu.memory_space<vmem>>, %arg5: memref<1x96xf32, #tpu.memory_space<vmem>>, %arg6: memref<80x32xf32, #tpu.memory_space<vmem>>, %arg7: memref<1x32xf32, #tpu.memory_space<vmem>>, %arg8: memref<32x768xf32, #tpu.memory_space<vmem>>, %arg9: memref<16x768xf32, #tpu.memory_space<vmem>>, %arg10: memref<1x768xf32, #tpu.memory_space<vmem>>, %arg11: memref<32x768xf32, #tpu.memory_space<vmem>>, %arg12: memref<1x32xf32, #tpu.memory_space<vmem>>, %arg13: memref<1x32xf32, #tpu.memory_space<vmem>>, %arg14: memref<32x768xf32, #tpu.memory_space<vmem>>, %arg15: memref<32x768xf32, #tpu.memory_space<vmem>>, %arg16: memref<1x768xf32, #tpu.memory_space<vmem>>, %arg17: memref<32x768xf32, #tpu.memory_space<vmem>>, %arg18: memref<1x32xf32, #tpu.memory_space<vmem>>, %arg19: memref<1x32xf32, #tpu.memory_space<vmem>>, %arg20: memref<32x128xf32, #tpu.memory_space<vmem>>, %arg21: memref<32x128xf32, #tpu.memory_space<vmem>>, %arg22: memref<1x128xf32, #tpu.memory_space<vmem>>, %arg23: memref<8x128xf32, #tpu.memory_space<vmem>>, %arg24: memref<64x768xf32, #tpu.memory_space<vmem>>, %arg25: memref<64x32xf32, #tpu.memory_space<vmem>>, %arg26: memref<64x32xf32, #tpu.memory_space<vmem>>) attributes {dimension_semantics = [], scalar_prefetch = 0 : i64, scratch_operands = 3 : i64, tpu.core_type = #tpu.core_type<tc>} {
    %c0 = arith.constant 0 : index
    %c0_0 = arith.constant 0 : index
    %0 = vector.load %arg0[%c0, %c0_0] : memref<64x16xf32, #tpu.memory_space<vmem>>, vector<64x16xf32>
    %c0_1 = arith.constant 0 : index
    %c0_2 = arith.constant 0 : index
    %1 = vector.load %arg2[%c0_1, %c0_2] : memref<16x96xf32, #tpu.memory_space<vmem>>, vector<16x96xf32>
    %cst = arith.constant dense<0.000000e+00> : vector<64x96xf32>
    %2 = tpu.matmul %0, %1, %cst {dimension_numbers = #tpu.dot_dimension_numbers<[1], [0], [0], [1], [0, 0, 1, 1], [], []>} : vector<64x16xf32>, vector<16x96xf32>, vector<64x96xf32> -> vector<64x96xf32>
    %c0_3 = arith.constant 0 : index
    %c0_4 = arith.constant 0 : index
    %3 = vector.load %arg3[%c0_3, %c0_4] : memref<1x96xf32, #tpu.memory_space<vmem>>, vector<1x96xf32>
    %4 = vector.broadcast %3 : vector<1x96xf32> to vector<64x96xf32>
    %5 = arith.addf %2, %4 : vector<64x96xf32>
    %6 = vector.extract_strided_slice %5 {offsets = [0, 0], sizes = [64, 48], strides = [1, 1]} : vector<64x96xf32> to vector<64x48xf32>
    %7 = vector.extract_strided_slice %6 {offsets = [0, 0], sizes = [64, 16], strides = [1, 1]} : vector<64x48xf32> to vector<64x16xf32>
    %8 = arith.negf %7 : vector<64x16xf32>
    %9 = math.exp %8 : vector<64x16xf32>
    %cst_5 = arith.constant 1.000000e+00 : f32
    %10 = vector.broadcast %cst_5 : f32 to vector<64x16xf32>
    %11 = arith.addf %10, %9 : vector<64x16xf32>
    %12 = arith.divf %10, %11 : vector<64x16xf32>
    %13 = vector.extract_strided_slice %6 {offsets = [0, 16], sizes = [64, 16], strides = [1, 1]} : vector<64x48xf32> to vector<64x16xf32>
    %14 = math.tanh %13 : vector<64x16xf32>
    %15 = arith.mulf %12, %14 : vector<64x16xf32>
    %16 = vector.extract_strided_slice %6 {offsets = [0, 32], sizes = [64, 16], strides = [1, 1]} : vector<64x48xf32> to vector<64x16xf32>
    %17 = arith.negf %16 : vector<64x16xf32>
    %18 = math.exp %17 : vector<64x16xf32>
    %cst_6 = arith.constant 1.000000e+00 : f32
    %19 = vector.broadcast %cst_6 : f32 to vector<64x16xf32>
    %20 = arith.addf %19, %18 : vector<64x16xf32>
    %21 = arith.divf %19, %20 : vector<64x16xf32>
    %22 = math.tanh %15 : vector<64x16xf32>
    %23 = arith.mulf %21, %22 : vector<64x16xf32>
    %24 = vector.extract_strided_slice %5 {offsets = [0, 48], sizes = [64, 48], strides = [1, 1]} : vector<64x96xf32> to vector<64x48xf32>
    %25 = vector.extract_strided_slice %24 {offsets = [0, 0], sizes = [64, 16], strides = [1, 1]} : vector<64x48xf32> to vector<64x16xf32>
    %26 = arith.negf %25 : vector<64x16xf32>
    %27 = math.exp %26 : vector<64x16xf32>
    %cst_7 = arith.constant 1.000000e+00 : f32
    %28 = vector.broadcast %cst_7 : f32 to vector<64x16xf32>
    %29 = arith.addf %28, %27 : vector<64x16xf32>
    %30 = arith.divf %28, %29 : vector<64x16xf32>
    %31 = vector.extract_strided_slice %24 {offsets = [0, 16], sizes = [64, 16], strides = [1, 1]} : vector<64x48xf32> to vector<64x16xf32>
    %32 = math.tanh %31 : vector<64x16xf32>
    %33 = arith.mulf %30, %32 : vector<64x16xf32>
    %34 = vector.extract_strided_slice %24 {offsets = [0, 32], sizes = [64, 16], strides = [1, 1]} : vector<64x48xf32> to vector<64x16xf32>
    %35 = arith.negf %34 : vector<64x16xf32>
    %36 = math.exp %35 : vector<64x16xf32>
    %cst_8 = arith.constant 1.000000e+00 : f32
    %37 = vector.broadcast %cst_8 : f32 to vector<64x16xf32>
    %38 = arith.addf %37, %36 : vector<64x16xf32>
    %39 = arith.divf %37, %38 : vector<64x16xf32>
    %40 = math.tanh %33 : vector<64x16xf32>
    %41 = arith.mulf %39, %40 : vector<64x16xf32>
    %42 = tpu.concatenate %23, %41 in 1 : vector<64x16xf32>, vector<64x16xf32> -> vector<64x32xf32>
    %c0_9 = arith.constant 0 : index
    %c0_10 = arith.constant 0 : index
    %43 = vector.load %arg4[%c0_9, %c0_10] : memref<32x96xf32, #tpu.memory_space<vmem>>, vector<32x96xf32>
    %cst_11 = arith.constant dense<0.000000e+00> : vector<64x96xf32>
    %44 = tpu.matmul %42, %43, %cst_11 {dimension_numbers = #tpu.dot_dimension_numbers<[1], [0], [0], [1], [0, 0, 1, 1], [], []>} : vector<64x32xf32>, vector<32x96xf32>, vector<64x96xf32> -> vector<64x96xf32>
    %c0_12 = arith.constant 0 : index
    %c0_13 = arith.constant 0 : index
    %45 = vector.load %arg5[%c0_12, %c0_13] : memref<1x96xf32, #tpu.memory_space<vmem>>, vector<1x96xf32>
    %46 = vector.broadcast %45 : vector<1x96xf32> to vector<64x96xf32>
    %47 = arith.addf %44, %46 : vector<64x96xf32>
    %48 = vector.extract_strided_slice %47 {offsets = [0, 0], sizes = [64, 48], strides = [1, 1]} : vector<64x96xf32> to vector<64x48xf32>
    %49 = vector.extract_strided_slice %48 {offsets = [0, 0], sizes = [64, 16], strides = [1, 1]} : vector<64x48xf32> to vector<64x16xf32>
    %50 = arith.negf %49 : vector<64x16xf32>
    %51 = math.exp %50 : vector<64x16xf32>
    %cst_14 = arith.constant 1.000000e+00 : f32
    %52 = vector.broadcast %cst_14 : f32 to vector<64x16xf32>
    %53 = arith.addf %52, %51 : vector<64x16xf32>
    %54 = arith.divf %52, %53 : vector<64x16xf32>
    %55 = vector.extract_strided_slice %48 {offsets = [0, 16], sizes = [64, 16], strides = [1, 1]} : vector<64x48xf32> to vector<64x16xf32>
    %56 = math.tanh %55 : vector<64x16xf32>
    %57 = arith.mulf %54, %56 : vector<64x16xf32>
    %58 = vector.extract_strided_slice %48 {offsets = [0, 32], sizes = [64, 16], strides = [1, 1]} : vector<64x48xf32> to vector<64x16xf32>
    %59 = arith.negf %58 : vector<64x16xf32>
    %60 = math.exp %59 : vector<64x16xf32>
    %cst_15 = arith.constant 1.000000e+00 : f32
    %61 = vector.broadcast %cst_15 : f32 to vector<64x16xf32>
    %62 = arith.addf %61, %60 : vector<64x16xf32>
    %63 = arith.divf %61, %62 : vector<64x16xf32>
    %64 = math.tanh %57 : vector<64x16xf32>
    %65 = arith.mulf %63, %64 : vector<64x16xf32>
    %66 = vector.extract_strided_slice %47 {offsets = [0, 48], sizes = [64, 48], strides = [1, 1]} : vector<64x96xf32> to vector<64x48xf32>
    %67 = vector.extract_strided_slice %66 {offsets = [0, 0], sizes = [64, 16], strides = [1, 1]} : vector<64x48xf32> to vector<64x16xf32>
    %68 = arith.negf %67 : vector<64x16xf32>
    %69 = math.exp %68 : vector<64x16xf32>
    %cst_16 = arith.constant 1.000000e+00 : f32
    %70 = vector.broadcast %cst_16 : f32 to vector<64x16xf32>
    %71 = arith.addf %70, %69 : vector<64x16xf32>
    %72 = arith.divf %70, %71 : vector<64x16xf32>
    %73 = vector.extract_strided_slice %66 {offsets = [0, 16], sizes = [64, 16], strides = [1, 1]} : vector<64x48xf32> to vector<64x16xf32>
    %74 = math.tanh %73 : vector<64x16xf32>
    %75 = arith.mulf %72, %74 : vector<64x16xf32>
    %76 = vector.extract_strided_slice %66 {offsets = [0, 32], sizes = [64, 16], strides = [1, 1]} : vector<64x48xf32> to vector<64x16xf32>
    %77 = arith.negf %76 : vector<64x16xf32>
    %78 = math.exp %77 : vector<64x16xf32>
    %cst_17 = arith.constant 1.000000e+00 : f32
    %79 = vector.broadcast %cst_17 : f32 to vector<64x16xf32>
    %80 = arith.addf %79, %78 : vector<64x16xf32>
    %81 = arith.divf %79, %80 : vector<64x16xf32>
    %82 = math.tanh %75 : vector<64x16xf32>
    %83 = arith.mulf %81, %82 : vector<64x16xf32>
    %84 = tpu.concatenate %0, %23, %41, %65, %83 in 1 : vector<64x16xf32>, vector<64x16xf32>, vector<64x16xf32>, vector<64x16xf32>, vector<64x16xf32> -> vector<64x80xf32>
    %c0_18 = arith.constant 0 : index
    %c0_19 = arith.constant 0 : index
    %85 = vector.load %arg6[%c0_18, %c0_19] : memref<80x32xf32, #tpu.memory_space<vmem>>, vector<80x32xf32>
    %cst_20 = arith.constant dense<0.000000e+00> : vector<64x32xf32>
    %86 = tpu.matmul %84, %85, %cst_20 {dimension_numbers = #tpu.dot_dimension_numbers<[1], [0], [0], [1], [0, 0, 1, 1], [], []>} : vector<64x80xf32>, vector<80x32xf32>, vector<64x32xf32> -> vector<64x32xf32>
    %c0_21 = arith.constant 0 : index
    %c0_22 = arith.constant 0 : index
    %87 = vector.load %arg7[%c0_21, %c0_22] : memref<1x32xf32, #tpu.memory_space<vmem>>, vector<1x32xf32>
    %88 = vector.broadcast %87 : vector<1x32xf32> to vector<64x32xf32>
    %89 = arith.addf %86, %88 : vector<64x32xf32>
    %c0_23 = arith.constant 0 : index
    %c0_24 = arith.constant 0 : index
    %90 = vector.load %arg8[%c0_23, %c0_24] : memref<32x768xf32, #tpu.memory_space<vmem>>, vector<32x768xf32>
    %cst_25 = arith.constant dense<0.000000e+00> : vector<64x768xf32>
    %91 = tpu.matmul %89, %90, %cst_25 {dimension_numbers = #tpu.dot_dimension_numbers<[1], [0], [0], [1], [0, 0, 1, 1], [], []>} : vector<64x32xf32>, vector<32x768xf32>, vector<64x768xf32> -> vector<64x768xf32>
    %c0_26 = arith.constant 0 : index
    %c0_27 = arith.constant 0 : index
    %92 = vector.load %arg1[%c0_26, %c0_27] : memref<64x16xf32, #tpu.memory_space<vmem>>, vector<64x16xf32>
    %c0_28 = arith.constant 0 : index
    %c0_29 = arith.constant 0 : index
    %93 = vector.load %arg9[%c0_28, %c0_29] : memref<16x768xf32, #tpu.memory_space<vmem>>, vector<16x768xf32>
    %cst_30 = arith.constant dense<0.000000e+00> : vector<64x768xf32>
    %94 = tpu.matmul %92, %93, %cst_30 {dimension_numbers = #tpu.dot_dimension_numbers<[1], [0], [0], [1], [0, 0, 1, 1], [], []>} : vector<64x16xf32>, vector<16x768xf32>, vector<64x768xf32> -> vector<64x768xf32>
    %95 = arith.addf %91, %94 : vector<64x768xf32>
    %c0_31 = arith.constant 0 : index
    %c0_32 = arith.constant 0 : index
    %96 = vector.load %arg10[%c0_31, %c0_32] : memref<1x768xf32, #tpu.memory_space<vmem>>, vector<1x768xf32>
    %97 = vector.broadcast %96 : vector<1x768xf32> to vector<64x768xf32>
    %98 = arith.addf %95, %97 : vector<64x768xf32>
    %c0_33 = arith.constant 0 : index
    %c0_34 = arith.constant 0 : index
    %99 = vector.load %arg24[%c0_33, %c0_34] : memref<64x768xf32, #tpu.memory_space<vmem>>, vector<64x768xf32>
    tpu.vector_store %arg24[%c0_33, %c0_34], %98 {strides = array<i32>} : memref<64x768xf32, #tpu.memory_space<vmem>>, vector<64x768xf32>,
    %c0_35 = arith.constant 0 : index
    %c0_36 = arith.constant 0 : index
    %100 = vector.load %arg12[%c0_35, %c0_36] : memref<1x32xf32, #tpu.memory_space<vmem>>, vector<1x32xf32>
    %101 = vector.shape_cast %100 : vector<1x32xf32> to vector<1x32xf32>
    %102 = vector.broadcast %101 : vector<1x32xf32> to vector<8x32xf32>
    %c0_37 = arith.constant 0 : index
    %c0_38 = arith.constant 0 : index
    %103 = vector.load %arg13[%c0_37, %c0_38] : memref<1x32xf32, #tpu.memory_space<vmem>>, vector<1x32xf32>
    %104 = vector.shape_cast %103 : vector<1x32xf32> to vector<1x32xf32>
    %105 = vector.broadcast %104 : vector<1x32xf32> to vector<8x32xf32>
    %c0_39 = arith.constant 0 : index
    %c0_40 = arith.constant 0 : index
    %106 = vector.load %arg18[%c0_39, %c0_40] : memref<1x32xf32, #tpu.memory_space<vmem>>, vector<1x32xf32>
    %107 = vector.shape_cast %106 : vector<1x32xf32> to vector<1x32xf32>
    %108 = vector.broadcast %107 : vector<1x32xf32> to vector<8x32xf32>
    %c0_41 = arith.constant 0 : index
    %c0_42 = arith.constant 0 : index
    %109 = vector.load %arg19[%c0_41, %c0_42] : memref<1x32xf32, #tpu.memory_space<vmem>>, vector<1x32xf32>
    %110 = vector.shape_cast %109 : vector<1x32xf32> to vector<1x32xf32>
    %111 = vector.broadcast %110 : vector<1x32xf32> to vector<8x32xf32>
    %c0_43 = arith.constant 0 : index
    %c0_44 = arith.constant 0 : index
    %112 = vector.load %arg11[%c0_43, %c0_44] : memref<32x768xf32, #tpu.memory_space<vmem>>, vector<32x768xf32>
    %cst_45 = arith.constant 0.000000e+00 : f32
    %113 = vector.broadcast %cst_45 : f32 to vector<8x32xf32>
    %cst_46 = arith.constant 0.000000e+00 : f32
    %114 = vector.broadcast %cst_46 : f32 to vector<8x32xf32>
    %115 = tpu.concatenate %113, %114 in 0 : vector<8x32xf32>, vector<8x32xf32> -> vector<16x32xf32>
    %cst_47 = arith.constant dense<0.000000e+00> : vector<16x768xf32>
    %116 = tpu.matmul %115, %112, %cst_47 {dimension_numbers = #tpu.dot_dimension_numbers<[1], [0], [0], [1], [0, 0, 1, 1], [], []>} : vector<16x32xf32>, vector<32x768xf32>, vector<16x768xf32> -> vector<16x768xf32>
    %c0_48 = arith.constant 0 : index
    %c0_49 = arith.constant 0 : index
    %117 = vector.load %arg24[%c0_48, %c0_49] : memref<64x768xf32, #tpu.memory_space<vmem>>, vector<8x384xf32>
    %118 = vector.extract_strided_slice %116 {offsets = [0, 0], sizes = [8, 384], strides = [1, 1]} : vector<16x768xf32> to vector<8x384xf32>
    %119 = vector.extract_strided_slice %117 {offsets = [0, 0], sizes = [8, 32], strides = [1, 1]} : vector<8x384xf32> to vector<8x32xf32>
    %120 = vector.extract_strided_slice %118 {offsets = [0, 0], sizes = [8, 32], strides = [1, 1]} : vector<8x384xf32> to vector<8x32xf32>
    %121 = arith.addf %119, %120 : vector<8x32xf32>
    %122 = arith.negf %121 : vector<8x32xf32>
    %123 = math.exp %122 : vector<8x32xf32>
    %cst_50 = arith.constant 1.000000e+00 : f32
    %124 = vector.broadcast %cst_50 : f32 to vector<8x32xf32>
    %125 = arith.addf %124, %123 : vector<8x32xf32>
    %126 = arith.divf %124, %125 : vector<8x32xf32>
    %127 = vector.extract_strided_slice %117 {offsets = [0, 128], sizes = [8, 32], strides = [1, 1]} : vector<8x384xf32> to vector<8x32xf32>
    %128 = vector.extract_strided_slice %118 {offsets = [0, 128], sizes = [8, 32], strides = [1, 1]} : vector<8x384xf32> to vector<8x32xf32>
    %129 = arith.addf %127, %128 : vector<8x32xf32>
    %130 = arith.negf %129 : vector<8x32xf32>
    %131 = math.exp %130 : vector<8x32xf32>
    %cst_51 = arith.constant 1.000000e+00 : f32
    %132 = vector.broadcast %cst_51 : f32 to vector<8x32xf32>
    %133 = arith.addf %132, %131 : vector<8x32xf32>
    %134 = arith.divf %132, %133 : vector<8x32xf32>
    %135 = vector.extract_strided_slice %117 {offsets = [0, 256], sizes = [8, 32], strides = [1, 1]} : vector<8x384xf32> to vector<8x32xf32>
    %136 = vector.extract_strided_slice %118 {offsets = [0, 256], sizes = [8, 32], strides = [1, 1]} : vector<8x384xf32> to vector<8x32xf32>
    %137 = arith.addf %136, %102 : vector<8x32xf32>
    %138 = arith.mulf %126, %137 : vector<8x32xf32>
    %139 = arith.addf %135, %138 : vector<8x32xf32>
    %140 = math.tanh %139 : vector<8x32xf32>
    %cst_52 = arith.constant 1.000000e+00 : f32
    %141 = vector.broadcast %cst_52 : f32 to vector<8x32xf32>
    %142 = arith.subf %141, %134 : vector<8x32xf32>
    %143 = arith.mulf %142, %140 : vector<8x32xf32>
    %144 = arith.mulf %134, %113 : vector<8x32xf32>
    %145 = arith.addf %143, %144 : vector<8x32xf32>
    %c56 = arith.constant 56 : index
    %c384 = arith.constant 384 : index
    %146 = vector.load %arg24[%c56, %c384] : memref<64x768xf32, #tpu.memory_space<vmem>>, vector<8x384xf32>
    %147 = vector.extract_strided_slice %116 {offsets = [8, 384], sizes = [8, 384], strides = [1, 1]} : vector<16x768xf32> to vector<8x384xf32>
    %148 = vector.extract_strided_slice %146 {offsets = [0, 0], sizes = [8, 32], strides = [1, 1]} : vector<8x384xf32> to vector<8x32xf32>
    %149 = vector.extract_strided_slice %147 {offsets = [0, 0], sizes = [8, 32], strides = [1, 1]} : vector<8x384xf32> to vector<8x32xf32>
    %150 = arith.addf %148, %149 : vector<8x32xf32>
    %151 = arith.negf %150 : vector<8x32xf32>
    %152 = math.exp %151 : vector<8x32xf32>
    %cst_53 = arith.constant 1.000000e+00 : f32
    %153 = vector.broadcast %cst_53 : f32 to vector<8x32xf32>
    %154 = arith.addf %153, %152 : vector<8x32xf32>
    %155 = arith.divf %153, %154 : vector<8x32xf32>
    %156 = vector.extract_strided_slice %146 {offsets = [0, 128], sizes = [8, 32], strides = [1, 1]} : vector<8x384xf32> to vector<8x32xf32>
    %157 = vector.extract_strided_slice %147 {offsets = [0, 128], sizes = [8, 32], strides = [1, 1]} : vector<8x384xf32> to vector<8x32xf32>
    %158 = arith.addf %156, %157 : vector<8x32xf32>
    %159 = arith.negf %158 : vector<8x32xf32>
    %160 = math.exp %159 : vector<8x32xf32>
    %cst_54 = arith.constant 1.000000e+00 : f32
    %161 = vector.broadcast %cst_54 : f32 to vector<8x32xf32>
    %162 = arith.addf %161, %160 : vector<8x32xf32>
    %163 = arith.divf %161, %162 : vector<8x32xf32>
    %164 = vector.extract_strided_slice %146 {offsets = [0, 256], sizes = [8, 32], strides = [1, 1]} : vector<8x384xf32> to vector<8x32xf32>
    %165 = vector.extract_strided_slice %147 {offsets = [0, 256], sizes = [8, 32], strides = [1, 1]} : vector<8x384xf32> to vector<8x32xf32>
    %166 = arith.addf %165, %105 : vector<8x32xf32>
    %167 = arith.mulf %155, %166 : vector<8x32xf32>
    %168 = arith.addf %164, %167 : vector<8x32xf32>
    %169 = math.tanh %168 : vector<8x32xf32>
    %cst_55 = arith.constant 1.000000e+00 : f32
    %170 = vector.broadcast %cst_55 : f32 to vector<8x32xf32>
    %171 = arith.subf %170, %163 : vector<8x32xf32>
    %172 = arith.mulf %171, %169 : vector<8x32xf32>
    %173 = arith.mulf %163, %114 : vector<8x32xf32>
    %174 = arith.addf %172, %173 : vector<8x32xf32>
    %c0_56 = arith.constant 0 : index
    %c0_57 = arith.constant 0 : index
    %175 = vector.load %arg25[%c0_56, %c0_57] : memref<64x32xf32, #tpu.memory_space<vmem>>, vector<8x32xf32>
    tpu.vector_store %arg25[%c0_56, %c0_57], %145 {strides = array<i32>} : memref<64x32xf32, #tpu.memory_space<vmem>>, vector<8x32xf32>,
    %c56_58 = arith.constant 56 : index
    %c0_59 = arith.constant 0 : index
    %176 = vector.load %arg26[%c56_58, %c0_59] : memref<64x32xf32, #tpu.memory_space<vmem>>, vector<8x32xf32>
    tpu.vector_store %arg26[%c56_58, %c0_59], %174 {strides = array<i32>} : memref<64x32xf32, #tpu.memory_space<vmem>>, vector<8x32xf32>,
    %177 = tpu.concatenate %145, %174 in 0 : vector<8x32xf32>, vector<8x32xf32> -> vector<16x32xf32>
    %cst_60 = arith.constant dense<0.000000e+00> : vector<16x768xf32>
    %178 = tpu.matmul %177, %112, %cst_60 {dimension_numbers = #tpu.dot_dimension_numbers<[1], [0], [0], [1], [0, 0, 1, 1], [], []>} : vector<16x32xf32>, vector<32x768xf32>, vector<16x768xf32> -> vector<16x768xf32>
    %c8 = arith.constant 8 : index
    %c0_61 = arith.constant 0 : index
    %179 = vector.load %arg24[%c8, %c0_61] : memref<64x768xf32, #tpu.memory_space<vmem>>, vector<8x384xf32>
    %180 = vector.extract_strided_slice %178 {offsets = [0, 0], sizes = [8, 384], strides = [1, 1]} : vector<16x768xf32> to vector<8x384xf32>
    %181 = vector.extract_strided_slice %179 {offsets = [0, 0], sizes = [8, 32], strides = [1, 1]} : vector<8x384xf32> to vector<8x32xf32>
    %182 = vector.extract_strided_slice %180 {offsets = [0, 0], sizes = [8, 32], strides = [1, 1]} : vector<8x384xf32> to vector<8x32xf32>
    %183 = arith.addf %181, %182 : vector<8x32xf32>
    %184 = arith.negf %183 : vector<8x32xf32>
    %185 = math.exp %184 : vector<8x32xf32>
    %cst_62 = arith.constant 1.000000e+00 : f32
    %186 = vector.broadcast %cst_62 : f32 to vector<8x32xf32>
    %187 = arith.addf %186, %185 : vector<8x32xf32>
    %188 = arith.divf %186, %187 : vector<8x32xf32>
    %189 = vector.extract_strided_slice %179 {offsets = [0, 128], sizes = [8, 32], strides = [1, 1]} : vector<8x384xf32> to vector<8x32xf32>
    %190 = vector.extract_strided_slice %180 {offsets = [0, 128], sizes = [8, 32], strides = [1, 1]} : vector<8x384xf32> to vector<8x32xf32>
    %191 = arith.addf %189, %190 : vector<8x32xf32>
    %192 = arith.negf %191 : vector<8x32xf32>
    %193 = math.exp %192 : vector<8x32xf32>
    %cst_63 = arith.constant 1.000000e+00 : f32
    %194 = vector.broadcast %cst_63 : f32 to vector<8x32xf32>
    %195 = arith.addf %194, %193 : vector<8x32xf32>
    %196 = arith.divf %194, %195 : vector<8x32xf32>
    %197 = vector.extract_strided_slice %179 {offsets = [0, 256], sizes = [8, 32], strides = [1, 1]} : vector<8x384xf32> to vector<8x32xf32>
    %198 = vector.extract_strided_slice %180 {offsets = [0, 256], sizes = [8, 32], strides = [1, 1]} : vector<8x384xf32> to vector<8x32xf32>
    %199 = arith.addf %198, %102 : vector<8x32xf32>
    %200 = arith.mulf %188, %199 : vector<8x32xf32>
    %201 = arith.addf %197, %200 : vector<8x32xf32>
    %202 = math.tanh %201 : vector<8x32xf32>
    %cst_64 = arith.constant 1.000000e+00 : f32
    %203 = vector.broadcast %cst_64 : f32 to vector<8x32xf32>
    %204 = arith.subf %203, %196 : vector<8x32xf32>
    %205 = arith.mulf %204, %202 : vector<8x32xf32>
    %206 = arith.mulf %196, %145 : vector<8x32xf32>
    %207 = arith.addf %205, %206 : vector<8x32xf32>
    %c48 = arith.constant 48 : index
    %c384_65 = arith.constant 384 : index
    %208 = vector.load %arg24[%c48, %c384_65] : memref<64x768xf32, #tpu.memory_space<vmem>>, vector<8x384xf32>
    %209 = vector.extract_strided_slice %178 {offsets = [8, 384], sizes = [8, 384], strides = [1, 1]} : vector<16x768xf32> to vector<8x384xf32>
    %210 = vector.extract_strided_slice %208 {offsets = [0, 0], sizes = [8, 32], strides = [1, 1]} : vector<8x384xf32> to vector<8x32xf32>
    %211 = vector.extract_strided_slice %209 {offsets = [0, 0], sizes = [8, 32], strides = [1, 1]} : vector<8x384xf32> to vector<8x32xf32>
    %212 = arith.addf %210, %211 : vector<8x32xf32>
    %213 = arith.negf %212 : vector<8x32xf32>
    %214 = math.exp %213 : vector<8x32xf32>
    %cst_66 = arith.constant 1.000000e+00 : f32
    %215 = vector.broadcast %cst_66 : f32 to vector<8x32xf32>
    %216 = arith.addf %215, %214 : vector<8x32xf32>
    %217 = arith.divf %215, %216 : vector<8x32xf32>
    %218 = vector.extract_strided_slice %208 {offsets = [0, 128], sizes = [8, 32], strides = [1, 1]} : vector<8x384xf32> to vector<8x32xf32>
    %219 = vector.extract_strided_slice %209 {offsets = [0, 128], sizes = [8, 32], strides = [1, 1]} : vector<8x384xf32> to vector<8x32xf32>
    %220 = arith.addf %218, %219 : vector<8x32xf32>
    %221 = arith.negf %220 : vector<8x32xf32>
    %222 = math.exp %221 : vector<8x32xf32>
    %cst_67 = arith.constant 1.000000e+00 : f32
    %223 = vector.broadcast %cst_67 : f32 to vector<8x32xf32>
    %224 = arith.addf %223, %222 : vector<8x32xf32>
    %225 = arith.divf %223, %224 : vector<8x32xf32>
    %226 = vector.extract_strided_slice %208 {offsets = [0, 256], sizes = [8, 32], strides = [1, 1]} : vector<8x384xf32> to vector<8x32xf32>
    %227 = vector.extract_strided_slice %209 {offsets = [0, 256], sizes = [8, 32], strides = [1, 1]} : vector<8x384xf32> to vector<8x32xf32>
    %228 = arith.addf %227, %105 : vector<8x32xf32>
    %229 = arith.mulf %217, %228 : vector<8x32xf32>
    %230 = arith.addf %226, %229 : vector<8x32xf32>
    %231 = math.tanh %230 : vector<8x32xf32>
    %cst_68 = arith.constant 1.000000e+00 : f32
    %232 = vector.broadcast %cst_68 : f32 to vector<8x32xf32>
    %233 = arith.subf %232, %225 : vector<8x32xf32>
    %234 = arith.mulf %233, %231 : vector<8x32xf32>
    %235 = arith.mulf %225, %174 : vector<8x32xf32>
    %236 = arith.addf %234, %235 : vector<8x32xf32>
    %c8_69 = arith.constant 8 : index
    %c0_70 = arith.constant 0 : index
    %237 = vector.load %arg25[%c8_69, %c0_70] : memref<64x32xf32, #tpu.memory_space<vmem>>, vector<8x32xf32>
    tpu.vector_store %arg25[%c8_69, %c0_70], %207 {strides = array<i32>} : memref<64x32xf32, #tpu.memory_space<vmem>>, vector<8x32xf32>,
    %c48_71 = arith.constant 48 : index
    %c0_72 = arith.constant 0 : index
    %238 = vector.load %arg26[%c48_71, %c0_72] : memref<64x32xf32, #tpu.memory_space<vmem>>, vector<8x32xf32>
    tpu.vector_store %arg26[%c48_71, %c0_72], %236 {strides = array<i32>} : memref<64x32xf32, #tpu.memory_space<vmem>>, vector<8x32xf32>,
    %239 = tpu.concatenate %207, %236 in 0 : vector<8x32xf32>, vector<8x32xf32> -> vector<16x32xf32>
    %cst_73 = arith.constant dense<0.000000e+00> : vector<16x768xf32>
    %240 = tpu.matmul %239, %112, %cst_73 {dimension_numbers = #tpu.dot_dimension_numbers<[1], [0], [0], [1], [0, 0, 1, 1], [], []>} : vector<16x32xf32>, vector<32x768xf32>, vector<16x768xf32> -> vector<16x768xf32>
    %c16 = arith.constant 16 : index
    %c0_74 = arith.constant 0 : index
    %241 = vector.load %arg24[%c16, %c0_74] : memref<64x768xf32, #tpu.memory_space<vmem>>, vector<8x384xf32>
    %242 = vector.extract_strided_slice %240 {offsets = [0, 0], sizes = [8, 384], strides = [1, 1]} : vector<16x768xf32> to vector<8x384xf32>
    %243 = vector.extract_strided_slice %241 {offsets = [0, 0], sizes = [8, 32], strides = [1, 1]} : vector<8x384xf32> to vector<8x32xf32>
    %244 = vector.extract_strided_slice %242 {offsets = [0, 0], sizes = [8, 32], strides = [1, 1]} : vector<8x384xf32> to vector<8x32xf32>
    %245 = arith.addf %243, %244 : vector<8x32xf32>
    %246 = arith.negf %245 : vector<8x32xf32>
    %247 = math.exp %246 : vector<8x32xf32>
    %cst_75 = arith.constant 1.000000e+00 : f32
    %248 = vector.broadcast %cst_75 : f32 to vector<8x32xf32>
    %249 = arith.addf %248, %247 : vector<8x32xf32>
    %250 = arith.divf %248, %249 : vector<8x32xf32>
    %251 = vector.extract_strided_slice %241 {offsets = [0, 128], sizes = [8, 32], strides = [1, 1]} : vector<8x384xf32> to vector<8x32xf32>
    %252 = vector.extract_strided_slice %242 {offsets = [0, 128], sizes = [8, 32], strides = [1, 1]} : vector<8x384xf32> to vector<8x32xf32>
    %253 = arith.addf %251, %252 : vector<8x32xf32>
    %254 = arith.negf %253 : vector<8x32xf32>
    %255 = math.exp %254 : vector<8x32xf32>
    %cst_76 = arith.constant 1.000000e+00 : f32
    %256 = vector.broadcast %cst_76 : f32 to vector<8x32xf32>
    %257 = arith.addf %256, %255 : vector<8x32xf32>
    %258 = arith.divf %256, %257 : vector<8x32xf32>
    %259 = vector.extract_strided_slice %241 {offsets = [0, 256], sizes = [8, 32], strides = [1, 1]} : vector<8x384xf32> to vector<8x32xf32>
    %260 = vector.extract_strided_slice %242 {offsets = [0, 256], sizes = [8, 32], strides = [1, 1]} : vector<8x384xf32> to vector<8x32xf32>
    %261 = arith.addf %260, %102 : vector<8x32xf32>
    %262 = arith.mulf %250, %261 : vector<8x32xf32>
    %263 = arith.addf %259, %262 : vector<8x32xf32>
    %264 = math.tanh %263 : vector<8x32xf32>
    %cst_77 = arith.constant 1.000000e+00 : f32
    %265 = vector.broadcast %cst_77 : f32 to vector<8x32xf32>
    %266 = arith.subf %265, %258 : vector<8x32xf32>
    %267 = arith.mulf %266, %264 : vector<8x32xf32>
    %268 = arith.mulf %258, %207 : vector<8x32xf32>
    %269 = arith.addf %267, %268 : vector<8x32xf32>
    %c40 = arith.constant 40 : index
    %c384_78 = arith.constant 384 : index
    %270 = vector.load %arg24[%c40, %c384_78] : memref<64x768xf32, #tpu.memory_space<vmem>>, vector<8x384xf32>
    %271 = vector.extract_strided_slice %240 {offsets = [8, 384], sizes = [8, 384], strides = [1, 1]} : vector<16x768xf32> to vector<8x384xf32>
    %272 = vector.extract_strided_slice %270 {offsets = [0, 0], sizes = [8, 32], strides = [1, 1]} : vector<8x384xf32> to vector<8x32xf32>
    %273 = vector.extract_strided_slice %271 {offsets = [0, 0], sizes = [8, 32], strides = [1, 1]} : vector<8x384xf32> to vector<8x32xf32>
    %274 = arith.addf %272, %273 : vector<8x32xf32>
    %275 = arith.negf %274 : vector<8x32xf32>
    %276 = math.exp %275 : vector<8x32xf32>
    %cst_79 = arith.constant 1.000000e+00 : f32
    %277 = vector.broadcast %cst_79 : f32 to vector<8x32xf32>
    %278 = arith.addf %277, %276 : vector<8x32xf32>
    %279 = arith.divf %277, %278 : vector<8x32xf32>
    %280 = vector.extract_strided_slice %270 {offsets = [0, 128], sizes = [8, 32], strides = [1, 1]} : vector<8x384xf32> to vector<8x32xf32>
    %281 = vector.extract_strided_slice %271 {offsets = [0, 128], sizes = [8, 32], strides = [1, 1]} : vector<8x384xf32> to vector<8x32xf32>
    %282 = arith.addf %280, %281 : vector<8x32xf32>
    %283 = arith.negf %282 : vector<8x32xf32>
    %284 = math.exp %283 : vector<8x32xf32>
    %cst_80 = arith.constant 1.000000e+00 : f32
    %285 = vector.broadcast %cst_80 : f32 to vector<8x32xf32>
    %286 = arith.addf %285, %284 : vector<8x32xf32>
    %287 = arith.divf %285, %286 : vector<8x32xf32>
    %288 = vector.extract_strided_slice %270 {offsets = [0, 256], sizes = [8, 32], strides = [1, 1]} : vector<8x384xf32> to vector<8x32xf32>
    %289 = vector.extract_strided_slice %271 {offsets = [0, 256], sizes = [8, 32], strides = [1, 1]} : vector<8x384xf32> to vector<8x32xf32>
    %290 = arith.addf %289, %105 : vector<8x32xf32>
    %291 = arith.mulf %279, %290 : vector<8x32xf32>
    %292 = arith.addf %288, %291 : vector<8x32xf32>
    %293 = math.tanh %292 : vector<8x32xf32>
    %cst_81 = arith.constant 1.000000e+00 : f32
    %294 = vector.broadcast %cst_81 : f32 to vector<8x32xf32>
    %295 = arith.subf %294, %287 : vector<8x32xf32>
    %296 = arith.mulf %295, %293 : vector<8x32xf32>
    %297 = arith.mulf %287, %236 : vector<8x32xf32>
    %298 = arith.addf %296, %297 : vector<8x32xf32>
    %c16_82 = arith.constant 16 : index
    %c0_83 = arith.constant 0 : index
    %299 = vector.load %arg25[%c16_82, %c0_83] : memref<64x32xf32, #tpu.memory_space<vmem>>, vector<8x32xf32>
    tpu.vector_store %arg25[%c16_82, %c0_83], %269 {strides = array<i32>} : memref<64x32xf32, #tpu.memory_space<vmem>>, vector<8x32xf32>,
    %c40_84 = arith.constant 40 : index
    %c0_85 = arith.constant 0 : index
    %300 = vector.load %arg26[%c40_84, %c0_85] : memref<64x32xf32, #tpu.memory_space<vmem>>, vector<8x32xf32>
    tpu.vector_store %arg26[%c40_84, %c0_85], %298 {strides = array<i32>} : memref<64x32xf32, #tpu.memory_space<vmem>>, vector<8x32xf32>,
    %301 = tpu.concatenate %269, %298 in 0 : vector<8x32xf32>, vector<8x32xf32> -> vector<16x32xf32>
    %cst_86 = arith.constant dense<0.000000e+00> : vector<16x768xf32>
    %302 = tpu.matmul %301, %112, %cst_86 {dimension_numbers = #tpu.dot_dimension_numbers<[1], [0], [0], [1], [0, 0, 1, 1], [], []>} : vector<16x32xf32>, vector<32x768xf32>, vector<16x768xf32> -> vector<16x768xf32>
    %c24 = arith.constant 24 : index
    %c0_87 = arith.constant 0 : index
    %303 = vector.load %arg24[%c24, %c0_87] : memref<64x768xf32, #tpu.memory_space<vmem>>, vector<8x384xf32>
    %304 = vector.extract_strided_slice %302 {offsets = [0, 0], sizes = [8, 384], strides = [1, 1]} : vector<16x768xf32> to vector<8x384xf32>
    %305 = vector.extract_strided_slice %303 {offsets = [0, 0], sizes = [8, 32], strides = [1, 1]} : vector<8x384xf32> to vector<8x32xf32>
    %306 = vector.extract_strided_slice %304 {offsets = [0, 0], sizes = [8, 32], strides = [1, 1]} : vector<8x384xf32> to vector<8x32xf32>
    %307 = arith.addf %305, %306 : vector<8x32xf32>
    %308 = arith.negf %307 : vector<8x32xf32>
    %309 = math.exp %308 : vector<8x32xf32>
    %cst_88 = arith.constant 1.000000e+00 : f32
    %310 = vector.broadcast %cst_88 : f32 to vector<8x32xf32>
    %311 = arith.addf %310, %309 : vector<8x32xf32>
    %312 = arith.divf %310, %311 : vector<8x32xf32>
    %313 = vector.extract_strided_slice %303 {offsets = [0, 128], sizes = [8, 32], strides = [1, 1]} : vector<8x384xf32> to vector<8x32xf32>
    %314 = vector.extract_strided_slice %304 {offsets = [0, 128], sizes = [8, 32], strides = [1, 1]} : vector<8x384xf32> to vector<8x32xf32>
    %315 = arith.addf %313, %314 : vector<8x32xf32>
    %316 = arith.negf %315 : vector<8x32xf32>
    %317 = math.exp %316 : vector<8x32xf32>
    %cst_89 = arith.constant 1.000000e+00 : f32
    %318 = vector.broadcast %cst_89 : f32 to vector<8x32xf32>
    %319 = arith.addf %318, %317 : vector<8x32xf32>
    %320 = arith.divf %318, %319 : vector<8x32xf32>
    %321 = vector.extract_strided_slice %303 {offsets = [0, 256], sizes = [8, 32], strides = [1, 1]} : vector<8x384xf32> to vector<8x32xf32>
    %322 = vector.extract_strided_slice %304 {offsets = [0, 256], sizes = [8, 32], strides = [1, 1]} : vector<8x384xf32> to vector<8x32xf32>
    %323 = arith.addf %322, %102 : vector<8x32xf32>
    %324 = arith.mulf %312, %323 : vector<8x32xf32>
    %325 = arith.addf %321, %324 : vector<8x32xf32>
    %326 = math.tanh %325 : vector<8x32xf32>
    %cst_90 = arith.constant 1.000000e+00 : f32
    %327 = vector.broadcast %cst_90 : f32 to vector<8x32xf32>
    %328 = arith.subf %327, %320 : vector<8x32xf32>
    %329 = arith.mulf %328, %326 : vector<8x32xf32>
    %330 = arith.mulf %320, %269 : vector<8x32xf32>
    %331 = arith.addf %329, %330 : vector<8x32xf32>
    %c32 = arith.constant 32 : index
    %c384_91 = arith.constant 384 : index
    %332 = vector.load %arg24[%c32, %c384_91] : memref<64x768xf32, #tpu.memory_space<vmem>>, vector<8x384xf32>
    %333 = vector.extract_strided_slice %302 {offsets = [8, 384], sizes = [8, 384], strides = [1, 1]} : vector<16x768xf32> to vector<8x384xf32>
    %334 = vector.extract_strided_slice %332 {offsets = [0, 0], sizes = [8, 32], strides = [1, 1]} : vector<8x384xf32> to vector<8x32xf32>
    %335 = vector.extract_strided_slice %333 {offsets = [0, 0], sizes = [8, 32], strides = [1, 1]} : vector<8x384xf32> to vector<8x32xf32>
    %336 = arith.addf %334, %335 : vector<8x32xf32>
    %337 = arith.negf %336 : vector<8x32xf32>
    %338 = math.exp %337 : vector<8x32xf32>
    %cst_92 = arith.constant 1.000000e+00 : f32
    %339 = vector.broadcast %cst_92 : f32 to vector<8x32xf32>
    %340 = arith.addf %339, %338 : vector<8x32xf32>
    %341 = arith.divf %339, %340 : vector<8x32xf32>
    %342 = vector.extract_strided_slice %332 {offsets = [0, 128], sizes = [8, 32], strides = [1, 1]} : vector<8x384xf32> to vector<8x32xf32>
    %343 = vector.extract_strided_slice %333 {offsets = [0, 128], sizes = [8, 32], strides = [1, 1]} : vector<8x384xf32> to vector<8x32xf32>
    %344 = arith.addf %342, %343 : vector<8x32xf32>
    %345 = arith.negf %344 : vector<8x32xf32>
    %346 = math.exp %345 : vector<8x32xf32>
    %cst_93 = arith.constant 1.000000e+00 : f32
    %347 = vector.broadcast %cst_93 : f32 to vector<8x32xf32>
    %348 = arith.addf %347, %346 : vector<8x32xf32>
    %349 = arith.divf %347, %348 : vector<8x32xf32>
    %350 = vector.extract_strided_slice %332 {offsets = [0, 256], sizes = [8, 32], strides = [1, 1]} : vector<8x384xf32> to vector<8x32xf32>
    %351 = vector.extract_strided_slice %333 {offsets = [0, 256], sizes = [8, 32], strides = [1, 1]} : vector<8x384xf32> to vector<8x32xf32>
    %352 = arith.addf %351, %105 : vector<8x32xf32>
    %353 = arith.mulf %341, %352 : vector<8x32xf32>
    %354 = arith.addf %350, %353 : vector<8x32xf32>
    %355 = math.tanh %354 : vector<8x32xf32>
    %cst_94 = arith.constant 1.000000e+00 : f32
    %356 = vector.broadcast %cst_94 : f32 to vector<8x32xf32>
    %357 = arith.subf %356, %349 : vector<8x32xf32>
    %358 = arith.mulf %357, %355 : vector<8x32xf32>
    %359 = arith.mulf %349, %298 : vector<8x32xf32>
    %360 = arith.addf %358, %359 : vector<8x32xf32>
    %c24_95 = arith.constant 24 : index
    %c0_96 = arith.constant 0 : index
    %361 = vector.load %arg25[%c24_95, %c0_96] : memref<64x32xf32, #tpu.memory_space<vmem>>, vector<8x32xf32>
    tpu.vector_store %arg25[%c24_95, %c0_96], %331 {strides = array<i32>} : memref<64x32xf32, #tpu.memory_space<vmem>>, vector<8x32xf32>,
    %c32_97 = arith.constant 32 : index
    %c0_98 = arith.constant 0 : index
    %362 = vector.load %arg26[%c32_97, %c0_98] : memref<64x32xf32, #tpu.memory_space<vmem>>, vector<8x32xf32>
    tpu.vector_store %arg26[%c32_97, %c0_98], %360 {strides = array<i32>} : memref<64x32xf32, #tpu.memory_space<vmem>>, vector<8x32xf32>,
    %363 = tpu.concatenate %331, %360 in 0 : vector<8x32xf32>, vector<8x32xf32> -> vector<16x32xf32>
    %cst_99 = arith.constant dense<0.000000e+00> : vector<16x768xf32>
    %364 = tpu.matmul %363, %112, %cst_99 {dimension_numbers = #tpu.dot_dimension_numbers<[1], [0], [0], [1], [0, 0, 1, 1], [], []>} : vector<16x32xf32>, vector<32x768xf32>, vector<16x768xf32> -> vector<16x768xf32>
    %c32_100 = arith.constant 32 : index
    %c0_101 = arith.constant 0 : index
    %365 = vector.load %arg24[%c32_100, %c0_101] : memref<64x768xf32, #tpu.memory_space<vmem>>, vector<8x384xf32>
    %366 = vector.extract_strided_slice %364 {offsets = [0, 0], sizes = [8, 384], strides = [1, 1]} : vector<16x768xf32> to vector<8x384xf32>
    %367 = vector.extract_strided_slice %365 {offsets = [0, 0], sizes = [8, 32], strides = [1, 1]} : vector<8x384xf32> to vector<8x32xf32>
    %368 = vector.extract_strided_slice %366 {offsets = [0, 0], sizes = [8, 32], strides = [1, 1]} : vector<8x384xf32> to vector<8x32xf32>
    %369 = arith.addf %367, %368 : vector<8x32xf32>
    %370 = arith.negf %369 : vector<8x32xf32>
    %371 = math.exp %370 : vector<8x32xf32>
    %cst_102 = arith.constant 1.000000e+00 : f32
    %372 = vector.broadcast %cst_102 : f32 to vector<8x32xf32>
    %373 = arith.addf %372, %371 : vector<8x32xf32>
    %374 = arith.divf %372, %373 : vector<8x32xf32>
    %375 = vector.extract_strided_slice %365 {offsets = [0, 128], sizes = [8, 32], strides = [1, 1]} : vector<8x384xf32> to vector<8x32xf32>
    %376 = vector.extract_strided_slice %366 {offsets = [0, 128], sizes = [8, 32], strides = [1, 1]} : vector<8x384xf32> to vector<8x32xf32>
    %377 = arith.addf %375, %376 : vector<8x32xf32>
    %378 = arith.negf %377 : vector<8x32xf32>
    %379 = math.exp %378 : vector<8x32xf32>
    %cst_103 = arith.constant 1.000000e+00 : f32
    %380 = vector.broadcast %cst_103 : f32 to vector<8x32xf32>
    %381 = arith.addf %380, %379 : vector<8x32xf32>
    %382 = arith.divf %380, %381 : vector<8x32xf32>
    %383 = vector.extract_strided_slice %365 {offsets = [0, 256], sizes = [8, 32], strides = [1, 1]} : vector<8x384xf32> to vector<8x32xf32>
    %384 = vector.extract_strided_slice %366 {offsets = [0, 256], sizes = [8, 32], strides = [1, 1]} : vector<8x384xf32> to vector<8x32xf32>
    %385 = arith.addf %384, %102 : vector<8x32xf32>
    %386 = arith.mulf %374, %385 : vector<8x32xf32>
    %387 = arith.addf %383, %386 : vector<8x32xf32>
    %388 = math.tanh %387 : vector<8x32xf32>
    %cst_104 = arith.constant 1.000000e+00 : f32
    %389 = vector.broadcast %cst_104 : f32 to vector<8x32xf32>
    %390 = arith.subf %389, %382 : vector<8x32xf32>
    %391 = arith.mulf %390, %388 : vector<8x32xf32>
    %392 = arith.mulf %382, %331 : vector<8x32xf32>
    %393 = arith.addf %391, %392 : vector<8x32xf32>
    %c24_105 = arith.constant 24 : index
    %c384_106 = arith.constant 384 : index
    %394 = vector.load %arg24[%c24_105, %c384_106] : memref<64x768xf32, #tpu.memory_space<vmem>>, vector<8x384xf32>
    %395 = vector.extract_strided_slice %364 {offsets = [8, 384], sizes = [8, 384], strides = [1, 1]} : vector<16x768xf32> to vector<8x384xf32>
    %396 = vector.extract_strided_slice %394 {offsets = [0, 0], sizes = [8, 32], strides = [1, 1]} : vector<8x384xf32> to vector<8x32xf32>
    %397 = vector.extract_strided_slice %395 {offsets = [0, 0], sizes = [8, 32], strides = [1, 1]} : vector<8x384xf32> to vector<8x32xf32>
    %398 = arith.addf %396, %397 : vector<8x32xf32>
    %399 = arith.negf %398 : vector<8x32xf32>
    %400 = math.exp %399 : vector<8x32xf32>
    %cst_107 = arith.constant 1.000000e+00 : f32
    %401 = vector.broadcast %cst_107 : f32 to vector<8x32xf32>
    %402 = arith.addf %401, %400 : vector<8x32xf32>
    %403 = arith.divf %401, %402 : vector<8x32xf32>
    %404 = vector.extract_strided_slice %394 {offsets = [0, 128], sizes = [8, 32], strides = [1, 1]} : vector<8x384xf32> to vector<8x32xf32>
    %405 = vector.extract_strided_slice %395 {offsets = [0, 128], sizes = [8, 32], strides = [1, 1]} : vector<8x384xf32> to vector<8x32xf32>
    %406 = arith.addf %404, %405 : vector<8x32xf32>
    %407 = arith.negf %406 : vector<8x32xf32>
    %408 = math.exp %407 : vector<8x32xf32>
    %cst_108 = arith.constant 1.000000e+00 : f32
    %409 = vector.broadcast %cst_108 : f32 to vector<8x32xf32>
    %410 = arith.addf %409, %408 : vector<8x32xf32>
    %411 = arith.divf %409, %410 : vector<8x32xf32>
    %412 = vector.extract_strided_slice %394 {offsets = [0, 256], sizes = [8, 32], strides = [1, 1]} : vector<8x384xf32> to vector<8x32xf32>
    %413 = vector.extract_strided_slice %395 {offsets = [0, 256], sizes = [8, 32], strides = [1, 1]} : vector<8x384xf32> to vector<8x32xf32>
    %414 = arith.addf %413, %105 : vector<8x32xf32>
    %415 = arith.mulf %403, %414 : vector<8x32xf32>
    %416 = arith.addf %412, %415 : vector<8x32xf32>
    %417 = math.tanh %416 : vector<8x32xf32>
    %cst_109 = arith.constant 1.000000e+00 : f32
    %418 = vector.broadcast %cst_109 : f32 to vector<8x32xf32>
    %419 = arith.subf %418, %411 : vector<8x32xf32>
    %420 = arith.mulf %419, %417 : vector<8x32xf32>
    %421 = arith.mulf %411, %360 : vector<8x32xf32>
    %422 = arith.addf %420, %421 : vector<8x32xf32>
    %c32_110 = arith.constant 32 : index
    %c0_111 = arith.constant 0 : index
    %423 = vector.load %arg25[%c32_110, %c0_111] : memref<64x32xf32, #tpu.memory_space<vmem>>, vector<8x32xf32>
    tpu.vector_store %arg25[%c32_110, %c0_111], %393 {strides = array<i32>} : memref<64x32xf32, #tpu.memory_space<vmem>>, vector<8x32xf32>,
    %c24_112 = arith.constant 24 : index
    %c0_113 = arith.constant 0 : index
    %424 = vector.load %arg26[%c24_112, %c0_113] : memref<64x32xf32, #tpu.memory_space<vmem>>, vector<8x32xf32>
    tpu.vector_store %arg26[%c24_112, %c0_113], %422 {strides = array<i32>} : memref<64x32xf32, #tpu.memory_space<vmem>>, vector<8x32xf32>,
    %425 = tpu.concatenate %393, %422 in 0 : vector<8x32xf32>, vector<8x32xf32> -> vector<16x32xf32>
    %cst_114 = arith.constant dense<0.000000e+00> : vector<16x768xf32>
    %426 = tpu.matmul %425, %112, %cst_114 {dimension_numbers = #tpu.dot_dimension_numbers<[1], [0], [0], [1], [0, 0, 1, 1], [], []>} : vector<16x32xf32>, vector<32x768xf32>, vector<16x768xf32> -> vector<16x768xf32>
    %c40_115 = arith.constant 40 : index
    %c0_116 = arith.constant 0 : index
    %427 = vector.load %arg24[%c40_115, %c0_116] : memref<64x768xf32, #tpu.memory_space<vmem>>, vector<8x384xf32>
    %428 = vector.extract_strided_slice %426 {offsets = [0, 0], sizes = [8, 384], strides = [1, 1]} : vector<16x768xf32> to vector<8x384xf32>
    %429 = vector.extract_strided_slice %427 {offsets = [0, 0], sizes = [8, 32], strides = [1, 1]} : vector<8x384xf32> to vector<8x32xf32>
    %430 = vector.extract_strided_slice %428 {offsets = [0, 0], sizes = [8, 32], strides = [1, 1]} : vector<8x384xf32> to vector<8x32xf32>
    %431 = arith.addf %429, %430 : vector<8x32xf32>
    %432 = arith.negf %431 : vector<8x32xf32>
    %433 = math.exp %432 : vector<8x32xf32>
    %cst_117 = arith.constant 1.000000e+00 : f32
    %434 = vector.broadcast %cst_117 : f32 to vector<8x32xf32>
    %435 = arith.addf %434, %433 : vector<8x32xf32>
    %436 = arith.divf %434, %435 : vector<8x32xf32>
    %437 = vector.extract_strided_slice %427 {offsets = [0, 128], sizes = [8, 32], strides = [1, 1]} : vector<8x384xf32> to vector<8x32xf32>
    %438 = vector.extract_strided_slice %428 {offsets = [0, 128], sizes = [8, 32], strides = [1, 1]} : vector<8x384xf32> to vector<8x32xf32>
    %439 = arith.addf %437, %438 : vector<8x32xf32>
    %440 = arith.negf %439 : vector<8x32xf32>
    %441 = math.exp %440 : vector<8x32xf32>
    %cst_118 = arith.constant 1.000000e+00 : f32
    %442 = vector.broadcast %cst_118 : f32 to vector<8x32xf32>
    %443 = arith.addf %442, %441 : vector<8x32xf32>
    %444 = arith.divf %442, %443 : vector<8x32xf32>
    %445 = vector.extract_strided_slice %427 {offsets = [0, 256], sizes = [8, 32], strides = [1, 1]} : vector<8x384xf32> to vector<8x32xf32>
    %446 = vector.extract_strided_slice %428 {offsets = [0, 256], sizes = [8, 32], strides = [1, 1]} : vector<8x384xf32> to vector<8x32xf32>
    %447 = arith.addf %446, %102 : vector<8x32xf32>
    %448 = arith.mulf %436, %447 : vector<8x32xf32>
    %449 = arith.addf %445, %448 : vector<8x32xf32>
    %450 = math.tanh %449 : vector<8x32xf32>
    %cst_119 = arith.constant 1.000000e+00 : f32
    %451 = vector.broadcast %cst_119 : f32 to vector<8x32xf32>
    %452 = arith.subf %451, %444 : vector<8x32xf32>
    %453 = arith.mulf %452, %450 : vector<8x32xf32>
    %454 = arith.mulf %444, %393 : vector<8x32xf32>
    %455 = arith.addf %453, %454 : vector<8x32xf32>
    %c16_120 = arith.constant 16 : index
    %c384_121 = arith.constant 384 : index
    %456 = vector.load %arg24[%c16_120, %c384_121] : memref<64x768xf32, #tpu.memory_space<vmem>>, vector<8x384xf32>
    %457 = vector.extract_strided_slice %426 {offsets = [8, 384], sizes = [8, 384], strides = [1, 1]} : vector<16x768xf32> to vector<8x384xf32>
    %458 = vector.extract_strided_slice %456 {offsets = [0, 0], sizes = [8, 32], strides = [1, 1]} : vector<8x384xf32> to vector<8x32xf32>
    %459 = vector.extract_strided_slice %457 {offsets = [0, 0], sizes = [8, 32], strides = [1, 1]} : vector<8x384xf32> to vector<8x32xf32>
    %460 = arith.addf %458, %459 : vector<8x32xf32>
    %461 = arith.negf %460 : vector<8x32xf32>
    %462 = math.exp %461 : vector<8x32xf32>
    %cst_122 = arith.constant 1.000000e+00 : f32
    %463 = vector.broadcast %cst_122 : f32 to vector<8x32xf32>
    %464 = arith.addf %463, %462 : vector<8x32xf32>
    %465 = arith.divf %463, %464 : vector<8x32xf32>
    %466 = vector.extract_strided_slice %456 {offsets = [0, 128], sizes = [8, 32], strides = [1, 1]} : vector<8x384xf32> to vector<8x32xf32>
    %467 = vector.extract_strided_slice %457 {offsets = [0, 128], sizes = [8, 32], strides = [1, 1]} : vector<8x384xf32> to vector<8x32xf32>
    %468 = arith.addf %466, %467 : vector<8x32xf32>
    %469 = arith.negf %468 : vector<8x32xf32>
    %470 = math.exp %469 : vector<8x32xf32>
    %cst_123 = arith.constant 1.000000e+00 : f32
    %471 = vector.broadcast %cst_123 : f32 to vector<8x32xf32>
    %472 = arith.addf %471, %470 : vector<8x32xf32>
    %473 = arith.divf %471, %472 : vector<8x32xf32>
    %474 = vector.extract_strided_slice %456 {offsets = [0, 256], sizes = [8, 32], strides = [1, 1]} : vector<8x384xf32> to vector<8x32xf32>
    %475 = vector.extract_strided_slice %457 {offsets = [0, 256], sizes = [8, 32], strides = [1, 1]} : vector<8x384xf32> to vector<8x32xf32>
    %476 = arith.addf %475, %105 : vector<8x32xf32>
    %477 = arith.mulf %465, %476 : vector<8x32xf32>
    %478 = arith.addf %474, %477 : vector<8x32xf32>
    %479 = math.tanh %478 : vector<8x32xf32>
    %cst_124 = arith.constant 1.000000e+00 : f32
    %480 = vector.broadcast %cst_124 : f32 to vector<8x32xf32>
    %481 = arith.subf %480, %473 : vector<8x32xf32>
    %482 = arith.mulf %481, %479 : vector<8x32xf32>
    %483 = arith.mulf %473, %422 : vector<8x32xf32>
    %484 = arith.addf %482, %483 : vector<8x32xf32>
    %c40_125 = arith.constant 40 : index
    %c0_126 = arith.constant 0 : index
    %485 = vector.load %arg25[%c40_125, %c0_126] : memref<64x32xf32, #tpu.memory_space<vmem>>, vector<8x32xf32>
    tpu.vector_store %arg25[%c40_125, %c0_126], %455 {strides = array<i32>} : memref<64x32xf32, #tpu.memory_space<vmem>>, vector<8x32xf32>,
    %c16_127 = arith.constant 16 : index
    %c0_128 = arith.constant 0 : index
    %486 = vector.load %arg26[%c16_127, %c0_128] : memref<64x32xf32, #tpu.memory_space<vmem>>, vector<8x32xf32>
    tpu.vector_store %arg26[%c16_127, %c0_128], %484 {strides = array<i32>} : memref<64x32xf32, #tpu.memory_space<vmem>>, vector<8x32xf32>,
    %487 = tpu.concatenate %455, %484 in 0 : vector<8x32xf32>, vector<8x32xf32> -> vector<16x32xf32>
    %cst_129 = arith.constant dense<0.000000e+00> : vector<16x768xf32>
    %488 = tpu.matmul %487, %112, %cst_129 {dimension_numbers = #tpu.dot_dimension_numbers<[1], [0], [0], [1], [0, 0, 1, 1], [], []>} : vector<16x32xf32>, vector<32x768xf32>, vector<16x768xf32> -> vector<16x768xf32>
    %c48_130 = arith.constant 48 : index
    %c0_131 = arith.constant 0 : index
    %489 = vector.load %arg24[%c48_130, %c0_131] : memref<64x768xf32, #tpu.memory_space<vmem>>, vector<8x384xf32>
    %490 = vector.extract_strided_slice %488 {offsets = [0, 0], sizes = [8, 384], strides = [1, 1]} : vector<16x768xf32> to vector<8x384xf32>
    %491 = vector.extract_strided_slice %489 {offsets = [0, 0], sizes = [8, 32], strides = [1, 1]} : vector<8x384xf32> to vector<8x32xf32>
    %492 = vector.extract_strided_slice %490 {offsets = [0, 0], sizes = [8, 32], strides = [1, 1]} : vector<8x384xf32> to vector<8x32xf32>
    %493 = arith.addf %491, %492 : vector<8x32xf32>
    %494 = arith.negf %493 : vector<8x32xf32>
    %495 = math.exp %494 : vector<8x32xf32>
    %cst_132 = arith.constant 1.000000e+00 : f32
    %496 = vector.broadcast %cst_132 : f32 to vector<8x32xf32>
    %497 = arith.addf %496, %495 : vector<8x32xf32>
    %498 = arith.divf %496, %497 : vector<8x32xf32>
    %499 = vector.extract_strided_slice %489 {offsets = [0, 128], sizes = [8, 32], strides = [1, 1]} : vector<8x384xf32> to vector<8x32xf32>
    %500 = vector.extract_strided_slice %490 {offsets = [0, 128], sizes = [8, 32], strides = [1, 1]} : vector<8x384xf32> to vector<8x32xf32>
    %501 = arith.addf %499, %500 : vector<8x32xf32>
    %502 = arith.negf %501 : vector<8x32xf32>
    %503 = math.exp %502 : vector<8x32xf32>
    %cst_133 = arith.constant 1.000000e+00 : f32
    %504 = vector.broadcast %cst_133 : f32 to vector<8x32xf32>
    %505 = arith.addf %504, %503 : vector<8x32xf32>
    %506 = arith.divf %504, %505 : vector<8x32xf32>
    %507 = vector.extract_strided_slice %489 {offsets = [0, 256], sizes = [8, 32], strides = [1, 1]} : vector<8x384xf32> to vector<8x32xf32>
    %508 = vector.extract_strided_slice %490 {offsets = [0, 256], sizes = [8, 32], strides = [1, 1]} : vector<8x384xf32> to vector<8x32xf32>
    %509 = arith.addf %508, %102 : vector<8x32xf32>
    %510 = arith.mulf %498, %509 : vector<8x32xf32>
    %511 = arith.addf %507, %510 : vector<8x32xf32>
    %512 = math.tanh %511 : vector<8x32xf32>
    %cst_134 = arith.constant 1.000000e+00 : f32
    %513 = vector.broadcast %cst_134 : f32 to vector<8x32xf32>
    %514 = arith.subf %513, %506 : vector<8x32xf32>
    %515 = arith.mulf %514, %512 : vector<8x32xf32>
    %516 = arith.mulf %506, %455 : vector<8x32xf32>
    %517 = arith.addf %515, %516 : vector<8x32xf32>
    %c8_135 = arith.constant 8 : index
    %c384_136 = arith.constant 384 : index
    %518 = vector.load %arg24[%c8_135, %c384_136] : memref<64x768xf32, #tpu.memory_space<vmem>>, vector<8x384xf32>
    %519 = vector.extract_strided_slice %488 {offsets = [8, 384], sizes = [8, 384], strides = [1, 1]} : vector<16x768xf32> to vector<8x384xf32>
    %520 = vector.extract_strided_slice %518 {offsets = [0, 0], sizes = [8, 32], strides = [1, 1]} : vector<8x384xf32> to vector<8x32xf32>
    %521 = vector.extract_strided_slice %519 {offsets = [0, 0], sizes = [8, 32], strides = [1, 1]} : vector<8x384xf32> to vector<8x32xf32>
    %522 = arith.addf %520, %521 : vector<8x32xf32>
    %523 = arith.negf %522 : vector<8x32xf32>
    %524 = math.exp %523 : vector<8x32xf32>
    %cst_137 = arith.constant 1.000000e+00 : f32
    %525 = vector.broadcast %cst_137 : f32 to vector<8x32xf32>
    %526 = arith.addf %525, %524 : vector<8x32xf32>
    %527 = arith.divf %525, %526 : vector<8x32xf32>
    %528 = vector.extract_strided_slice %518 {offsets = [0, 128], sizes = [8, 32], strides = [1, 1]} : vector<8x384xf32> to vector<8x32xf32>
    %529 = vector.extract_strided_slice %519 {offsets = [0, 128], sizes = [8, 32], strides = [1, 1]} : vector<8x384xf32> to vector<8x32xf32>
    %530 = arith.addf %528, %529 : vector<8x32xf32>
    %531 = arith.negf %530 : vector<8x32xf32>
    %532 = math.exp %531 : vector<8x32xf32>
    %cst_138 = arith.constant 1.000000e+00 : f32
    %533 = vector.broadcast %cst_138 : f32 to vector<8x32xf32>
    %534 = arith.addf %533, %532 : vector<8x32xf32>
    %535 = arith.divf %533, %534 : vector<8x32xf32>
    %536 = vector.extract_strided_slice %518 {offsets = [0, 256], sizes = [8, 32], strides = [1, 1]} : vector<8x384xf32> to vector<8x32xf32>
    %537 = vector.extract_strided_slice %519 {offsets = [0, 256], sizes = [8, 32], strides = [1, 1]} : vector<8x384xf32> to vector<8x32xf32>
    %538 = arith.addf %537, %105 : vector<8x32xf32>
    %539 = arith.mulf %527, %538 : vector<8x32xf32>
    %540 = arith.addf %536, %539 : vector<8x32xf32>
    %541 = math.tanh %540 : vector<8x32xf32>
    %cst_139 = arith.constant 1.000000e+00 : f32
    %542 = vector.broadcast %cst_139 : f32 to vector<8x32xf32>
    %543 = arith.subf %542, %535 : vector<8x32xf32>
    %544 = arith.mulf %543, %541 : vector<8x32xf32>
    %545 = arith.mulf %535, %484 : vector<8x32xf32>
    %546 = arith.addf %544, %545 : vector<8x32xf32>
    %c48_140 = arith.constant 48 : index
    %c0_141 = arith.constant 0 : index
    %547 = vector.load %arg25[%c48_140, %c0_141] : memref<64x32xf32, #tpu.memory_space<vmem>>, vector<8x32xf32>
    tpu.vector_store %arg25[%c48_140, %c0_141], %517 {strides = array<i32>} : memref<64x32xf32, #tpu.memory_space<vmem>>, vector<8x32xf32>,
    %c8_142 = arith.constant 8 : index
    %c0_143 = arith.constant 0 : index
    %548 = vector.load %arg26[%c8_142, %c0_143] : memref<64x32xf32, #tpu.memory_space<vmem>>, vector<8x32xf32>
    tpu.vector_store %arg26[%c8_142, %c0_143], %546 {strides = array<i32>} : memref<64x32xf32, #tpu.memory_space<vmem>>, vector<8x32xf32>,
    %549 = tpu.concatenate %517, %546 in 0 : vector<8x32xf32>, vector<8x32xf32> -> vector<16x32xf32>
    %cst_144 = arith.constant dense<0.000000e+00> : vector<16x768xf32>
    %550 = tpu.matmul %549, %112, %cst_144 {dimension_numbers = #tpu.dot_dimension_numbers<[1], [0], [0], [1], [0, 0, 1, 1], [], []>} : vector<16x32xf32>, vector<32x768xf32>, vector<16x768xf32> -> vector<16x768xf32>
    %c56_145 = arith.constant 56 : index
    %c0_146 = arith.constant 0 : index
    %551 = vector.load %arg24[%c56_145, %c0_146] : memref<64x768xf32, #tpu.memory_space<vmem>>, vector<8x384xf32>
    %552 = vector.extract_strided_slice %550 {offsets = [0, 0], sizes = [8, 384], strides = [1, 1]} : vector<16x768xf32> to vector<8x384xf32>
    %553 = vector.extract_strided_slice %551 {offsets = [0, 0], sizes = [8, 32], strides = [1, 1]} : vector<8x384xf32> to vector<8x32xf32>
    %554 = vector.extract_strided_slice %552 {offsets = [0, 0], sizes = [8, 32], strides = [1, 1]} : vector<8x384xf32> to vector<8x32xf32>
    %555 = arith.addf %553, %554 : vector<8x32xf32>
    %556 = arith.negf %555 : vector<8x32xf32>
    %557 = math.exp %556 : vector<8x32xf32>
    %cst_147 = arith.constant 1.000000e+00 : f32
    %558 = vector.broadcast %cst_147 : f32 to vector<8x32xf32>
    %559 = arith.addf %558, %557 : vector<8x32xf32>
    %560 = arith.divf %558, %559 : vector<8x32xf32>
    %561 = vector.extract_strided_slice %551 {offsets = [0, 128], sizes = [8, 32], strides = [1, 1]} : vector<8x384xf32> to vector<8x32xf32>
    %562 = vector.extract_strided_slice %552 {offsets = [0, 128], sizes = [8, 32], strides = [1, 1]} : vector<8x384xf32> to vector<8x32xf32>
    %563 = arith.addf %561, %562 : vector<8x32xf32>
    %564 = arith.negf %563 : vector<8x32xf32>
    %565 = math.exp %564 : vector<8x32xf32>
    %cst_148 = arith.constant 1.000000e+00 : f32
    %566 = vector.broadcast %cst_148 : f32 to vector<8x32xf32>
    %567 = arith.addf %566, %565 : vector<8x32xf32>
    %568 = arith.divf %566, %567 : vector<8x32xf32>
    %569 = vector.extract_strided_slice %551 {offsets = [0, 256], sizes = [8, 32], strides = [1, 1]} : vector<8x384xf32> to vector<8x32xf32>
    %570 = vector.extract_strided_slice %552 {offsets = [0, 256], sizes = [8, 32], strides = [1, 1]} : vector<8x384xf32> to vector<8x32xf32>
    %571 = arith.addf %570, %102 : vector<8x32xf32>
    %572 = arith.mulf %560, %571 : vector<8x32xf32>
    %573 = arith.addf %569, %572 : vector<8x32xf32>
    %574 = math.tanh %573 : vector<8x32xf32>
    %cst_149 = arith.constant 1.000000e+00 : f32
    %575 = vector.broadcast %cst_149 : f32 to vector<8x32xf32>
    %576 = arith.subf %575, %568 : vector<8x32xf32>
    %577 = arith.mulf %576, %574 : vector<8x32xf32>
    %578 = arith.mulf %568, %517 : vector<8x32xf32>
    %579 = arith.addf %577, %578 : vector<8x32xf32>
    %c0_150 = arith.constant 0 : index
    %c384_151 = arith.constant 384 : index
    %580 = vector.load %arg24[%c0_150, %c384_151] : memref<64x768xf32, #tpu.memory_space<vmem>>, vector<8x384xf32>
    %581 = vector.extract_strided_slice %550 {offsets = [8, 384], sizes = [8, 384], strides = [1, 1]} : vector<16x768xf32> to vector<8x384xf32>
    %582 = vector.extract_strided_slice %580 {offsets = [0, 0], sizes = [8, 32], strides = [1, 1]} : vector<8x384xf32> to vector<8x32xf32>
    %583 = vector.extract_strided_slice %581 {offsets = [0, 0], sizes = [8, 32], strides = [1, 1]} : vector<8x384xf32> to vector<8x32xf32>
    %584 = arith.addf %582, %583 : vector<8x32xf32>
    %585 = arith.negf %584 : vector<8x32xf32>
    %586 = math.exp %585 : vector<8x32xf32>
    %cst_152 = arith.constant 1.000000e+00 : f32
    %587 = vector.broadcast %cst_152 : f32 to vector<8x32xf32>
    %588 = arith.addf %587, %586 : vector<8x32xf32>
    %589 = arith.divf %587, %588 : vector<8x32xf32>
    %590 = vector.extract_strided_slice %580 {offsets = [0, 128], sizes = [8, 32], strides = [1, 1]} : vector<8x384xf32> to vector<8x32xf32>
    %591 = vector.extract_strided_slice %581 {offsets = [0, 128], sizes = [8, 32], strides = [1, 1]} : vector<8x384xf32> to vector<8x32xf32>
    %592 = arith.addf %590, %591 : vector<8x32xf32>
    %593 = arith.negf %592 : vector<8x32xf32>
    %594 = math.exp %593 : vector<8x32xf32>
    %cst_153 = arith.constant 1.000000e+00 : f32
    %595 = vector.broadcast %cst_153 : f32 to vector<8x32xf32>
    %596 = arith.addf %595, %594 : vector<8x32xf32>
    %597 = arith.divf %595, %596 : vector<8x32xf32>
    %598 = vector.extract_strided_slice %580 {offsets = [0, 256], sizes = [8, 32], strides = [1, 1]} : vector<8x384xf32> to vector<8x32xf32>
    %599 = vector.extract_strided_slice %581 {offsets = [0, 256], sizes = [8, 32], strides = [1, 1]} : vector<8x384xf32> to vector<8x32xf32>
    %600 = arith.addf %599, %105 : vector<8x32xf32>
    %601 = arith.mulf %589, %600 : vector<8x32xf32>
    %602 = arith.addf %598, %601 : vector<8x32xf32>
    %603 = math.tanh %602 : vector<8x32xf32>
    %cst_154 = arith.constant 1.000000e+00 : f32
    %604 = vector.broadcast %cst_154 : f32 to vector<8x32xf32>
    %605 = arith.subf %604, %597 : vector<8x32xf32>
    %606 = arith.mulf %605, %603 : vector<8x32xf32>
    %607 = arith.mulf %597, %546 : vector<8x32xf32>
    %608 = arith.addf %606, %607 : vector<8x32xf32>
    %c56_155 = arith.constant 56 : index
    %c0_156 = arith.constant 0 : index
    %609 = vector.load %arg25[%c56_155, %c0_156] : memref<64x32xf32, #tpu.memory_space<vmem>>, vector<8x32xf32>
    tpu.vector_store %arg25[%c56_155, %c0_156], %579 {strides = array<i32>} : memref<64x32xf32, #tpu.memory_space<vmem>>, vector<8x32xf32>,
    %c0_157 = arith.constant 0 : index
    %c0_158 = arith.constant 0 : index
    %610 = vector.load %arg26[%c0_157, %c0_158] : memref<64x32xf32, #tpu.memory_space<vmem>>, vector<8x32xf32>
    tpu.vector_store %arg26[%c0_157, %c0_158], %608 {strides = array<i32>} : memref<64x32xf32, #tpu.memory_space<vmem>>, vector<8x32xf32>,
    %c0_159 = arith.constant 0 : index
    %c0_160 = arith.constant 0 : index
    %611 = vector.load %arg25[%c0_159, %c0_160] : memref<64x32xf32, #tpu.memory_space<vmem>>, vector<64x32xf32>
    %c0_161 = arith.constant 0 : index
    %c0_162 = arith.constant 0 : index
    %612 = vector.load %arg14[%c0_161, %c0_162] : memref<32x768xf32, #tpu.memory_space<vmem>>, vector<32x768xf32>
    %cst_163 = arith.constant dense<0.000000e+00> : vector<64x768xf32>
    %613 = tpu.matmul %611, %612, %cst_163 {dimension_numbers = #tpu.dot_dimension_numbers<[1], [0], [0], [1], [0, 0, 1, 1], [], []>} : vector<64x32xf32>, vector<32x768xf32>, vector<64x768xf32> -> vector<64x768xf32>
    %c0_164 = arith.constant 0 : index
    %c0_165 = arith.constant 0 : index
    %614 = vector.load %arg26[%c0_164, %c0_165] : memref<64x32xf32, #tpu.memory_space<vmem>>, vector<64x32xf32>
    %c0_166 = arith.constant 0 : index
    %c0_167 = arith.constant 0 : index
    %615 = vector.load %arg15[%c0_166, %c0_167] : memref<32x768xf32, #tpu.memory_space<vmem>>, vector<32x768xf32>
    %cst_168 = arith.constant dense<0.000000e+00> : vector<64x768xf32>
    %616 = tpu.matmul %614, %615, %cst_168 {dimension_numbers = #tpu.dot_dimension_numbers<[1], [0], [0], [1], [0, 0, 1, 1], [], []>} : vector<64x32xf32>, vector<32x768xf32>, vector<64x768xf32> -> vector<64x768xf32>
    %617 = arith.addf %613, %616 : vector<64x768xf32>
    %c0_169 = arith.constant 0 : index
    %c0_170 = arith.constant 0 : index
    %618 = vector.load %arg16[%c0_169, %c0_170] : memref<1x768xf32, #tpu.memory_space<vmem>>, vector<1x768xf32>
    %619 = vector.broadcast %618 : vector<1x768xf32> to vector<64x768xf32>
    %620 = arith.addf %617, %619 : vector<64x768xf32>
    %c0_171 = arith.constant 0 : index
    %c0_172 = arith.constant 0 : index
    %621 = vector.load %arg24[%c0_171, %c0_172] : memref<64x768xf32, #tpu.memory_space<vmem>>, vector<64x768xf32>
    tpu.vector_store %arg24[%c0_171, %c0_172], %620 {strides = array<i32>} : memref<64x768xf32, #tpu.memory_space<vmem>>, vector<64x768xf32>,
    %c0_173 = arith.constant 0 : index
    %c0_174 = arith.constant 0 : index
    %622 = vector.load %arg17[%c0_173, %c0_174] : memref<32x768xf32, #tpu.memory_space<vmem>>, vector<32x768xf32>
    %cst_175 = arith.constant 0.000000e+00 : f32
    %623 = vector.broadcast %cst_175 : f32 to vector<8x32xf32>
    %cst_176 = arith.constant 0.000000e+00 : f32
    %624 = vector.broadcast %cst_176 : f32 to vector<8x32xf32>
    %625 = tpu.concatenate %623, %624 in 0 : vector<8x32xf32>, vector<8x32xf32> -> vector<16x32xf32>
    %cst_177 = arith.constant dense<0.000000e+00> : vector<16x768xf32>
    %626 = tpu.matmul %625, %622, %cst_177 {dimension_numbers = #tpu.dot_dimension_numbers<[1], [0], [0], [1], [0, 0, 1, 1], [], []>} : vector<16x32xf32>, vector<32x768xf32>, vector<16x768xf32> -> vector<16x768xf32>
    %c0_178 = arith.constant 0 : index
    %c0_179 = arith.constant 0 : index
    %627 = vector.load %arg24[%c0_178, %c0_179] : memref<64x768xf32, #tpu.memory_space<vmem>>, vector<8x384xf32>
    %628 = vector.extract_strided_slice %626 {offsets = [0, 0], sizes = [8, 384], strides = [1, 1]} : vector<16x768xf32> to vector<8x384xf32>
    %629 = vector.extract_strided_slice %627 {offsets = [0, 0], sizes = [8, 32], strides = [1, 1]} : vector<8x384xf32> to vector<8x32xf32>
    %630 = vector.extract_strided_slice %628 {offsets = [0, 0], sizes = [8, 32], strides = [1, 1]} : vector<8x384xf32> to vector<8x32xf32>
    %631 = arith.addf %629, %630 : vector<8x32xf32>
    %632 = arith.negf %631 : vector<8x32xf32>
    %633 = math.exp %632 : vector<8x32xf32>
    %cst_180 = arith.constant 1.000000e+00 : f32
    %634 = vector.broadcast %cst_180 : f32 to vector<8x32xf32>
    %635 = arith.addf %634, %633 : vector<8x32xf32>
    %636 = arith.divf %634, %635 : vector<8x32xf32>
    %637 = vector.extract_strided_slice %627 {offsets = [0, 128], sizes = [8, 32], strides = [1, 1]} : vector<8x384xf32> to vector<8x32xf32>
    %638 = vector.extract_strided_slice %628 {offsets = [0, 128], sizes = [8, 32], strides = [1, 1]} : vector<8x384xf32> to vector<8x32xf32>
    %639 = arith.addf %637, %638 : vector<8x32xf32>
    %640 = arith.negf %639 : vector<8x32xf32>
    %641 = math.exp %640 : vector<8x32xf32>
    %cst_181 = arith.constant 1.000000e+00 : f32
    %642 = vector.broadcast %cst_181 : f32 to vector<8x32xf32>
    %643 = arith.addf %642, %641 : vector<8x32xf32>
    %644 = arith.divf %642, %643 : vector<8x32xf32>
    %645 = vector.extract_strided_slice %627 {offsets = [0, 256], sizes = [8, 32], strides = [1, 1]} : vector<8x384xf32> to vector<8x32xf32>
    %646 = vector.extract_strided_slice %628 {offsets = [0, 256], sizes = [8, 32], strides = [1, 1]} : vector<8x384xf32> to vector<8x32xf32>
    %647 = arith.addf %646, %108 : vector<8x32xf32>
    %648 = arith.mulf %636, %647 : vector<8x32xf32>
    %649 = arith.addf %645, %648 : vector<8x32xf32>
    %650 = math.tanh %649 : vector<8x32xf32>
    %cst_182 = arith.constant 1.000000e+00 : f32
    %651 = vector.broadcast %cst_182 : f32 to vector<8x32xf32>
    %652 = arith.subf %651, %644 : vector<8x32xf32>
    %653 = arith.mulf %652, %650 : vector<8x32xf32>
    %654 = arith.mulf %644, %623 : vector<8x32xf32>
    %655 = arith.addf %653, %654 : vector<8x32xf32>
    %c56_183 = arith.constant 56 : index
    %c384_184 = arith.constant 384 : index
    %656 = vector.load %arg24[%c56_183, %c384_184] : memref<64x768xf32, #tpu.memory_space<vmem>>, vector<8x384xf32>
    %657 = vector.extract_strided_slice %626 {offsets = [8, 384], sizes = [8, 384], strides = [1, 1]} : vector<16x768xf32> to vector<8x384xf32>
    %658 = vector.extract_strided_slice %656 {offsets = [0, 0], sizes = [8, 32], strides = [1, 1]} : vector<8x384xf32> to vector<8x32xf32>
    %659 = vector.extract_strided_slice %657 {offsets = [0, 0], sizes = [8, 32], strides = [1, 1]} : vector<8x384xf32> to vector<8x32xf32>
    %660 = arith.addf %658, %659 : vector<8x32xf32>
    %661 = arith.negf %660 : vector<8x32xf32>
    %662 = math.exp %661 : vector<8x32xf32>
    %cst_185 = arith.constant 1.000000e+00 : f32
    %663 = vector.broadcast %cst_185 : f32 to vector<8x32xf32>
    %664 = arith.addf %663, %662 : vector<8x32xf32>
    %665 = arith.divf %663, %664 : vector<8x32xf32>
    %666 = vector.extract_strided_slice %656 {offsets = [0, 128], sizes = [8, 32], strides = [1, 1]} : vector<8x384xf32> to vector<8x32xf32>
    %667 = vector.extract_strided_slice %657 {offsets = [0, 128], sizes = [8, 32], strides = [1, 1]} : vector<8x384xf32> to vector<8x32xf32>
    %668 = arith.addf %666, %667 : vector<8x32xf32>
    %669 = arith.negf %668 : vector<8x32xf32>
    %670 = math.exp %669 : vector<8x32xf32>
    %cst_186 = arith.constant 1.000000e+00 : f32
    %671 = vector.broadcast %cst_186 : f32 to vector<8x32xf32>
    %672 = arith.addf %671, %670 : vector<8x32xf32>
    %673 = arith.divf %671, %672 : vector<8x32xf32>
    %674 = vector.extract_strided_slice %656 {offsets = [0, 256], sizes = [8, 32], strides = [1, 1]} : vector<8x384xf32> to vector<8x32xf32>
    %675 = vector.extract_strided_slice %657 {offsets = [0, 256], sizes = [8, 32], strides = [1, 1]} : vector<8x384xf32> to vector<8x32xf32>
    %676 = arith.addf %675, %111 : vector<8x32xf32>
    %677 = arith.mulf %665, %676 : vector<8x32xf32>
    %678 = arith.addf %674, %677 : vector<8x32xf32>
    %679 = math.tanh %678 : vector<8x32xf32>
    %cst_187 = arith.constant 1.000000e+00 : f32
    %680 = vector.broadcast %cst_187 : f32 to vector<8x32xf32>
    %681 = arith.subf %680, %673 : vector<8x32xf32>
    %682 = arith.mulf %681, %679 : vector<8x32xf32>
    %683 = arith.mulf %673, %624 : vector<8x32xf32>
    %684 = arith.addf %682, %683 : vector<8x32xf32>
    %685 = tpu.concatenate %655, %684 in 0 : vector<8x32xf32>, vector<8x32xf32> -> vector<16x32xf32>
    %cst_188 = arith.constant dense<0.000000e+00> : vector<16x768xf32>
    %686 = tpu.matmul %685, %622, %cst_188 {dimension_numbers = #tpu.dot_dimension_numbers<[1], [0], [0], [1], [0, 0, 1, 1], [], []>} : vector<16x32xf32>, vector<32x768xf32>, vector<16x768xf32> -> vector<16x768xf32>
    %c8_189 = arith.constant 8 : index
    %c0_190 = arith.constant 0 : index
    %687 = vector.load %arg24[%c8_189, %c0_190] : memref<64x768xf32, #tpu.memory_space<vmem>>, vector<8x384xf32>
    %688 = vector.extract_strided_slice %686 {offsets = [0, 0], sizes = [8, 384], strides = [1, 1]} : vector<16x768xf32> to vector<8x384xf32>
    %689 = vector.extract_strided_slice %687 {offsets = [0, 0], sizes = [8, 32], strides = [1, 1]} : vector<8x384xf32> to vector<8x32xf32>
    %690 = vector.extract_strided_slice %688 {offsets = [0, 0], sizes = [8, 32], strides = [1, 1]} : vector<8x384xf32> to vector<8x32xf32>
    %691 = arith.addf %689, %690 : vector<8x32xf32>
    %692 = arith.negf %691 : vector<8x32xf32>
    %693 = math.exp %692 : vector<8x32xf32>
    %cst_191 = arith.constant 1.000000e+00 : f32
    %694 = vector.broadcast %cst_191 : f32 to vector<8x32xf32>
    %695 = arith.addf %694, %693 : vector<8x32xf32>
    %696 = arith.divf %694, %695 : vector<8x32xf32>
    %697 = vector.extract_strided_slice %687 {offsets = [0, 128], sizes = [8, 32], strides = [1, 1]} : vector<8x384xf32> to vector<8x32xf32>
    %698 = vector.extract_strided_slice %688 {offsets = [0, 128], sizes = [8, 32], strides = [1, 1]} : vector<8x384xf32> to vector<8x32xf32>
    %699 = arith.addf %697, %698 : vector<8x32xf32>
    %700 = arith.negf %699 : vector<8x32xf32>
    %701 = math.exp %700 : vector<8x32xf32>
    %cst_192 = arith.constant 1.000000e+00 : f32
    %702 = vector.broadcast %cst_192 : f32 to vector<8x32xf32>
    %703 = arith.addf %702, %701 : vector<8x32xf32>
    %704 = arith.divf %702, %703 : vector<8x32xf32>
    %705 = vector.extract_strided_slice %687 {offsets = [0, 256], sizes = [8, 32], strides = [1, 1]} : vector<8x384xf32> to vector<8x32xf32>
    %706 = vector.extract_strided_slice %688 {offsets = [0, 256], sizes = [8, 32], strides = [1, 1]} : vector<8x384xf32> to vector<8x32xf32>
    %707 = arith.addf %706, %108 : vector<8x32xf32>
    %708 = arith.mulf %696, %707 : vector<8x32xf32>
    %709 = arith.addf %705, %708 : vector<8x32xf32>
    %710 = math.tanh %709 : vector<8x32xf32>
    %cst_193 = arith.constant 1.000000e+00 : f32
    %711 = vector.broadcast %cst_193 : f32 to vector<8x32xf32>
    %712 = arith.subf %711, %704 : vector<8x32xf32>
    %713 = arith.mulf %712, %710 : vector<8x32xf32>
    %714 = arith.mulf %704, %655 : vector<8x32xf32>
    %715 = arith.addf %713, %714 : vector<8x32xf32>
    %c48_194 = arith.constant 48 : index
    %c384_195 = arith.constant 384 : index
    %716 = vector.load %arg24[%c48_194, %c384_195] : memref<64x768xf32, #tpu.memory_space<vmem>>, vector<8x384xf32>
    %717 = vector.extract_strided_slice %686 {offsets = [8, 384], sizes = [8, 384], strides = [1, 1]} : vector<16x768xf32> to vector<8x384xf32>
    %718 = vector.extract_strided_slice %716 {offsets = [0, 0], sizes = [8, 32], strides = [1, 1]} : vector<8x384xf32> to vector<8x32xf32>
    %719 = vector.extract_strided_slice %717 {offsets = [0, 0], sizes = [8, 32], strides = [1, 1]} : vector<8x384xf32> to vector<8x32xf32>
    %720 = arith.addf %718, %719 : vector<8x32xf32>
    %721 = arith.negf %720 : vector<8x32xf32>
    %722 = math.exp %721 : vector<8x32xf32>
    %cst_196 = arith.constant 1.000000e+00 : f32
    %723 = vector.broadcast %cst_196 : f32 to vector<8x32xf32>
    %724 = arith.addf %723, %722 : vector<8x32xf32>
    %725 = arith.divf %723, %724 : vector<8x32xf32>
    %726 = vector.extract_strided_slice %716 {offsets = [0, 128], sizes = [8, 32], strides = [1, 1]} : vector<8x384xf32> to vector<8x32xf32>
    %727 = vector.extract_strided_slice %717 {offsets = [0, 128], sizes = [8, 32], strides = [1, 1]} : vector<8x384xf32> to vector<8x32xf32>
    %728 = arith.addf %726, %727 : vector<8x32xf32>
    %729 = arith.negf %728 : vector<8x32xf32>
    %730 = math.exp %729 : vector<8x32xf32>
    %cst_197 = arith.constant 1.000000e+00 : f32
    %731 = vector.broadcast %cst_197 : f32 to vector<8x32xf32>
    %732 = arith.addf %731, %730 : vector<8x32xf32>
    %733 = arith.divf %731, %732 : vector<8x32xf32>
    %734 = vector.extract_strided_slice %716 {offsets = [0, 256], sizes = [8, 32], strides = [1, 1]} : vector<8x384xf32> to vector<8x32xf32>
    %735 = vector.extract_strided_slice %717 {offsets = [0, 256], sizes = [8, 32], strides = [1, 1]} : vector<8x384xf32> to vector<8x32xf32>
    %736 = arith.addf %735, %111 : vector<8x32xf32>
    %737 = arith.mulf %725, %736 : vector<8x32xf32>
    %738 = arith.addf %734, %737 : vector<8x32xf32>
    %739 = math.tanh %738 : vector<8x32xf32>
    %cst_198 = arith.constant 1.000000e+00 : f32
    %740 = vector.broadcast %cst_198 : f32 to vector<8x32xf32>
    %741 = arith.subf %740, %733 : vector<8x32xf32>
    %742 = arith.mulf %741, %739 : vector<8x32xf32>
    %743 = arith.mulf %733, %684 : vector<8x32xf32>
    %744 = arith.addf %742, %743 : vector<8x32xf32>
    %745 = tpu.concatenate %715, %744 in 0 : vector<8x32xf32>, vector<8x32xf32> -> vector<16x32xf32>
    %cst_199 = arith.constant dense<0.000000e+00> : vector<16x768xf32>
    %746 = tpu.matmul %745, %622, %cst_199 {dimension_numbers = #tpu.dot_dimension_numbers<[1], [0], [0], [1], [0, 0, 1, 1], [], []>} : vector<16x32xf32>, vector<32x768xf32>, vector<16x768xf32> -> vector<16x768xf32>
    %c16_200 = arith.constant 16 : index
    %c0_201 = arith.constant 0 : index
    %747 = vector.load %arg24[%c16_200, %c0_201] : memref<64x768xf32, #tpu.memory_space<vmem>>, vector<8x384xf32>
    %748 = vector.extract_strided_slice %746 {offsets = [0, 0], sizes = [8, 384], strides = [1, 1]} : vector<16x768xf32> to vector<8x384xf32>
    %749 = vector.extract_strided_slice %747 {offsets = [0, 0], sizes = [8, 32], strides = [1, 1]} : vector<8x384xf32> to vector<8x32xf32>
    %750 = vector.extract_strided_slice %748 {offsets = [0, 0], sizes = [8, 32], strides = [1, 1]} : vector<8x384xf32> to vector<8x32xf32>
    %751 = arith.addf %749, %750 : vector<8x32xf32>
    %752 = arith.negf %751 : vector<8x32xf32>
    %753 = math.exp %752 : vector<8x32xf32>
    %cst_202 = arith.constant 1.000000e+00 : f32
    %754 = vector.broadcast %cst_202 : f32 to vector<8x32xf32>
    %755 = arith.addf %754, %753 : vector<8x32xf32>
    %756 = arith.divf %754, %755 : vector<8x32xf32>
    %757 = vector.extract_strided_slice %747 {offsets = [0, 128], sizes = [8, 32], strides = [1, 1]} : vector<8x384xf32> to vector<8x32xf32>
    %758 = vector.extract_strided_slice %748 {offsets = [0, 128], sizes = [8, 32], strides = [1, 1]} : vector<8x384xf32> to vector<8x32xf32>
    %759 = arith.addf %757, %758 : vector<8x32xf32>
    %760 = arith.negf %759 : vector<8x32xf32>
    %761 = math.exp %760 : vector<8x32xf32>
    %cst_203 = arith.constant 1.000000e+00 : f32
    %762 = vector.broadcast %cst_203 : f32 to vector<8x32xf32>
    %763 = arith.addf %762, %761 : vector<8x32xf32>
    %764 = arith.divf %762, %763 : vector<8x32xf32>
    %765 = vector.extract_strided_slice %747 {offsets = [0, 256], sizes = [8, 32], strides = [1, 1]} : vector<8x384xf32> to vector<8x32xf32>
    %766 = vector.extract_strided_slice %748 {offsets = [0, 256], sizes = [8, 32], strides = [1, 1]} : vector<8x384xf32> to vector<8x32xf32>
    %767 = arith.addf %766, %108 : vector<8x32xf32>
    %768 = arith.mulf %756, %767 : vector<8x32xf32>
    %769 = arith.addf %765, %768 : vector<8x32xf32>
    %770 = math.tanh %769 : vector<8x32xf32>
    %cst_204 = arith.constant 1.000000e+00 : f32
    %771 = vector.broadcast %cst_204 : f32 to vector<8x32xf32>
    %772 = arith.subf %771, %764 : vector<8x32xf32>
    %773 = arith.mulf %772, %770 : vector<8x32xf32>
    %774 = arith.mulf %764, %715 : vector<8x32xf32>
    %775 = arith.addf %773, %774 : vector<8x32xf32>
    %c40_205 = arith.constant 40 : index
    %c384_206 = arith.constant 384 : index
    %776 = vector.load %arg24[%c40_205, %c384_206] : memref<64x768xf32, #tpu.memory_space<vmem>>, vector<8x384xf32>
    %777 = vector.extract_strided_slice %746 {offsets = [8, 384], sizes = [8, 384], strides = [1, 1]} : vector<16x768xf32> to vector<8x384xf32>
    %778 = vector.extract_strided_slice %776 {offsets = [0, 0], sizes = [8, 32], strides = [1, 1]} : vector<8x384xf32> to vector<8x32xf32>
    %779 = vector.extract_strided_slice %777 {offsets = [0, 0], sizes = [8, 32], strides = [1, 1]} : vector<8x384xf32> to vector<8x32xf32>
    %780 = arith.addf %778, %779 : vector<8x32xf32>
    %781 = arith.negf %780 : vector<8x32xf32>
    %782 = math.exp %781 : vector<8x32xf32>
    %cst_207 = arith.constant 1.000000e+00 : f32
    %783 = vector.broadcast %cst_207 : f32 to vector<8x32xf32>
    %784 = arith.addf %783, %782 : vector<8x32xf32>
    %785 = arith.divf %783, %784 : vector<8x32xf32>
    %786 = vector.extract_strided_slice %776 {offsets = [0, 128], sizes = [8, 32], strides = [1, 1]} : vector<8x384xf32> to vector<8x32xf32>
    %787 = vector.extract_strided_slice %777 {offsets = [0, 128], sizes = [8, 32], strides = [1, 1]} : vector<8x384xf32> to vector<8x32xf32>
    %788 = arith.addf %786, %787 : vector<8x32xf32>
    %789 = arith.negf %788 : vector<8x32xf32>
    %790 = math.exp %789 : vector<8x32xf32>
    %cst_208 = arith.constant 1.000000e+00 : f32
    %791 = vector.broadcast %cst_208 : f32 to vector<8x32xf32>
    %792 = arith.addf %791, %790 : vector<8x32xf32>
    %793 = arith.divf %791, %792 : vector<8x32xf32>
    %794 = vector.extract_strided_slice %776 {offsets = [0, 256], sizes = [8, 32], strides = [1, 1]} : vector<8x384xf32> to vector<8x32xf32>
    %795 = vector.extract_strided_slice %777 {offsets = [0, 256], sizes = [8, 32], strides = [1, 1]} : vector<8x384xf32> to vector<8x32xf32>
    %796 = arith.addf %795, %111 : vector<8x32xf32>
    %797 = arith.mulf %785, %796 : vector<8x32xf32>
    %798 = arith.addf %794, %797 : vector<8x32xf32>
    %799 = math.tanh %798 : vector<8x32xf32>
    %cst_209 = arith.constant 1.000000e+00 : f32
    %800 = vector.broadcast %cst_209 : f32 to vector<8x32xf32>
    %801 = arith.subf %800, %793 : vector<8x32xf32>
    %802 = arith.mulf %801, %799 : vector<8x32xf32>
    %803 = arith.mulf %793, %744 : vector<8x32xf32>
    %804 = arith.addf %802, %803 : vector<8x32xf32>
    %805 = tpu.concatenate %775, %804 in 0 : vector<8x32xf32>, vector<8x32xf32> -> vector<16x32xf32>
    %cst_210 = arith.constant dense<0.000000e+00> : vector<16x768xf32>
    %806 = tpu.matmul %805, %622, %cst_210 {dimension_numbers = #tpu.dot_dimension_numbers<[1], [0], [0], [1], [0, 0, 1, 1], [], []>} : vector<16x32xf32>, vector<32x768xf32>, vector<16x768xf32> -> vector<16x768xf32>
    %c24_211 = arith.constant 24 : index
    %c0_212 = arith.constant 0 : index
    %807 = vector.load %arg24[%c24_211, %c0_212] : memref<64x768xf32, #tpu.memory_space<vmem>>, vector<8x384xf32>
    %808 = vector.extract_strided_slice %806 {offsets = [0, 0], sizes = [8, 384], strides = [1, 1]} : vector<16x768xf32> to vector<8x384xf32>
    %809 = vector.extract_strided_slice %807 {offsets = [0, 0], sizes = [8, 32], strides = [1, 1]} : vector<8x384xf32> to vector<8x32xf32>
    %810 = vector.extract_strided_slice %808 {offsets = [0, 0], sizes = [8, 32], strides = [1, 1]} : vector<8x384xf32> to vector<8x32xf32>
    %811 = arith.addf %809, %810 : vector<8x32xf32>
    %812 = arith.negf %811 : vector<8x32xf32>
    %813 = math.exp %812 : vector<8x32xf32>
    %cst_213 = arith.constant 1.000000e+00 : f32
    %814 = vector.broadcast %cst_213 : f32 to vector<8x32xf32>
    %815 = arith.addf %814, %813 : vector<8x32xf32>
    %816 = arith.divf %814, %815 : vector<8x32xf32>
    %817 = vector.extract_strided_slice %807 {offsets = [0, 128], sizes = [8, 32], strides = [1, 1]} : vector<8x384xf32> to vector<8x32xf32>
    %818 = vector.extract_strided_slice %808 {offsets = [0, 128], sizes = [8, 32], strides = [1, 1]} : vector<8x384xf32> to vector<8x32xf32>
    %819 = arith.addf %817, %818 : vector<8x32xf32>
    %820 = arith.negf %819 : vector<8x32xf32>
    %821 = math.exp %820 : vector<8x32xf32>
    %cst_214 = arith.constant 1.000000e+00 : f32
    %822 = vector.broadcast %cst_214 : f32 to vector<8x32xf32>
    %823 = arith.addf %822, %821 : vector<8x32xf32>
    %824 = arith.divf %822, %823 : vector<8x32xf32>
    %825 = vector.extract_strided_slice %807 {offsets = [0, 256], sizes = [8, 32], strides = [1, 1]} : vector<8x384xf32> to vector<8x32xf32>
    %826 = vector.extract_strided_slice %808 {offsets = [0, 256], sizes = [8, 32], strides = [1, 1]} : vector<8x384xf32> to vector<8x32xf32>
    %827 = arith.addf %826, %108 : vector<8x32xf32>
    %828 = arith.mulf %816, %827 : vector<8x32xf32>
    %829 = arith.addf %825, %828 : vector<8x32xf32>
    %830 = math.tanh %829 : vector<8x32xf32>
    %cst_215 = arith.constant 1.000000e+00 : f32
    %831 = vector.broadcast %cst_215 : f32 to vector<8x32xf32>
    %832 = arith.subf %831, %824 : vector<8x32xf32>
    %833 = arith.mulf %832, %830 : vector<8x32xf32>
    %834 = arith.mulf %824, %775 : vector<8x32xf32>
    %835 = arith.addf %833, %834 : vector<8x32xf32>
    %c32_216 = arith.constant 32 : index
    %c384_217 = arith.constant 384 : index
    %836 = vector.load %arg24[%c32_216, %c384_217] : memref<64x768xf32, #tpu.memory_space<vmem>>, vector<8x384xf32>
    %837 = vector.extract_strided_slice %806 {offsets = [8, 384], sizes = [8, 384], strides = [1, 1]} : vector<16x768xf32> to vector<8x384xf32>
    %838 = vector.extract_strided_slice %836 {offsets = [0, 0], sizes = [8, 32], strides = [1, 1]} : vector<8x384xf32> to vector<8x32xf32>
    %839 = vector.extract_strided_slice %837 {offsets = [0, 0], sizes = [8, 32], strides = [1, 1]} : vector<8x384xf32> to vector<8x32xf32>
    %840 = arith.addf %838, %839 : vector<8x32xf32>
    %841 = arith.negf %840 : vector<8x32xf32>
    %842 = math.exp %841 : vector<8x32xf32>
    %cst_218 = arith.constant 1.000000e+00 : f32
    %843 = vector.broadcast %cst_218 : f32 to vector<8x32xf32>
    %844 = arith.addf %843, %842 : vector<8x32xf32>
    %845 = arith.divf %843, %844 : vector<8x32xf32>
    %846 = vector.extract_strided_slice %836 {offsets = [0, 128], sizes = [8, 32], strides = [1, 1]} : vector<8x384xf32> to vector<8x32xf32>
    %847 = vector.extract_strided_slice %837 {offsets = [0, 128], sizes = [8, 32], strides = [1, 1]} : vector<8x384xf32> to vector<8x32xf32>
    %848 = arith.addf %846, %847 : vector<8x32xf32>
    %849 = arith.negf %848 : vector<8x32xf32>
    %850 = math.exp %849 : vector<8x32xf32>
    %cst_219 = arith.constant 1.000000e+00 : f32
    %851 = vector.broadcast %cst_219 : f32 to vector<8x32xf32>
    %852 = arith.addf %851, %850 : vector<8x32xf32>
    %853 = arith.divf %851, %852 : vector<8x32xf32>
    %854 = vector.extract_strided_slice %836 {offsets = [0, 256], sizes = [8, 32], strides = [1, 1]} : vector<8x384xf32> to vector<8x32xf32>
    %855 = vector.extract_strided_slice %837 {offsets = [0, 256], sizes = [8, 32], strides = [1, 1]} : vector<8x384xf32> to vector<8x32xf32>
    %856 = arith.addf %855, %111 : vector<8x32xf32>
    %857 = arith.mulf %845, %856 : vector<8x32xf32>
    %858 = arith.addf %854, %857 : vector<8x32xf32>
    %859 = math.tanh %858 : vector<8x32xf32>
    %cst_220 = arith.constant 1.000000e+00 : f32
    %860 = vector.broadcast %cst_220 : f32 to vector<8x32xf32>
    %861 = arith.subf %860, %853 : vector<8x32xf32>
    %862 = arith.mulf %861, %859 : vector<8x32xf32>
    %863 = arith.mulf %853, %804 : vector<8x32xf32>
    %864 = arith.addf %862, %863 : vector<8x32xf32>
    %865 = tpu.concatenate %835, %864 in 0 : vector<8x32xf32>, vector<8x32xf32> -> vector<16x32xf32>
    %cst_221 = arith.constant dense<0.000000e+00> : vector<16x768xf32>
    %866 = tpu.matmul %865, %622, %cst_221 {dimension_numbers = #tpu.dot_dimension_numbers<[1], [0], [0], [1], [0, 0, 1, 1], [], []>} : vector<16x32xf32>, vector<32x768xf32>, vector<16x768xf32> -> vector<16x768xf32>
    %c32_222 = arith.constant 32 : index
    %c0_223 = arith.constant 0 : index
    %867 = vector.load %arg24[%c32_222, %c0_223] : memref<64x768xf32, #tpu.memory_space<vmem>>, vector<8x384xf32>
    %868 = vector.extract_strided_slice %866 {offsets = [0, 0], sizes = [8, 384], strides = [1, 1]} : vector<16x768xf32> to vector<8x384xf32>
    %869 = vector.extract_strided_slice %867 {offsets = [0, 0], sizes = [8, 32], strides = [1, 1]} : vector<8x384xf32> to vector<8x32xf32>
    %870 = vector.extract_strided_slice %868 {offsets = [0, 0], sizes = [8, 32], strides = [1, 1]} : vector<8x384xf32> to vector<8x32xf32>
    %871 = arith.addf %869, %870 : vector<8x32xf32>
    %872 = arith.negf %871 : vector<8x32xf32>
    %873 = math.exp %872 : vector<8x32xf32>
    %cst_224 = arith.constant 1.000000e+00 : f32
    %874 = vector.broadcast %cst_224 : f32 to vector<8x32xf32>
    %875 = arith.addf %874, %873 : vector<8x32xf32>
    %876 = arith.divf %874, %875 : vector<8x32xf32>
    %877 = vector.extract_strided_slice %867 {offsets = [0, 128], sizes = [8, 32], strides = [1, 1]} : vector<8x384xf32> to vector<8x32xf32>
    %878 = vector.extract_strided_slice %868 {offsets = [0, 128], sizes = [8, 32], strides = [1, 1]} : vector<8x384xf32> to vector<8x32xf32>
    %879 = arith.addf %877, %878 : vector<8x32xf32>
    %880 = arith.negf %879 : vector<8x32xf32>
    %881 = math.exp %880 : vector<8x32xf32>
    %cst_225 = arith.constant 1.000000e+00 : f32
    %882 = vector.broadcast %cst_225 : f32 to vector<8x32xf32>
    %883 = arith.addf %882, %881 : vector<8x32xf32>
    %884 = arith.divf %882, %883 : vector<8x32xf32>
    %885 = vector.extract_strided_slice %867 {offsets = [0, 256], sizes = [8, 32], strides = [1, 1]} : vector<8x384xf32> to vector<8x32xf32>
    %886 = vector.extract_strided_slice %868 {offsets = [0, 256], sizes = [8, 32], strides = [1, 1]} : vector<8x384xf32> to vector<8x32xf32>
    %887 = arith.addf %886, %108 : vector<8x32xf32>
    %888 = arith.mulf %876, %887 : vector<8x32xf32>
    %889 = arith.addf %885, %888 : vector<8x32xf32>
    %890 = math.tanh %889 : vector<8x32xf32>
    %cst_226 = arith.constant 1.000000e+00 : f32
    %891 = vector.broadcast %cst_226 : f32 to vector<8x32xf32>
    %892 = arith.subf %891, %884 : vector<8x32xf32>
    %893 = arith.mulf %892, %890 : vector<8x32xf32>
    %894 = arith.mulf %884, %835 : vector<8x32xf32>
    %895 = arith.addf %893, %894 : vector<8x32xf32>
    %c24_227 = arith.constant 24 : index
    %c384_228 = arith.constant 384 : index
    %896 = vector.load %arg24[%c24_227, %c384_228] : memref<64x768xf32, #tpu.memory_space<vmem>>, vector<8x384xf32>
    %897 = vector.extract_strided_slice %866 {offsets = [8, 384], sizes = [8, 384], strides = [1, 1]} : vector<16x768xf32> to vector<8x384xf32>
    %898 = vector.extract_strided_slice %896 {offsets = [0, 0], sizes = [8, 32], strides = [1, 1]} : vector<8x384xf32> to vector<8x32xf32>
    %899 = vector.extract_strided_slice %897 {offsets = [0, 0], sizes = [8, 32], strides = [1, 1]} : vector<8x384xf32> to vector<8x32xf32>
    %900 = arith.addf %898, %899 : vector<8x32xf32>
    %901 = arith.negf %900 : vector<8x32xf32>
    %902 = math.exp %901 : vector<8x32xf32>
    %cst_229 = arith.constant 1.000000e+00 : f32
    %903 = vector.broadcast %cst_229 : f32 to vector<8x32xf32>
    %904 = arith.addf %903, %902 : vector<8x32xf32>
    %905 = arith.divf %903, %904 : vector<8x32xf32>
    %906 = vector.extract_strided_slice %896 {offsets = [0, 128], sizes = [8, 32], strides = [1, 1]} : vector<8x384xf32> to vector<8x32xf32>
    %907 = vector.extract_strided_slice %897 {offsets = [0, 128], sizes = [8, 32], strides = [1, 1]} : vector<8x384xf32> to vector<8x32xf32>
    %908 = arith.addf %906, %907 : vector<8x32xf32>
    %909 = arith.negf %908 : vector<8x32xf32>
    %910 = math.exp %909 : vector<8x32xf32>
    %cst_230 = arith.constant 1.000000e+00 : f32
    %911 = vector.broadcast %cst_230 : f32 to vector<8x32xf32>
    %912 = arith.addf %911, %910 : vector<8x32xf32>
    %913 = arith.divf %911, %912 : vector<8x32xf32>
    %914 = vector.extract_strided_slice %896 {offsets = [0, 256], sizes = [8, 32], strides = [1, 1]} : vector<8x384xf32> to vector<8x32xf32>
    %915 = vector.extract_strided_slice %897 {offsets = [0, 256], sizes = [8, 32], strides = [1, 1]} : vector<8x384xf32> to vector<8x32xf32>
    %916 = arith.addf %915, %111 : vector<8x32xf32>
    %917 = arith.mulf %905, %916 : vector<8x32xf32>
    %918 = arith.addf %914, %917 : vector<8x32xf32>
    %919 = math.tanh %918 : vector<8x32xf32>
    %cst_231 = arith.constant 1.000000e+00 : f32
    %920 = vector.broadcast %cst_231 : f32 to vector<8x32xf32>
    %921 = arith.subf %920, %913 : vector<8x32xf32>
    %922 = arith.mulf %921, %919 : vector<8x32xf32>
    %923 = arith.mulf %913, %864 : vector<8x32xf32>
    %924 = arith.addf %922, %923 : vector<8x32xf32>
    %925 = tpu.concatenate %895, %924 in 0 : vector<8x32xf32>, vector<8x32xf32> -> vector<16x32xf32>
    %cst_232 = arith.constant dense<0.000000e+00> : vector<16x768xf32>
    %926 = tpu.matmul %925, %622, %cst_232 {dimension_numbers = #tpu.dot_dimension_numbers<[1], [0], [0], [1], [0, 0, 1, 1], [], []>} : vector<16x32xf32>, vector<32x768xf32>, vector<16x768xf32> -> vector<16x768xf32>
    %c40_233 = arith.constant 40 : index
    %c0_234 = arith.constant 0 : index
    %927 = vector.load %arg24[%c40_233, %c0_234] : memref<64x768xf32, #tpu.memory_space<vmem>>, vector<8x384xf32>
    %928 = vector.extract_strided_slice %926 {offsets = [0, 0], sizes = [8, 384], strides = [1, 1]} : vector<16x768xf32> to vector<8x384xf32>
    %929 = vector.extract_strided_slice %927 {offsets = [0, 0], sizes = [8, 32], strides = [1, 1]} : vector<8x384xf32> to vector<8x32xf32>
    %930 = vector.extract_strided_slice %928 {offsets = [0, 0], sizes = [8, 32], strides = [1, 1]} : vector<8x384xf32> to vector<8x32xf32>
    %931 = arith.addf %929, %930 : vector<8x32xf32>
    %932 = arith.negf %931 : vector<8x32xf32>
    %933 = math.exp %932 : vector<8x32xf32>
    %cst_235 = arith.constant 1.000000e+00 : f32
    %934 = vector.broadcast %cst_235 : f32 to vector<8x32xf32>
    %935 = arith.addf %934, %933 : vector<8x32xf32>
    %936 = arith.divf %934, %935 : vector<8x32xf32>
    %937 = vector.extract_strided_slice %927 {offsets = [0, 128], sizes = [8, 32], strides = [1, 1]} : vector<8x384xf32> to vector<8x32xf32>
    %938 = vector.extract_strided_slice %928 {offsets = [0, 128], sizes = [8, 32], strides = [1, 1]} : vector<8x384xf32> to vector<8x32xf32>
    %939 = arith.addf %937, %938 : vector<8x32xf32>
    %940 = arith.negf %939 : vector<8x32xf32>
    %941 = math.exp %940 : vector<8x32xf32>
    %cst_236 = arith.constant 1.000000e+00 : f32
    %942 = vector.broadcast %cst_236 : f32 to vector<8x32xf32>
    %943 = arith.addf %942, %941 : vector<8x32xf32>
    %944 = arith.divf %942, %943 : vector<8x32xf32>
    %945 = vector.extract_strided_slice %927 {offsets = [0, 256], sizes = [8, 32], strides = [1, 1]} : vector<8x384xf32> to vector<8x32xf32>
    %946 = vector.extract_strided_slice %928 {offsets = [0, 256], sizes = [8, 32], strides = [1, 1]} : vector<8x384xf32> to vector<8x32xf32>
    %947 = arith.addf %946, %108 : vector<8x32xf32>
    %948 = arith.mulf %936, %947 : vector<8x32xf32>
    %949 = arith.addf %945, %948 : vector<8x32xf32>
    %950 = math.tanh %949 : vector<8x32xf32>
    %cst_237 = arith.constant 1.000000e+00 : f32
    %951 = vector.broadcast %cst_237 : f32 to vector<8x32xf32>
    %952 = arith.subf %951, %944 : vector<8x32xf32>
    %953 = arith.mulf %952, %950 : vector<8x32xf32>
    %954 = arith.mulf %944, %895 : vector<8x32xf32>
    %955 = arith.addf %953, %954 : vector<8x32xf32>
    %c16_238 = arith.constant 16 : index
    %c384_239 = arith.constant 384 : index
    %956 = vector.load %arg24[%c16_238, %c384_239] : memref<64x768xf32, #tpu.memory_space<vmem>>, vector<8x384xf32>
    %957 = vector.extract_strided_slice %926 {offsets = [8, 384], sizes = [8, 384], strides = [1, 1]} : vector<16x768xf32> to vector<8x384xf32>
    %958 = vector.extract_strided_slice %956 {offsets = [0, 0], sizes = [8, 32], strides = [1, 1]} : vector<8x384xf32> to vector<8x32xf32>
    %959 = vector.extract_strided_slice %957 {offsets = [0, 0], sizes = [8, 32], strides = [1, 1]} : vector<8x384xf32> to vector<8x32xf32>
    %960 = arith.addf %958, %959 : vector<8x32xf32>
    %961 = arith.negf %960 : vector<8x32xf32>
    %962 = math.exp %961 : vector<8x32xf32>
    %cst_240 = arith.constant 1.000000e+00 : f32
    %963 = vector.broadcast %cst_240 : f32 to vector<8x32xf32>
    %964 = arith.addf %963, %962 : vector<8x32xf32>
    %965 = arith.divf %963, %964 : vector<8x32xf32>
    %966 = vector.extract_strided_slice %956 {offsets = [0, 128], sizes = [8, 32], strides = [1, 1]} : vector<8x384xf32> to vector<8x32xf32>
    %967 = vector.extract_strided_slice %957 {offsets = [0, 128], sizes = [8, 32], strides = [1, 1]} : vector<8x384xf32> to vector<8x32xf32>
    %968 = arith.addf %966, %967 : vector<8x32xf32>
    %969 = arith.negf %968 : vector<8x32xf32>
    %970 = math.exp %969 : vector<8x32xf32>
    %cst_241 = arith.constant 1.000000e+00 : f32
    %971 = vector.broadcast %cst_241 : f32 to vector<8x32xf32>
    %972 = arith.addf %971, %970 : vector<8x32xf32>
    %973 = arith.divf %971, %972 : vector<8x32xf32>
    %974 = vector.extract_strided_slice %956 {offsets = [0, 256], sizes = [8, 32], strides = [1, 1]} : vector<8x384xf32> to vector<8x32xf32>
    %975 = vector.extract_strided_slice %957 {offsets = [0, 256], sizes = [8, 32], strides = [1, 1]} : vector<8x384xf32> to vector<8x32xf32>
    %976 = arith.addf %975, %111 : vector<8x32xf32>
    %977 = arith.mulf %965, %976 : vector<8x32xf32>
    %978 = arith.addf %974, %977 : vector<8x32xf32>
    %979 = math.tanh %978 : vector<8x32xf32>
    %cst_242 = arith.constant 1.000000e+00 : f32
    %980 = vector.broadcast %cst_242 : f32 to vector<8x32xf32>
    %981 = arith.subf %980, %973 : vector<8x32xf32>
    %982 = arith.mulf %981, %979 : vector<8x32xf32>
    %983 = arith.mulf %973, %924 : vector<8x32xf32>
    %984 = arith.addf %982, %983 : vector<8x32xf32>
    %985 = tpu.concatenate %955, %984 in 0 : vector<8x32xf32>, vector<8x32xf32> -> vector<16x32xf32>
    %cst_243 = arith.constant dense<0.000000e+00> : vector<16x768xf32>
    %986 = tpu.matmul %985, %622, %cst_243 {dimension_numbers = #tpu.dot_dimension_numbers<[1], [0], [0], [1], [0, 0, 1, 1], [], []>} : vector<16x32xf32>, vector<32x768xf32>, vector<16x768xf32> -> vector<16x768xf32>
    %c48_244 = arith.constant 48 : index
    %c0_245 = arith.constant 0 : index
    %987 = vector.load %arg24[%c48_244, %c0_245] : memref<64x768xf32, #tpu.memory_space<vmem>>, vector<8x384xf32>
    %988 = vector.extract_strided_slice %986 {offsets = [0, 0], sizes = [8, 384], strides = [1, 1]} : vector<16x768xf32> to vector<8x384xf32>
    %989 = vector.extract_strided_slice %987 {offsets = [0, 0], sizes = [8, 32], strides = [1, 1]} : vector<8x384xf32> to vector<8x32xf32>
    %990 = vector.extract_strided_slice %988 {offsets = [0, 0], sizes = [8, 32], strides = [1, 1]} : vector<8x384xf32> to vector<8x32xf32>
    %991 = arith.addf %989, %990 : vector<8x32xf32>
    %992 = arith.negf %991 : vector<8x32xf32>
    %993 = math.exp %992 : vector<8x32xf32>
    %cst_246 = arith.constant 1.000000e+00 : f32
    %994 = vector.broadcast %cst_246 : f32 to vector<8x32xf32>
    %995 = arith.addf %994, %993 : vector<8x32xf32>
    %996 = arith.divf %994, %995 : vector<8x32xf32>
    %997 = vector.extract_strided_slice %987 {offsets = [0, 128], sizes = [8, 32], strides = [1, 1]} : vector<8x384xf32> to vector<8x32xf32>
    %998 = vector.extract_strided_slice %988 {offsets = [0, 128], sizes = [8, 32], strides = [1, 1]} : vector<8x384xf32> to vector<8x32xf32>
    %999 = arith.addf %997, %998 : vector<8x32xf32>
    %1000 = arith.negf %999 : vector<8x32xf32>
    %1001 = math.exp %1000 : vector<8x32xf32>
    %cst_247 = arith.constant 1.000000e+00 : f32
    %1002 = vector.broadcast %cst_247 : f32 to vector<8x32xf32>
    %1003 = arith.addf %1002, %1001 : vector<8x32xf32>
    %1004 = arith.divf %1002, %1003 : vector<8x32xf32>
    %1005 = vector.extract_strided_slice %987 {offsets = [0, 256], sizes = [8, 32], strides = [1, 1]} : vector<8x384xf32> to vector<8x32xf32>
    %1006 = vector.extract_strided_slice %988 {offsets = [0, 256], sizes = [8, 32], strides = [1, 1]} : vector<8x384xf32> to vector<8x32xf32>
    %1007 = arith.addf %1006, %108 : vector<8x32xf32>
    %1008 = arith.mulf %996, %1007 : vector<8x32xf32>
    %1009 = arith.addf %1005, %1008 : vector<8x32xf32>
    %1010 = math.tanh %1009 : vector<8x32xf32>
    %cst_248 = arith.constant 1.000000e+00 : f32
    %1011 = vector.broadcast %cst_248 : f32 to vector<8x32xf32>
    %1012 = arith.subf %1011, %1004 : vector<8x32xf32>
    %1013 = arith.mulf %1012, %1010 : vector<8x32xf32>
    %1014 = arith.mulf %1004, %955 : vector<8x32xf32>
    %1015 = arith.addf %1013, %1014 : vector<8x32xf32>
    %c8_249 = arith.constant 8 : index
    %c384_250 = arith.constant 384 : index
    %1016 = vector.load %arg24[%c8_249, %c384_250] : memref<64x768xf32, #tpu.memory_space<vmem>>, vector<8x384xf32>
    %1017 = vector.extract_strided_slice %986 {offsets = [8, 384], sizes = [8, 384], strides = [1, 1]} : vector<16x768xf32> to vector<8x384xf32>
    %1018 = vector.extract_strided_slice %1016 {offsets = [0, 0], sizes = [8, 32], strides = [1, 1]} : vector<8x384xf32> to vector<8x32xf32>
    %1019 = vector.extract_strided_slice %1017 {offsets = [0, 0], sizes = [8, 32], strides = [1, 1]} : vector<8x384xf32> to vector<8x32xf32>
    %1020 = arith.addf %1018, %1019 : vector<8x32xf32>
    %1021 = arith.negf %1020 : vector<8x32xf32>
    %1022 = math.exp %1021 : vector<8x32xf32>
    %cst_251 = arith.constant 1.000000e+00 : f32
    %1023 = vector.broadcast %cst_251 : f32 to vector<8x32xf32>
    %1024 = arith.addf %1023, %1022 : vector<8x32xf32>
    %1025 = arith.divf %1023, %1024 : vector<8x32xf32>
    %1026 = vector.extract_strided_slice %1016 {offsets = [0, 128], sizes = [8, 32], strides = [1, 1]} : vector<8x384xf32> to vector<8x32xf32>
    %1027 = vector.extract_strided_slice %1017 {offsets = [0, 128], sizes = [8, 32], strides = [1, 1]} : vector<8x384xf32> to vector<8x32xf32>
    %1028 = arith.addf %1026, %1027 : vector<8x32xf32>
    %1029 = arith.negf %1028 : vector<8x32xf32>
    %1030 = math.exp %1029 : vector<8x32xf32>
    %cst_252 = arith.constant 1.000000e+00 : f32
    %1031 = vector.broadcast %cst_252 : f32 to vector<8x32xf32>
    %1032 = arith.addf %1031, %1030 : vector<8x32xf32>
    %1033 = arith.divf %1031, %1032 : vector<8x32xf32>
    %1034 = vector.extract_strided_slice %1016 {offsets = [0, 256], sizes = [8, 32], strides = [1, 1]} : vector<8x384xf32> to vector<8x32xf32>
    %1035 = vector.extract_strided_slice %1017 {offsets = [0, 256], sizes = [8, 32], strides = [1, 1]} : vector<8x384xf32> to vector<8x32xf32>
    %1036 = arith.addf %1035, %111 : vector<8x32xf32>
    %1037 = arith.mulf %1025, %1036 : vector<8x32xf32>
    %1038 = arith.addf %1034, %1037 : vector<8x32xf32>
    %1039 = math.tanh %1038 : vector<8x32xf32>
    %cst_253 = arith.constant 1.000000e+00 : f32
    %1040 = vector.broadcast %cst_253 : f32 to vector<8x32xf32>
    %1041 = arith.subf %1040, %1033 : vector<8x32xf32>
    %1042 = arith.mulf %1041, %1039 : vector<8x32xf32>
    %1043 = arith.mulf %1033, %984 : vector<8x32xf32>
    %1044 = arith.addf %1042, %1043 : vector<8x32xf32>
    %1045 = tpu.concatenate %1015, %1044 in 0 : vector<8x32xf32>, vector<8x32xf32> -> vector<16x32xf32>
    %cst_254 = arith.constant dense<0.000000e+00> : vector<16x768xf32>
    %1046 = tpu.matmul %1045, %622, %cst_254 {dimension_numbers = #tpu.dot_dimension_numbers<[1], [0], [0], [1], [0, 0, 1, 1], [], []>} : vector<16x32xf32>, vector<32x768xf32>, vector<16x768xf32> -> vector<16x768xf32>
    %c56_255 = arith.constant 56 : index
    %c0_256 = arith.constant 0 : index
    %1047 = vector.load %arg24[%c56_255, %c0_256] : memref<64x768xf32, #tpu.memory_space<vmem>>, vector<8x384xf32>
    %1048 = vector.extract_strided_slice %1046 {offsets = [0, 0], sizes = [8, 384], strides = [1, 1]} : vector<16x768xf32> to vector<8x384xf32>
    %1049 = vector.extract_strided_slice %1047 {offsets = [0, 0], sizes = [8, 32], strides = [1, 1]} : vector<8x384xf32> to vector<8x32xf32>
    %1050 = vector.extract_strided_slice %1048 {offsets = [0, 0], sizes = [8, 32], strides = [1, 1]} : vector<8x384xf32> to vector<8x32xf32>
    %1051 = arith.addf %1049, %1050 : vector<8x32xf32>
    %1052 = arith.negf %1051 : vector<8x32xf32>
    %1053 = math.exp %1052 : vector<8x32xf32>
    %cst_257 = arith.constant 1.000000e+00 : f32
    %1054 = vector.broadcast %cst_257 : f32 to vector<8x32xf32>
    %1055 = arith.addf %1054, %1053 : vector<8x32xf32>
    %1056 = arith.divf %1054, %1055 : vector<8x32xf32>
    %1057 = vector.extract_strided_slice %1047 {offsets = [0, 128], sizes = [8, 32], strides = [1, 1]} : vector<8x384xf32> to vector<8x32xf32>
    %1058 = vector.extract_strided_slice %1048 {offsets = [0, 128], sizes = [8, 32], strides = [1, 1]} : vector<8x384xf32> to vector<8x32xf32>
    %1059 = arith.addf %1057, %1058 : vector<8x32xf32>
    %1060 = arith.negf %1059 : vector<8x32xf32>
    %1061 = math.exp %1060 : vector<8x32xf32>
    %cst_258 = arith.constant 1.000000e+00 : f32
    %1062 = vector.broadcast %cst_258 : f32 to vector<8x32xf32>
    %1063 = arith.addf %1062, %1061 : vector<8x32xf32>
    %1064 = arith.divf %1062, %1063 : vector<8x32xf32>
    %1065 = vector.extract_strided_slice %1047 {offsets = [0, 256], sizes = [8, 32], strides = [1, 1]} : vector<8x384xf32> to vector<8x32xf32>
    %1066 = vector.extract_strided_slice %1048 {offsets = [0, 256], sizes = [8, 32], strides = [1, 1]} : vector<8x384xf32> to vector<8x32xf32>
    %1067 = arith.addf %1066, %108 : vector<8x32xf32>
    %1068 = arith.mulf %1056, %1067 : vector<8x32xf32>
    %1069 = arith.addf %1065, %1068 : vector<8x32xf32>
    %1070 = math.tanh %1069 : vector<8x32xf32>
    %cst_259 = arith.constant 1.000000e+00 : f32
    %1071 = vector.broadcast %cst_259 : f32 to vector<8x32xf32>
    %1072 = arith.subf %1071, %1064 : vector<8x32xf32>
    %1073 = arith.mulf %1072, %1070 : vector<8x32xf32>
    %1074 = arith.mulf %1064, %1015 : vector<8x32xf32>
    %1075 = arith.addf %1073, %1074 : vector<8x32xf32>
    %c0_260 = arith.constant 0 : index
    %c384_261 = arith.constant 384 : index
    %1076 = vector.load %arg24[%c0_260, %c384_261] : memref<64x768xf32, #tpu.memory_space<vmem>>, vector<8x384xf32>
    %1077 = vector.extract_strided_slice %1046 {offsets = [8, 384], sizes = [8, 384], strides = [1, 1]} : vector<16x768xf32> to vector<8x384xf32>
    %1078 = vector.extract_strided_slice %1076 {offsets = [0, 0], sizes = [8, 32], strides = [1, 1]} : vector<8x384xf32> to vector<8x32xf32>
    %1079 = vector.extract_strided_slice %1077 {offsets = [0, 0], sizes = [8, 32], strides = [1, 1]} : vector<8x384xf32> to vector<8x32xf32>
    %1080 = arith.addf %1078, %1079 : vector<8x32xf32>
    %1081 = arith.negf %1080 : vector<8x32xf32>
    %1082 = math.exp %1081 : vector<8x32xf32>
    %cst_262 = arith.constant 1.000000e+00 : f32
    %1083 = vector.broadcast %cst_262 : f32 to vector<8x32xf32>
    %1084 = arith.addf %1083, %1082 : vector<8x32xf32>
    %1085 = arith.divf %1083, %1084 : vector<8x32xf32>
    %1086 = vector.extract_strided_slice %1076 {offsets = [0, 128], sizes = [8, 32], strides = [1, 1]} : vector<8x384xf32> to vector<8x32xf32>
    %1087 = vector.extract_strided_slice %1077 {offsets = [0, 128], sizes = [8, 32], strides = [1, 1]} : vector<8x384xf32> to vector<8x32xf32>
    %1088 = arith.addf %1086, %1087 : vector<8x32xf32>
    %1089 = arith.negf %1088 : vector<8x32xf32>
    %1090 = math.exp %1089 : vector<8x32xf32>
    %cst_263 = arith.constant 1.000000e+00 : f32
    %1091 = vector.broadcast %cst_263 : f32 to vector<8x32xf32>
    %1092 = arith.addf %1091, %1090 : vector<8x32xf32>
    %1093 = arith.divf %1091, %1092 : vector<8x32xf32>
    %1094 = vector.extract_strided_slice %1076 {offsets = [0, 256], sizes = [8, 32], strides = [1, 1]} : vector<8x384xf32> to vector<8x32xf32>
    %1095 = vector.extract_strided_slice %1077 {offsets = [0, 256], sizes = [8, 32], strides = [1, 1]} : vector<8x384xf32> to vector<8x32xf32>
    %1096 = arith.addf %1095, %111 : vector<8x32xf32>
    %1097 = arith.mulf %1085, %1096 : vector<8x32xf32>
    %1098 = arith.addf %1094, %1097 : vector<8x32xf32>
    %1099 = math.tanh %1098 : vector<8x32xf32>
    %cst_264 = arith.constant 1.000000e+00 : f32
    %1100 = vector.broadcast %cst_264 : f32 to vector<8x32xf32>
    %1101 = arith.subf %1100, %1093 : vector<8x32xf32>
    %1102 = arith.mulf %1101, %1099 : vector<8x32xf32>
    %1103 = arith.mulf %1093, %1044 : vector<8x32xf32>
    %1104 = arith.addf %1102, %1103 : vector<8x32xf32>
    %c0_265 = arith.constant 0 : index
    %c0_266 = arith.constant 0 : index
    %1105 = vector.load %arg20[%c0_265, %c0_266] : memref<32x128xf32, #tpu.memory_space<vmem>>, vector<32x128xf32>
    %cst_267 = arith.constant dense<0.000000e+00> : vector<8x128xf32>
    %1106 = tpu.matmul %1075, %1105, %cst_267 {dimension_numbers = #tpu.dot_dimension_numbers<[1], [0], [0], [1], [0, 0, 1, 1], [], []>} : vector<8x32xf32>, vector<32x128xf32>, vector<8x128xf32> -> vector<8x128xf32>
    %c0_268 = arith.constant 0 : index
    %c0_269 = arith.constant 0 : index
    %1107 = vector.load %arg21[%c0_268, %c0_269] : memref<32x128xf32, #tpu.memory_space<vmem>>, vector<32x128xf32>
    %cst_270 = arith.constant dense<0.000000e+00> : vector<8x128xf32>
    %1108 = tpu.matmul %1104, %1107, %cst_270 {dimension_numbers = #tpu.dot_dimension_numbers<[1], [0], [0], [1], [0, 0, 1, 1], [], []>} : vector<8x32xf32>, vector<32x128xf32>, vector<8x128xf32> -> vector<8x128xf32>
    %1109 = arith.addf %1106, %1108 : vector<8x128xf32>
    %c0_271 = arith.constant 0 : index
    %c0_272 = arith.constant 0 : index
    %1110 = vector.load %arg22[%c0_271, %c0_272] : memref<1x128xf32, #tpu.memory_space<vmem>>, vector<1x128xf32>
    %1111 = vector.broadcast %1110 : vector<1x128xf32> to vector<8x128xf32>
    %1112 = arith.addf %1109, %1111 : vector<8x128xf32>
    %c0_273 = arith.constant 0 : index
    %c0_274 = arith.constant 0 : index
    %1113 = vector.load %arg23[%c0_273, %c0_274] : memref<8x128xf32, #tpu.memory_space<vmem>>, vector<8x128xf32>
    tpu.vector_store %arg23[%c0_273, %c0_274], %1112 {strides = array<i32>} : memref<8x128xf32, #tpu.memory_space<vmem>>, vector<8x128xf32>,
    return
  }
}

</mosaic_0001>

<bundles_post_ra>
// kernel: gru_classifier_forward_fused.1
= control target key start
LH: loop header
LB: loop body
LE: loop exit
PB: predicated region body
PF: predicated region fallthrough
CT: control target
= control target key end

     0   :  { %vm91_vm0 = vcmask 130048   ;;  %s9136_s28 = smov 112   ;;  %s9137_s29 = smov 32   ;;  %vm440_vm1 = vcmask 261120   ;;  %vm834_vm2 = vcmask 392192   ;;  %vm843_vm3 = vcmask 523264   ;;  %s11414_s2 = inlined_call_operand.vmem [shape: f32[16,96], index: 2, kind: input, shape index: {}]   ;;  %s11415_s0 = inlined_call_operand.vmem [shape: f32[64,16], index: 0, kind: input, shape index: {}]   ;;  %s11416_s3 = inlined_call_operand.vmem [shape: f32[1,96], index: 3, kind: input, shape index: {}]   ;;  %s11417_s4 = inlined_call_operand.vmem [shape: f32[32,96], index: 4, kind: input, shape index: {}]   ;;  %s11418_s5 = inlined_call_operand.vmem [shape: f32[1,96], index: 5, kind: input, shape index: {}]   ;;  %s11419_s6 = inlined_call_operand.vmem [shape: f32[80,32], index: 6, kind: input, shape index: {}]   ;;  %s11420_s9 = inlined_call_operand.vmem [shape: f32[16,768], index: 9, kind: input, shape index: {}]   ;;  %s11421_s1 = inlined_call_operand.vmem [shape: f32[64,16], index: 1, kind: input, shape index: {}]   ;;  %s11422_s8 = inlined_call_operand.vmem [shape: f32[32,768], index: 8, kind: input, shape index: {}]   ;;  %s11423_s11 = inlined_call_operand.vmem [shape: f32[32,768], index: 11, kind: input, shape index: {}]   ;;  %s11424_s7 = inlined_call_operand.vmem [shape: f32[1,32], index: 7, kind: input, shape index: {}]   ;;  %s11425_s10 = inlined_call_operand.vmem [shape: f32[1,768], index: 10, kind: input, shape index: {}]   ;;  %s11426_s13 = inlined_call_operand.vmem [shape: f32[1,32], index: 13, kind: input, shape index: {}]   ;;  %s11427_s12 = inlined_call_operand.vmem [shape: f32[1,32], index: 12, kind: input, shape index: {}]   ;;  %s11428_s15 = inlined_call_operand.vmem [shape: f32[32,768], index: 15, kind: input, shape index: {}]   ;;  %s11429_s14 = inlined_call_operand.vmem [shape: f32[32,768], index: 14, kind: input, shape index: {}]   ;;  %s11430_s17 = inlined_call_operand.vmem [shape: f32[32,768], index: 17, kind: input, shape index: {}]   ;;  %s11431_s16 = inlined_call_operand.vmem [shape: f32[1,768], index: 16, kind: input, shape index: {}]   ;;  %s11432_s19 = inlined_call_operand.vmem [shape: f32[1,32], index: 19, kind: input, shape index: {}]   ;;  %s11433_s18 = inlined_call_operand.vmem [shape: f32[1,32], index: 18, kind: input, shape index: {}]   ;;  %s11434_s20 = inlined_call_operand.vmem [shape: f32[32,128], index: 20, kind: input, shape index: {}]   ;;  %s11435_s21 = inlined_call_operand.vmem [shape: f32[32,128], index: 21, kind: input, shape index: {}]   ;;  %s11436_s22 = inlined_call_operand.vmem [shape: f32[1,128], index: 22, kind: input, shape index: {}]   ;;  %s11437_s23 = inlined_call_operand.vmem [shape: f32[8,128], index: 23, kind: output, shape index: {}]  }
   0x1   :  { %11454 = sst [smem:[#allocation8_spill]] %s11414_s2  ;;  %s9139_s27 = smov 96   ;;  %vm869_vm4 = vcmask 654336   ;;  %vm9144_vm5 = vmmov 0  }
   0x2   :  { %11455 = sst [smem:[#allocation9_spill]] %s11415_s0  ;;  %s11462_s24 = sld [smem:[#allocation8_spill]] }
   0x3   :  { %11456 = sst [smem:[#allocation10_spill]] %s11416_s3  ;;  %s11463_s3 = sld [smem:[#allocation9_spill]] }
   0x4   :  { %11457 = sst [smem:[#allocation11_spill]] %s11417_s4 }
   0x5   :  { %11458 = sst [smem:[#allocation12_spill]] %s11418_s5  ;;  %s11465_s5 = sld [smem:[#allocation11_spill]] }
   0x6   :  { %11459 = sst [smem:[#allocation13_spill]] %s11419_s6  ;;  %s11466_s2 = sld [smem:[#allocation12_spill]] }
   0x7   :  { %11460 = sst [smem:[#allocation14_spill]] %s11420_s9  ;;  %s9138_s9 = smov 64  }
   0x8   :  { %11461 = sst [smem:[#allocation15_spill]] %s11421_s1  ;;  %v82_v0 = vld [vmem:[%s11462_s24] sm:$0xff]  ;;  %v83_v1 = vld [vmem:[%s11462_s24 + $0x8] sm:$0xff]  ;;  %s11464_s1 = sld [smem:[#allocation10_spill]] }
   0x9   :  { %v74_v2 = vld [vmem:[%s11463_s3] sm:$0xff]  ;;  %v7995_v3 = vpack.c.bf16 %v83_v1, %v82_v0  ;;  %v75_v4 = vld [vmem:[%s11463_s3 + $0x8] sm:$0xff]  ;;  %v76_v5 = vld [vmem:[%s11463_s3 + $0x10] sm:$0xff]  ;;  %s11467_s24 = sld [smem:[#allocation13_spill]]  ;;  %s11469_s26 = sld [smem:[#allocation15_spill]] }
   0xa   :  { %7909 = vmatprep.mubr.msk.f32.mxu0 %vm91_vm0, %v74_v2  ;;  %v77_v6 = vld [vmem:[%s11463_s3 + $0x18] sm:$0xff]  ;;  %v78_v7 = vld [vmem:[%s11463_s3 + $0x20] sm:$0xff]  ;;  %v79_v8 = vld [vmem:[%s11463_s3 + $0x28] sm:$0xff] }
   0xb   :  { %7996 = vmatprep.subr.bf16.mxu0 %v7995_v3  ;;  %v80_v9 = vld [vmem:[%s11463_s3 + $0x30] sm:$0xff]  ;;  %v81_v10 = vld [vmem:[%s11463_s3 + $0x38] sm:$0xff] }
   0xc   :  { %7998 = vmatpush3.bf16.msra.mxu0 %v7995_v3 }
   0xe   :  { %v7561_v11 = vld [vmem:[%s11464_s1] ss:$0 sm:$0xff] }
   0xf   :  { %7910 = vmatmul.mubr.msk.f32.vlgmr.msra.gmra.mrb[0].mxu0 %vm91_vm0, %v75_v4 }
  0x10   :  { %7912 = vmatprep.mubr.msk.f32.mxu0 %vm91_vm0, %v76_v5 }
  0x13   :  { %7913 = vmatmul.mubr.msk.f32.gmra.mrb[2].mxu0 %vm91_vm0, %v77_v6 }
  0x14   :  { %7915 = vmatprep.mubr.msk.f32.mxu0 %vm91_vm0, %v78_v7 }
  0x17   :  { %7916 = vmatmul.mubr.msk.f32.gmra.mrb[4].mxu0 %vm91_vm0, %v79_v8 }
  0x18   :  { %7918 = vmatprep.mubr.msk.f32.mxu0 %vm91_vm0, %v80_v9 }
  0x1b   :  { %7919 = vmatmul.mubr.msk.f32.gmra.mrb[6].mxu0 %vm91_vm0, %v81_v10 }
  0xe2   :  { %v7911_v12 = vpop.f32.mrb[0].mxu0 }
  0xe3   :  { %v182_v13 = vpop.f32.mrb[1].mxu0  ;;  %v188_v15 = vadd.f32 %v7911_v12, %v7561_v11 }
  0xe4   :  { %v183_v14 = vadd.f32 %v7561_v11, %v182_v13 }
  0xe5   :  { %v7571_v37 = vmul.f32 -1.442695, %v188_v15 }
  0xe6   :  { %8676 = vtanh.f32 %v183_v14  ;;  %v7914_v16 = vpop.f32.mrb[2].mxu0  ;;  %v7570_v36 = vmul.f32 -1.442695, %v183_v14 }
  0xe7   :  { %v192_v17 = vpop.f32.mrb[3].mxu0  ;;  %v198_v18 = vadd.f32 %v7914_v16, %v7561_v11  ;;  %8678 = vtanh.f32 %v188_v15 }
  0xe8   :  { %v193_v19 = vadd.f32 %v7561_v11, %v192_v17 }
  0xe9   :  { %v7573_v39 = vmul.f32 -1.442695, %v198_v18 }
  0xea   :  { %8680 = vtanh.f32 %v193_v19  ;;  %v7917_v20 = vpop.f32.mrb[4].mxu0  ;;  %v7572_v38 = vmul.f32 -1.442695, %v193_v19 }
  0xeb   :  { %v202_v21 = vpop.f32.mrb[5].mxu0  ;;  %8682 = vtanh.f32 %v198_v18  ;;  %v208_v22 = vadd.f32 %v7917_v20, %v7561_v11 }
  0xec   :  { %v203_v23 = vadd.f32 %v7561_v11, %v202_v21 }
  0xed   :  { %v7575_v41 = vmul.f32 -1.442695, %v208_v22 }
  0xee   :  { %8684 = vtanh.f32 %v203_v23  ;;  %v7920_v24 = vpop.f32.mrb[6].mxu0  ;;  %v7574_v40 = vmul.f32 -1.442695, %v203_v23 }
  0xef   :  { %v212_v25 = vpop.f32.mrb[7].mxu0  ;;  %8686 = vtanh.f32 %v208_v22  ;;  %v218_v27 = vadd.f32 %v7920_v24, %v7561_v11 }
  0xf0   :  { %v8677_v26 = vpop.eup %8676  ;;  %v213_v28 = vadd.f32 %v7561_v11, %v212_v25 }
  0xf1   :  { %285 = vrot.lane.b32.xlu0 %v8677_v26, %s9136_s28  ;;  %v8679_v29 = vpop.eup %8678  ;;  %v7577_v44 = vmul.f32 -1.442695, %v218_v27 }
  0xf2   :  { %8688 = vtanh.f32 %v213_v28  ;;  %v7576_v42 = vmul.f32 -1.442695, %v213_v28  ;;  %v429_v28 = vld [vmem:[%s11465_s5] sm:$0xff] }
  0xf3   :  { %8690 = vtanh.f32 %v218_v27 }
  0xf4   :  { %v8681_v30 = vpop.eup %8680  ;;  %8692 = vpow2.f32 %v7570_v36 }
  0xf5   :  { %289 = vrot.lane.b32.xlu1 %v8681_v30, %s9136_s28  ;;  %287 = vrot.lane.b32.xlu0 %v8679_v29, %s9136_s28  ;;  %v8683_v31 = vpop.eup %8682  ;;  %8694 = vpow2.f32 %v7571_v37  ;;  %v430_v29 = vld [vmem:[%s11465_s5 + $0x8] sm:$0xff] }
  0xf6   :  { %8696 = vpow2.f32 %v7572_v38  ;;  %v7999_v30 = vpack.c.bf16 %v430_v29, %v429_v28 }
  0xf7   :  { %8698 = vpow2.f32 %v7573_v39 }
  0xf8   :  { %v8685_v32 = vpop.eup %8684  ;;  %8700 = vpow2.f32 %v7574_v40  ;;  %8000 = vmatprep.subr.bf16.mxu1 %v7999_v30 }
  0xf9   :  { %291 = vrot.lane.b32.xlu1 %v8683_v31, %s9136_s28  ;;  %293 = vrot.lane.b32.xlu0 %v8685_v32, %s9136_s28  ;;  %v8687_v33 = vpop.eup %8686  ;;  %8702 = vpow2.f32 %v7575_v41  ;;  %v431_v31 = vld [vmem:[%s11465_s5 + $0x10] sm:$0xff]  ;;  %v432_v32 = vld [vmem:[%s11465_s5 + $0x18] sm:$0xff]  ;;  %s9140_s5 = smov 80  }
  0xfa   :  { %8704 = vpow2.f32 %v7576_v42  ;;  %8002 = vmatpush3.bf16.msra.mxu1 %v7999_v30 }
  0xfb   :  { %8706 = vpow2.f32 %v7577_v44 }
  0xfc   :  { %v8689_v34 = vpop.eup %8688 }
  0xfd   :  { %295 = vrot.lane.b32.xlu1 %v8687_v33, %s9136_s28  ;;  %297 = vrot.lane.b32.xlu0 %v8689_v34, %s9136_s28  ;;  %v8691_v35 = vpop.eup %8690  ;;  %v8003_v33 = vpack.c.bf16 %v432_v32, %v431_v31 }
  0xfe   :  { %v8693_v43 = vpop.eup %8692 }
  0xff   :  { %v8695_v45 = vpop.eup %8694  ;;  %v245_v46 = vadd.f32 1.0, %v8693_v43  ;;  %8004 = vmatprep.subr.bf16.mxu1 %v8003_v33 }
 0x100   :  { %v8697_v47 = vpop.eup %8696  ;;  %v246_v48 = vadd.f32 1.0, %v8695_v45  ;;  %8006 = vmatpush3.bf16.msra.mxu1 %v8003_v33 }
 0x101   :  { %299 = vrot.lane.b32.xlu1 %v8691_v35, %s9136_s28  ;;  %v8699_v49 = vpop.eup %8698  ;;  %8708 = vrcp.f32 %v245_v46  ;;  %v247_v50 = vadd.f32 1.0, %v8697_v47 }
 0x102   :  { %v8701_v51 = vpop.eup %8700  ;;  %8710 = vrcp.f32 %v246_v48  ;;  %v248_v52 = vadd.f32 1.0, %v8699_v49 }
 0x103   :  { %v8703_v53 = vpop.eup %8702  ;;  %8712 = vrcp.f32 %v247_v50  ;;  %v249_v54 = vadd.f32 1.0, %v8701_v51 }
 0x104   :  { %v8705_v55 = vpop.eup %8704  ;;  %8714 = vrcp.f32 %v248_v52  ;;  %v250_v56 = vadd.f32 1.0, %v8703_v53 }
 0x105   :  { %8716 = vrcp.f32 %v249_v54  ;;  %v251_v57 = vadd.f32 1.0, %v8705_v55  ;;  %v8707_v58 = vpop.eup %8706 }
 0x106   :  { %8718 = vrcp.f32 %v250_v56  ;;  %v252_v62 = vadd.f32 1.0, %v8707_v58 }
 0x107   :  { %8720 = vrcp.f32 %v251_v57 }
 0x10b   :  { %v9314_v59 = vpop.eup %8708 }
 0x10c   :  { %v9317_v63 = vpop.eup %8710 }
 0x10d   :  { %v9319_v0 = vpop.eup %8712 }
 0x10e   :  { %v9323_v5 = vpop.eup %8714 }
 0x10f   :  { %v9325_v6 = vpop.eup %8716 }
 0x110   :  { %v9329_v11 = vpop.eup %8718 }
 0x111   :  { %v9331_v12 = vpop.eup %8720 }
 0x163   :  { %v286_v60 = vpop.permute.xlu0 %285 }
 0x164   :  { %v309_v61 = vmul.f32 %v9314_v59, %v286_v60 }
 0x166   :  { %8722 = vtanh.f32 %v309_v61 }
 0x167   :  { %v290_v1 = vpop.permute.xlu1 %289  ;;  %v288_v2 = vpop.permute.xlu0 %287  ;;  %8724 = vrcp.f32 %v252_v62 }
 0x168   :  { %v311_v3 = vmul.f32 %v9319_v0, %v290_v1  ;;  %v310_v4 = vmul.f32 %v9317_v63, %v288_v2 }
 0x16a   :  { %8726 = vtanh.f32 %v311_v3 }
 0x16b   :  { %8728 = vtanh.f32 %v310_v4  ;;  %v292_v7 = vpop.permute.xlu1 %291  ;;  %v294_v8 = vpop.permute.xlu0 %293 }
 0x16c   :  { %v312_v9 = vmul.f32 %v9323_v5, %v292_v7  ;;  %v313_v10 = vmul.f32 %v9325_v6, %v294_v8 }
 0x16e   :  { %8730 = vtanh.f32 %v312_v9 }
 0x16f   :  { %8732 = vtanh.f32 %v313_v10  ;;  %v296_v13 = vpop.permute.xlu1 %295  ;;  %v298_v14 = vpop.permute.xlu0 %297  ;;  %v7578_v10 = vld [vmem:[%s11466_s2] ss:$0 sm:$0xff]  ;;  %s11468_s2 = sld [smem:[#allocation14_spill]] }
 0x170   :  { %v8723_v15 = vpop.eup %8722  ;;  %v314_v16 = vmul.f32 %v9329_v11, %v296_v13  ;;  %v315_v17 = vmul.f32 %v9331_v12, %v298_v14 }
 0x171   :  { %333 = vrot.lane.b32.xlu0 %v8723_v15, %s9137_s29  ;;  %v8725_v18 = vpop.eup %8724 }
 0x172   :  { %8734 = vtanh.f32 %v314_v16 }
 0x173   :  { %8736 = vtanh.f32 %v315_v17  ;;  %v300_v19 = vpop.permute.xlu1 %299 }
 0x174   :  { %v8727_v20 = vpop.eup %8726  ;;  %v316_v21 = vmul.f32 %v8725_v18, %v300_v19 }
 0x175   :  { %v8729_v22 = vpop.eup %8728  ;;  %337 = vrot.lane.b32.xlu0 %v8727_v20, %s9137_s29 }
 0x176   :  { %8738 = vtanh.f32 %v316_v21  ;;  %335 = vrot.lane.b32.xlu1 %v8729_v22, %s9137_s29 }
 0x178   :  { %v8731_v23 = vpop.eup %8730 }
 0x179   :  { %v8733_v24 = vpop.eup %8732 }
 0x17a   :  { %339 = vrot.lane.b32.xlu1 %v8731_v23, %s9137_s29  ;;  %341 = vrot.lane.b32.xlu0 %v8733_v24, %s9137_s29 }
 0x17c   :  { %v8735_v25 = vpop.eup %8734 }
 0x17d   :  { %v8737_v26 = vpop.eup %8736 }
 0x17e   :  { %343 = vrot.lane.b32.xlu1 %v8735_v25, %s9137_s29  ;;  %345 = vrot.lane.b32.xlu0 %v8737_v26, %s9137_s29 }
 0x180   :  { %v8739_v27 = vpop.eup %8738 }
 0x182   :  { %347 = vrot.lane.b32.xlu1 %v8739_v27, %s9137_s29 }
 0x1e3   :  { %v334_v34 = vpop.permute.xlu0 %333 }
 0x1e4   :  { %v9356_v35 = vmul.f32 %v9314_v59, %v334_v34 }
 0x1e6   :  { %397 = vrot.lane.b32.xlu1 %v9356_v35, %s9138_s9  ;;  %373 = vrot.lane.b32.xlu0 %v9356_v35, %s9139_s27 }
 0x1e7   :  { %v338_v38 = vpop.permute.xlu0 %337 }
 0x1e8   :  { %v336_v36 = vpop.permute.xlu1 %335  ;;  %v9366_v39 = vmul.f32 %v9319_v0, %v338_v38 }
 0x1e9   :  { %v9361_v37 = vmul.f32 %v9317_v63, %v336_v36 }
 0x1eb   :  { %399 = vrot.lane.b32.xlu1 %v9361_v37, %s9138_s9  ;;  %375 = vrot.lane.b32.xlu0 %v9361_v37, %s9139_s27 }
 0x1ec   :  { %v340_v40 = vpop.permute.xlu1 %339  ;;  %v342_v42 = vpop.permute.xlu0 %341 }
 0x1ed   :  { %v9371_v41 = vmul.f32 %v9323_v5, %v340_v40  ;;  %v9376_v43 = vmul.f32 %v9325_v6, %v342_v42 }
 0x1ef   :  { %401 = vrot.lane.b32.xlu1 %v9366_v39, %s9138_s9  ;;  %377 = vrot.lane.b32.xlu0 %v9366_v39, %s9139_s27 }
 0x1f0   :  { %v344_v44 = vpop.permute.xlu1 %343  ;;  %v346_v46 = vpop.permute.xlu0 %345 }
 0x1f1   :  { %v9381_v45 = vmul.f32 %v9329_v11, %v344_v44  ;;  %v9386_v47 = vmul.f32 %v9331_v12, %v346_v46 }
 0x1f3   :  { %403 = vrot.lane.b32.xlu1 %v9371_v41, %s9138_s9  ;;  %379 = vrot.lane.b32.xlu0 %v9371_v41, %s9139_s27 }
 0x1f4   :  { %v348_v48 = vpop.permute.xlu1 %347 }
 0x1f5   :  { %v9390_v49 = vmul.f32 %v8725_v18, %v348_v48 }
 0x1f7   :  { %405 = vrot.lane.b32.xlu1 %v9376_v43, %s9138_s9  ;;  %381 = vrot.lane.b32.xlu0 %v9376_v43, %s9139_s27 }
 0x1fb   :  { %407 = vrot.lane.b32.xlu1 %v9381_v45, %s9138_s9  ;;  %383 = vrot.lane.b32.xlu0 %v9381_v45, %s9139_s27 }
 0x1ff   :  { %409 = vrot.lane.b32.xlu1 %v9386_v47, %s9138_s9  ;;  %385 = vrot.lane.b32.xlu0 %v9386_v47, %s9139_s27 }
 0x203   :  { %411 = vrot.lane.b32.xlu1 %v9390_v49, %s9138_s9  ;;  %387 = vrot.lane.b32.xlu0 %v9390_v49, %s9139_s27 }
 0x258   :  { %v398_v50 = vpop.permute.xlu1 %397  ;;  %v374_v51 = vpop.permute.xlu0 %373 }
 0x259   :  { %v421_v52 = vsel %vm91_vm0, %v374_v51, %v398_v50 }
 0x25a   :  { %7929 = vmatprep.mubr.msk.f32.mxu1 %vm440_vm1, %v421_v52 }
 0x25d   :  { %v400_v53 = vpop.permute.xlu1 %399  ;;  %v376_v54 = vpop.permute.xlu0 %375 }
 0x25e   :  { %v422_v55 = vsel %vm91_vm0, %v376_v54, %v400_v53 }
 0x25f   :  { %7930 = vmatmul.mubr.msk.f32.vlgmr.msra.gmra.mrb[0].mxu1 %vm440_vm1, %v422_v55 }
 0x261   :  { %v402_v56 = vpop.permute.xlu1 %401  ;;  %v378_v57 = vpop.permute.xlu0 %377 }
 0x262   :  { %v423_v58 = vsel %vm91_vm0, %v378_v57, %v402_v56 }
 0x263   :  { %7932 = vmatprep.mubr.msk.f32.mxu1 %vm440_vm1, %v423_v58 }
 0x265   :  { %v404_v59 = vpop.permute.xlu1 %403  ;;  %v380_v60 = vpop.permute.xlu0 %379 }
 0x266   :  { %v424_v61 = vsel %vm91_vm0, %v380_v60, %v404_v59 }
 0x267   :  { %7933 = vmatmul.mubr.msk.f32.gmra.mrb[2].mxu1 %vm440_vm1, %v424_v61 }
 0x269   :  { %v406_v62 = vpop.permute.xlu1 %405  ;;  %v382_v63 = vpop.permute.xlu0 %381 }
 0x26a   :  { %v425_v0 = vsel %vm91_vm0, %v382_v63, %v406_v62 }
 0x26b   :  { %7935 = vmatprep.mubr.msk.f32.mxu1 %vm440_vm1, %v425_v0 }
 0x26d   :  { %v408_v1 = vpop.permute.xlu1 %407  ;;  %v384_v2 = vpop.permute.xlu0 %383 }
 0x26e   :  { %v426_v3 = vsel %vm91_vm0, %v384_v2, %v408_v1 }
 0x26f   :  { %7936 = vmatmul.mubr.msk.f32.gmra.mrb[4].mxu1 %vm440_vm1, %v426_v3 }
 0x271   :  { %v410_v4 = vpop.permute.xlu1 %409  ;;  %v386_v5 = vpop.permute.xlu0 %385 }
 0x272   :  { %v427_v6 = vsel %vm91_vm0, %v386_v5, %v410_v4 }
 0x273   :  { %7938 = vmatprep.mubr.msk.f32.mxu1 %vm440_vm1, %v427_v6 }
 0x275   :  { %v412_v7 = vpop.permute.xlu1 %411  ;;  %v388_v8 = vpop.permute.xlu0 %387 }
 0x276   :  { %v428_v9 = vsel %vm91_vm0, %v388_v8, %v412_v7 }
 0x277   :  { %7939 = vmatmul.mubr.msk.f32.gmra.mrb[6].mxu1 %vm440_vm1, %v428_v9 }
 0x332   :  { %v7931_v11 = vpop.f32.mrb[0].mxu1 }
 0x333   :  { %v537_v12 = vadd.f32 %v7931_v11, %v7578_v10  ;;  %v531_v13 = vpop.f32.mrb[1].mxu1 }
 0x334   :  { %v532_v14 = vadd.f32 %v7578_v10, %v531_v13 }
 0x335   :  { %8740 = vtanh.f32 %v537_v12  ;;  %v7588_v36 = vmul.f32 -1.442695, %v537_v12 }
 0x336   :  { %8742 = vtanh.f32 %v532_v14  ;;  %v7587_v38 = vmul.f32 -1.442695, %v532_v14 }
 0x33a   :  { %v7934_v15 = vpop.f32.mrb[2].mxu1 }
 0x33b   :  { %v547_v16 = vadd.f32 %v7934_v15, %v7578_v10  ;;  %v541_v17 = vpop.f32.mrb[3].mxu1 }
 0x33c   :  { %v542_v18 = vadd.f32 %v7578_v10, %v541_v17 }
 0x33d   :  { %8744 = vtanh.f32 %v547_v16  ;;  %v7590_v40 = vmul.f32 -1.442695, %v547_v16 }
 0x33e   :  { %8746 = vtanh.f32 %v542_v18  ;;  %v7589_v42 = vmul.f32 -1.442695, %v542_v18 }
 0x33f   :  { %v8741_v19 = vpop.eup %8740 }
 0x340   :  { %v8743_v20 = vpop.eup %8742  ;;  %636 = vrot.lane.b32.xlu1 %v8741_v19, %s9136_s28 }
 0x341   :  { %634 = vrot.lane.b32.xlu0 %v8743_v20, %s9136_s28 }
 0x342   :  { %v7937_v21 = vpop.f32.mrb[4].mxu1 }
 0x343   :  { %v557_v22 = vadd.f32 %v7937_v21, %v7578_v10  ;;  %v551_v23 = vpop.f32.mrb[5].mxu1 }
 0x344   :  { %v552_v24 = vadd.f32 %v7578_v10, %v551_v23 }
 0x345   :  { %8748 = vtanh.f32 %v557_v22  ;;  %v7592_v50 = vmul.f32 -1.442695, %v557_v22 }
 0x346   :  { %8750 = vtanh.f32 %v552_v24  ;;  %v7591_v52 = vmul.f32 -1.442695, %v552_v24 }
 0x347   :  { %v8745_v25 = vpop.eup %8744 }
 0x348   :  { %v8747_v26 = vpop.eup %8746  ;;  %640 = vrot.lane.b32.xlu1 %v8745_v25, %s9136_s28 }
 0x349   :  { %638 = vrot.lane.b32.xlu0 %v8747_v26, %s9136_s28 }
 0x34a   :  { %v7940_v27 = vpop.f32.mrb[6].mxu1 }
 0x34b   :  { %v567_v28 = vadd.f32 %v7940_v27, %v7578_v10  ;;  %v561_v29 = vpop.f32.mrb[7].mxu1 }
 0x34c   :  { %v562_v30 = vadd.f32 %v7578_v10, %v561_v29 }
 0x34d   :  { %8752 = vtanh.f32 %v567_v28  ;;  %v7594_v56 = vmul.f32 -1.442695, %v567_v28 }
 0x34e   :  { %8754 = vtanh.f32 %v562_v30  ;;  %v7593_v58 = vmul.f32 -1.442695, %v562_v30 }
 0x34f   :  { %v8749_v31 = vpop.eup %8748  ;;  %8756 = vpow2.f32 %v7588_v36  ;;  %v855_v36 = vld [vmem:[%s11467_s24 + $0x18] sm:$0xff] }
 0x350   :  { %644 = vrot.lane.b32.xlu1 %v8749_v31, %s9136_s28  ;;  %v8751_v32 = vpop.eup %8750  ;;  %8758 = vpow2.f32 %v7587_v38 }
 0x351   :  { %642 = vrot.lane.b32.xlu0 %v8751_v32, %s9136_s28  ;;  %8760 = vpow2.f32 %v7590_v40  ;;  %v856_v40 = vld [vmem:[%s11467_s24 + $0x20] sm:$0xff] }
 0x352   :  { %8762 = vpow2.f32 %v7589_v42  ;;  %v857_v42 = vld [vmem:[%s11467_s24 + $0x28] sm:$0xff] }
 0x357   :  { %v8753_v33 = vpop.eup %8752 }
 0x358   :  { %648 = vrot.lane.b32.xlu1 %v8753_v33, %s9136_s28  ;;  %v8755_v34 = vpop.eup %8754 }
 0x359   :  { %646 = vrot.lane.b32.xlu0 %v8755_v34, %s9136_s28  ;;  %v8757_v44 = vpop.eup %8756 }
 0x35a   :  { %v8759_v46 = vpop.eup %8758  ;;  %v595_v48 = vadd.f32 1.0, %v8757_v44  ;;  %v858_v44 = vld [vmem:[%s11467_s24 + $0x30] sm:$0xff] }
 0x35b   :  { %v594_v51 = vadd.f32 1.0, %v8759_v46  ;;  %v8761_v53 = vpop.eup %8760  ;;  %v859_v46 = vld [vmem:[%s11467_s24 + $0x38] sm:$0xff] }
 0x35c   :  { %8764 = vrcp.f32 %v595_v48  ;;  %v8763_v54 = vpop.eup %8762  ;;  %v597_v55 = vadd.f32 1.0, %v8761_v53  ;;  %v860_v48 = vld [vmem:[%s11467_s24 + $0x40] sm:$0xff] }
 0x35d   :  { %8766 = vpow2.f32 %v7592_v50  ;;  %v596_v57 = vadd.f32 1.0, %v8763_v54  ;;  %v861_v50 = vld [vmem:[%s11467_s24 + $0x48] sm:$0xff] }
 0x35e   :  { %8768 = vrcp.f32 %v594_v51  ;;  %v8023_v51 = vpack.c.bf16 %v861_v50, %v860_v48 }
 0x35f   :  { %8770 = vpow2.f32 %v7591_v52 }
 0x360   :  { %8772 = vrcp.f32 %v597_v55 }
 0x361   :  { %8774 = vpow2.f32 %v7594_v56 }
 0x362   :  { %8776 = vrcp.f32 %v596_v57 }
 0x363   :  { %8778 = vpow2.f32 %v7593_v58 }
 0x366   :  { %v9421_v59 = vpop.eup %8764 }
 0x367   :  { %v8767_v60 = vpop.eup %8766 }
 0x368   :  { %v9423_v62 = vpop.eup %8768  ;;  %v599_v3 = vadd.f32 1.0, %v8767_v60 }
 0x369   :  { %v8771_v2 = vpop.eup %8770 }
 0x36a   :  { %v598_v4 = vadd.f32 1.0, %v8771_v2  ;;  %v9427_v5 = vpop.eup %8772  ;;  %v11448_v2 = vmov 0.0  }
 0x36b   :  { %v8775_v6 = vpop.eup %8774  ;;  %1131 = vmatprep.mubr.f32.mxu1 %v11448_v2 }
 0x36c   :  { %v9429_v8 = vpop.eup %8776  ;;  %v601_v13 = vadd.f32 1.0, %v8775_v6  ;;  %v1036_v6 = vld [vmem:[%s11468_s2 + $0x28] sm:$0xff] }
 0x36d   :  { %v8779_v12 = vpop.eup %8778 }
 0x36e   :  { %v600_v16 = vadd.f32 1.0, %v8779_v12 }
 0x3b2   :  { %v637_v61 = vpop.permute.xlu1 %636 }
 0x3b3   :  { %v659_v63 = vmul.f32 %v9421_v59, %v637_v61  ;;  %v635_v0 = vpop.permute.xlu0 %634 }
 0x3b4   :  { %v658_v1 = vmul.f32 %v9423_v62, %v635_v0  ;;  %v1038_v0 = vld [vmem:[%s11468_s2 + $0x38] sm:$0xff] }
 0x3b5   :  { %8780 = vtanh.f32 %v659_v63  ;;  %v1032_v63 = vld [vmem:[%s11468_s2 + $0x8] sm:$0xff] }
 0x3b6   :  { %8782 = vtanh.f32 %v658_v1  ;;  %v1031_v1 = vld [vmem:[%s11468_s2] sm:$0xff] }
 0x3b7   :  { %8784 = vrcp.f32 %v599_v3 }
 0x3b8   :  { %8786 = vrcp.f32 %v598_v4  ;;  %v8027_v4 = vpack.c.bf16 %v1038_v0, %v1032_v63 }
 0x3ba   :  { %v641_v7 = vpop.permute.xlu1 %640  ;;  %8028 = vmatprep.subr.bf16.mxu1 %v8027_v4 }
 0x3bb   :  { %v661_v9 = vmul.f32 %v9427_v5, %v641_v7  ;;  %v639_v10 = vpop.permute.xlu0 %638  ;;  %v1042_v7 = vld [vmem:[%s11468_s2 + $0x58] sm:$0xff] }
 0x3bc   :  { %v660_v11 = vmul.f32 %v9429_v8, %v639_v10  ;;  %v1035_v10 = vld [vmem:[%s11468_s2 + $0x20] sm:$0xff] }
 0x3bd   :  { %8788 = vtanh.f32 %v661_v9  ;;  %v8035_v9 = vpack.c.bf16 %v1042_v7, %v1036_v6 }
 0x3be   :  { %8790 = vtanh.f32 %v660_v11  ;;  %v1041_v11 = vld [vmem:[%s11468_s2 + $0x50] sm:$0xff] }
 0x3bf   :  { %v8781_v14 = vpop.eup %8780  ;;  %8792 = vrcp.f32 %v601_v13 }
 0x3c0   :  { %v8783_v15 = vpop.eup %8782  ;;  %684 = vrot.lane.b32.xlu1 %v8781_v14, %s9137_s29  ;;  %8794 = vrcp.f32 %v600_v16  ;;  %v9564_v14 = vld [vmem:[%s11469_s26] sm:$0xff]  ;;  %v1034_v16 = vld [vmem:[%s11468_s2 + $0x18] sm:$0xff] }
 0x3c1   :  { %682 = vrot.lane.b32.xlu0 %v8783_v15, %s9137_s29  ;;  %v9435_v17 = vpop.eup %8784  ;;  %v8037_v15 = vpack.c.bf16 %v1041_v11, %v1035_v10 }
 0x3c2   :  { %v645_v18 = vpop.permute.xlu1 %644  ;;  %v9438_v20 = vpop.eup %8786 }
 0x3c3   :  { %v663_v19 = vmul.f32 %v9435_v17, %v645_v18  ;;  %v643_v21 = vpop.permute.xlu0 %642 }
 0x3c4   :  { %v662_v23 = vmul.f32 %v9438_v20, %v643_v21  ;;  %v9586_v21 = vld [vmem:[%s11469_s26 + $0x8] sm:$0xff] }
 0x3c5   :  { %8796 = vtanh.f32 %v663_v19  ;;  %v1000_v19 = vld [vmem:[%s11422_s8 + $0x8] sm:$0xff] }
 0x3c6   :  { %8798 = vtanh.f32 %v662_v23  ;;  %v9595_v23 = vld [vmem:[%s11469_s26 + $0x10] sm:$0xff] }
 0x3c7   :  { %v8789_v22 = vpop.eup %8788 }
 0x3c8   :  { %v8791_v24 = vpop.eup %8790  ;;  %688 = vrot.lane.b32.xlu1 %v8789_v22, %s9137_s29 }
 0x3c9   :  { %686 = vrot.lane.b32.xlu0 %v8791_v24, %s9137_s29  ;;  %v9443_v25 = vpop.eup %8792  ;;  %v9603_v24 = vld [vmem:[%s11469_s26 + $0x18] sm:$0xff] }
 0x3ca   :  { %v649_v26 = vpop.permute.xlu1 %648  ;;  %v9446_v28 = vpop.eup %8794 }
 0x3cb   :  { %v665_v27 = vmul.f32 %v9443_v25, %v649_v26  ;;  %v647_v29 = vpop.permute.xlu0 %646  ;;  %v9619_v26 = vld [vmem:[%s11469_s26 + $0x28] sm:$0xff] }
 0x3cc   :  { %v664_v30 = vmul.f32 %v9446_v28, %v647_v29  ;;  %v999_v29 = vld [vmem:[%s11422_s8] sm:$0xff] }
 0x3cd   :  { %8800 = vtanh.f32 %v665_v27  ;;  %v9627_v27 = vld [vmem:[%s11469_s26 + $0x30] sm:$0xff] }
 0x3ce   :  { %8802 = vtanh.f32 %v664_v30  ;;  %v1005_v30 = vld [vmem:[%s11422_s8 + $0x30] sm:$0xff] }
 0x3cf   :  { %v8797_v31 = vpop.eup %8796 }
 0x3d0   :  { %692 = vrot.lane.b32.xlu1 %v8797_v31, %s9137_s29  ;;  %v8799_v32 = vpop.eup %8798  ;;  %v1012_v31 = vld [vmem:[%s11422_s8 + $0x68] sm:$0xff] }
 0x3d1   :  { %690 = vrot.lane.b32.xlu0 %v8799_v32, %s9137_s29  ;;  %v1018_v32 = vld [vmem:[%s11422_s8 + $0x98] sm:$0xff] }
 0x3d7   :  { %v8801_v33 = vpop.eup %8800 }
 0x3d8   :  { %696 = vrot.lane.b32.xlu1 %v8801_v33, %s9137_s29  ;;  %v8803_v34 = vpop.eup %8802  ;;  %v8041_v33 = vpack.c.bf16 %v1005_v30, %v999_v29 }
 0x3d9   :  { %694 = vrot.lane.b32.xlu0 %v8803_v34, %s9137_s29  ;;  %v8043_v34 = vpack.c.bf16 %v1018_v32, %v1012_v31 }
 0x3dc   :  { %716 = vrot.lane.b32.xlu1 %v9361_v37, %s9136_s28 }
 0x3dd   :  { %714 = vrot.lane.b32.xlu0 %v9356_v35, %s9136_s28 }
 0x3e0   :  { %740 = vrot.lane.b32.xlu1 %v9361_v37, %s9140_s5  ;;  %v853_v37 = vld [vmem:[%s11467_s24 + $0x8] sm:$0xff] }
 0x3e1   :  { %738 = vrot.lane.b32.xlu0 %v9356_v35, %s9140_s5  ;;  %v852_v35 = vld [vmem:[%s11467_s24] sm:$0xff] }
 0x3e4   :  { %720 = vrot.lane.b32.xlu1 %v9371_v41, %s9136_s28 }
 0x3e5   :  { %718 = vrot.lane.b32.xlu0 %v9366_v39, %s9136_s28 }
 0x3e8   :  { %744 = vrot.lane.b32.xlu1 %v9371_v41, %s9140_s5  ;;  %v854_v41 = vld [vmem:[%s11467_s24 + $0x10] sm:$0xff] }
 0x3e9   :  { %742 = vrot.lane.b32.xlu0 %v9366_v39, %s9140_s5  ;;  %v8007_v39 = vpack.c.bf16 %v853_v37, %v852_v35  ;;  %v8011_v38 = vpack.c.bf16 %v855_v36, %v854_v41  ;;  %v1011_v35 = vld [vmem:[%s11422_s8 + $0x60] sm:$0xff]  ;;  %v1017_v37 = vld [vmem:[%s11422_s8 + $0x90] sm:$0xff] }
 0x3ea   :  { %v8045_v41 = vpack.c.bf16 %v1017_v37, %v1011_v35  ;;  %v9128_v37 = vld [vmem:[%s11463_s3 + $0x20] sm:$0xff] }
 0x3eb   :  { %8008 = vmatprep.subr.bf16.mxu0 %v8007_v39 }
 0x3ec   :  { %724 = vrot.lane.b32.xlu1 %v9381_v45, %s9136_s28  ;;  %8010 = vmatpush3.bf16.msra.mxu0 %v8007_v39 }
 0x3ed   :  { %722 = vrot.lane.b32.xlu0 %v9376_v43, %s9136_s28  ;;  %8012 = vmatprep.subr.bf16.mxu0 %v8011_v38 }
 0x3f0   :  { %748 = vrot.lane.b32.xlu1 %v9381_v45, %s9140_s5  ;;  %v8015_v45 = vpack.c.bf16 %v857_v42, %v856_v40  ;;  %8014 = vmatpush3.bf16.msra.mxu0 %v8011_v38 }
 0x3f1   :  { %746 = vrot.lane.b32.xlu0 %v9376_v43, %s9140_s5  ;;  %v8019_v43 = vpack.c.bf16 %v859_v46, %v858_v44 }
 0x3f2   :  { %8016 = vmatprep.subr.bf16.mxu0 %v8015_v45 }
 0x3f4   :  { %728 = vrot.lane.b32.xlu1 %v9390_v49, %s9136_s28  ;;  %8018 = vmatpush3.bf16.msra.mxu0 %v8015_v45 }
 0x3f5   :  { %726 = vrot.lane.b32.xlu0 %v9386_v47, %s9136_s28  ;;  %8020 = vmatprep.subr.bf16.mxu0 %v8019_v43 }
 0x3f8   :  { %752 = vrot.lane.b32.xlu1 %v9390_v49, %s9140_s5  ;;  %8022 = vmatpush3.bf16.msra.mxu0 %v8019_v43 }
 0x3f9   :  { %750 = vrot.lane.b32.xlu0 %v9386_v47, %s9140_s5  ;;  %8024 = vmatprep.subr.bf16.mxu0 %v8023_v51  ;;  %s9141_s5 = smov 16  }
 0x3fc   :  { %8026 = vmatpush3.bf16.msra.mxu0 %v8023_v51 }
 0x432   :  { %v685_v49 = vpop.permute.xlu1 %684 }
 0x433   :  { %v707_v52 = vmul.f32 %v9421_v59, %v685_v49  ;;  %v683_v53 = vpop.permute.xlu0 %682 }
 0x434   :  { %v706_v47 = vmul.f32 %v9423_v62, %v683_v53 }
 0x435   :  { %772 = vrot.lane.b32.xlu1 %v707_v52, %s9141_s5 }
 0x436   :  { %770 = vrot.lane.b32.xlu0 %v706_v47, %s9141_s5 }
 0x439   :  { %796 = vrot.lane.b32.xlu1 %v707_v52, %s9136_s28 }
 0x43a   :  { %v689_v54 = vpop.permute.xlu1 %688  ;;  %794 = vrot.lane.b32.xlu0 %v706_v47, %s9136_s28 }
 0x43b   :  { %v709_v55 = vmul.f32 %v9427_v5, %v689_v54  ;;  %v687_v56 = vpop.permute.xlu0 %686  ;;  %v1037_v5 = vld [vmem:[%s11468_s2 + $0x30] sm:$0xff] }
 0x43c   :  { %v708_v57 = vmul.f32 %v9429_v8, %v687_v56  ;;  %v8029_v8 = vpack.c.bf16 %v1037_v5, %v1031_v1  ;;  %v1033_v56 = vld [vmem:[%s11468_s2 + $0x10] sm:$0xff] }
 0x43d   :  { %776 = vrot.lane.b32.xlu1 %v709_v55, %s9141_s5 }
 0x43e   :  { %774 = vrot.lane.b32.xlu0 %v708_v57, %s9141_s5  ;;  %8030 = vmatpush1.bf16.msra.mxu1 %v8029_v8 }
 0x43f   :  { %8036 = vmatprep.subr.bf16.mxu1 %v8035_v9 }
 0x441   :  { %800 = vrot.lane.b32.xlu1 %v709_v55, %s9136_s28  ;;  %7604 = vmatmul.mubr.msk.f32.vlgmr.msra.gmra.mrb[8].mxu1 %vm91_vm0, %v9564_v14 }
 0x442   :  { %798 = vrot.lane.b32.xlu0 %v708_v57, %s9136_s28  ;;  %v693_v58 = vpop.permute.xlu1 %692  ;;  %8038 = vmatpush1.bf16.msra.mxu1 %v8037_v15  ;;  %v1039_v57 = vld [vmem:[%s11468_s2 + $0x40] sm:$0xff] }
 0x443   :  { %v711_v59 = vmul.f32 %v9435_v17, %v693_v58  ;;  %v691_v60 = vpop.permute.xlu0 %690  ;;  %v1040_v17 = vld [vmem:[%s11468_s2 + $0x48] sm:$0xff]  ;;  %1137 = vmatprep.mubr.f32.mxu1 %v11448_v2  ;;  %v9124_v58 = vld [vmem:[%s11463_s3] sm:$0xff]  ;;  %v8033_v6 = vpack.c.bf16 %v1039_v57, %v1033_v56 }
 0x444   :  { %v710_v61 = vmul.f32 %v9438_v20, %v691_v60  ;;  %v8031_v18 = vpack.c.bf16 %v1040_v17, %v1034_v16  ;;  %v1006_v20 = vld [vmem:[%s11422_s8 + $0x38] sm:$0xff] }
 0x445   :  { %780 = vrot.lane.b32.xlu1 %v711_v59, %s9141_s5  ;;  %v8039_v22 = vpack.c.bf16 %v1006_v20, %v1000_v19  ;;  %7605 = vmatmul.mubr.msk.f32.gmra.mrb[10].mxu1 %vm91_vm0, %v9586_v21  ;;  %v1002_v60 = vld [vmem:[%s11422_s8 + $0x18] sm:$0xff] }
 0x446   :  { %778 = vrot.lane.b32.xlu0 %v710_v61, %s9141_s5  ;;  %8032 = vmatprep.subr.bf16.mxu0 %v8031_v18  ;;  %v9127_v16 = vld [vmem:[%s11463_s3 + $0x18] sm:$0xff] }
 0x447   :  { %8040 = vmatprep.subr.bf16.mxu1 %v8039_v22  ;;  %1143 = vmatprep.mubr.f32.mxu1 %v11448_v2 }
 0x449   :  { %804 = vrot.lane.b32.xlu1 %v711_v59, %s9136_s28  ;;  %7606 = vmatmul.mubr.msk.f32.gmra.mrb[12].mxu1 %vm91_vm0, %v9595_v23 }
 0x44a   :  { %v697_v62 = vpop.permute.xlu1 %696  ;;  %802 = vrot.lane.b32.xlu0 %v710_v61, %s9136_s28  ;;  %1149 = vmatprep.mubr.f32.mxu1 %v11448_v2  ;;  %v1008_v61 = vld [vmem:[%s11422_s8 + $0x48] sm:$0xff] }
 0x44b   :  { %v713_v3 = vmul.f32 %v9443_v25, %v697_v62  ;;  %v695_v12 = vpop.permute.xlu0 %694  ;;  %v9611_v25 = vld [vmem:[%s11469_s26 + $0x20] sm:$0xff]  ;;  %v9125_v62 = vld [vmem:[%s11463_s3 + $0x8] sm:$0xff]  ;;  %v8047_v9 = vpack.c.bf16 %v1008_v61, %v1002_v60 }
 0x44c   :  { %v712_v13 = vmul.f32 %v9446_v28, %v695_v12  ;;  %v9635_v28 = vld [vmem:[%s11469_s26 + $0x38] sm:$0xff] }
 0x44d   :  { %784 = vrot.lane.b32.xlu1 %v713_v3, %s9141_s5  ;;  %7607 = vmatmul.mubr.msk.f32.gmra.mrb[14].mxu1 %vm91_vm0, %v9603_v24 }
 0x44e   :  { %782 = vrot.lane.b32.xlu0 %v712_v13, %s9141_s5  ;;  %1155 = vmatprep.mubr.f32.mxu1 %v11448_v2  ;;  %v717_v39 = vpop.permute.xlu1 %716 }
 0x44f   :  { %v715_v36 = vpop.permute.xlu0 %714  ;;  %v819_v63 = vsel %vm91_vm0, %v9125_v62, %v717_v39  ;;  %v9129_v39 = vld [vmem:[%s11463_s3 + $0x28] sm:$0xff] }
 0x450   :  { %v818_v59 = vsel %vm91_vm0, %v9124_v58, %v715_v36 }
 0x451   :  { %808 = vrot.lane.b32.xlu1 %v713_v3, %s9136_s28  ;;  %7608 = vmatmul.mubr.msk.f32.gmra.mrb[16].mxu1 %vm91_vm0, %v9611_v25 }
 0x452   :  { %806 = vrot.lane.b32.xlu0 %v712_v13, %s9136_s28  ;;  %1161 = vmatprep.mubr.f32.mxu1 %v11448_v2  ;;  %v741_v38 = vpop.permute.xlu1 %740  ;;  %v9126_v13 = vld [vmem:[%s11463_s3 + $0x10] sm:$0xff] }
 0x453   :  { %v739_v40 = vpop.permute.xlu0 %738  ;;  %v827_v3 = vsel %vm440_vm1, %v819_v63, %v741_v38  ;;  %v1001_v63 = vld [vmem:[%s11422_s8 + $0x10] sm:$0xff] }
 0x454   :  { %v826_v0 = vsel %vm440_vm1, %v818_v59, %v739_v40 }
 0x455   :  { %7609 = vmatmul.mubr.msk.f32.gmra.mrb[18].mxu1 %vm91_vm0, %v9619_v26 }
 0x456   :  { %1167 = vmatprep.mubr.f32.mxu1 %v11448_v2  ;;  %v721_v42 = vpop.permute.xlu1 %720 }
 0x457   :  { %v719_v45 = vpop.permute.xlu0 %718  ;;  %v821_v17 = vsel %vm91_vm0, %v9127_v16, %v721_v42 }
 0x458   :  { %v820_v15 = vsel %vm91_vm0, %v9126_v13, %v719_v45 }
 0x459   :  { %7610 = vmatmul.mubr.msk.f32.gmra.mrb[20].mxu1 %vm91_vm0, %v9627_v27 }
 0x45a   :  { %1173 = vmatprep.mubr.f32.mxu1 %v11448_v2  ;;  %v745_v44 = vpop.permute.xlu1 %744 }
 0x45b   :  { %v743_v46 = vpop.permute.xlu0 %742  ;;  %v829_v20 = vsel %vm440_vm1, %v821_v17, %v745_v44 }
 0x45c   :  { %v828_v18 = vsel %vm440_vm1, %v820_v15, %v743_v46 }
 0x45d   :  { %7611 = vmatmul.mubr.msk.f32.gmra.mrb[22].mxu1 %vm91_vm0, %v9635_v28 }
 0x45e   :  { %1357 = vmatprep.mubr.f32.mxu1 %v11448_v2  ;;  %v725_v43 = vpop.permute.xlu1 %724 }
 0x45f   :  { %v723_v48 = vpop.permute.xlu0 %722  ;;  %v823_v36 = vsel %vm91_vm0, %v9129_v39, %v725_v43  ;;  %v9130_v43 = vld [vmem:[%s11463_s3 + $0x30] sm:$0xff] }
 0x461   :  { %7620 = vmatmul.mubr.msk.f32.vlgmr.msra.gmra.mrb[24].mxu1 %vm91_vm0, %v9564_v14 }
 0x462   :  { %8042 = vmatpush1.bf16.msra.mxu1 %v8041_v33  ;;  %1363 = vmatprep.mubr.f32.mxu1 %v11448_v2  ;;  %v749_v50 = vpop.permute.xlu1 %748 }
 0x463   :  { %8044 = vmatprep.subr.bf16.mxu1 %v8043_v34  ;;  %v747_v51 = vpop.permute.xlu0 %746  ;;  %v831_v40 = vsel %vm440_vm1, %v823_v36, %v749_v50  ;;  %v1930_v36 = vld [vmem:[%s11423_s11 + $0x28] sm:$0xff] }
 0x465   :  { %7621 = vmatmul.mubr.msk.f32.gmra.mrb[26].mxu1 %vm91_vm0, %v9586_v21 }
 0x466   :  { %1369 = vmatprep.mubr.f32.mxu1 %v11448_v2  ;;  %8046 = vmatpush1.bf16.msra.mxu1 %v8045_v41  ;;  %v9682_v49 = vpop.permute.xlu1 %728  ;;  %v822_v41 = vsel %vm91_vm0, %v9128_v37, %v723_v48 }
 0x467   :  { %v9684_v52 = vpop.permute.xlu0 %726  ;;  %v830_v38 = vsel %vm440_vm1, %v822_v41, %v747_v51  ;;  %v9131_v51 = vld [vmem:[%s11463_s3 + $0x38] sm:$0xff] }
 0x468   :  { %v824_v50 = vsel %vm91_vm0, %v9130_v43, %v9684_v52  ;;  %v825_v56 = vsel %vm91_vm0, %v9131_v51, %v9682_v49  ;;  %v1007_v49 = vld [vmem:[%s11422_s8 + $0x40] sm:$0xff] }
 0x469   :  { %7622 = vmatmul.mubr.msk.f32.gmra.mrb[28].mxu1 %vm91_vm0, %v9595_v23 }
 0x46a   :  { %1375 = vmatprep.mubr.f32.mxu1 %v11448_v2  ;;  %v9686_v53 = vpop.permute.xlu1 %752 }
 0x46b   :  { %v9688_v47 = vpop.permute.xlu0 %750  ;;  %v833_v59 = vsel %vm440_vm1, %v825_v56, %v9686_v53  ;;  %v8049_v53 = vpack.c.bf16 %v1007_v49, %v1001_v63 }
 0x46c   :  { %v832_v57 = vsel %vm440_vm1, %v824_v50, %v9688_v47 }
 0x46d   :  { %7623 = vmatmul.mubr.msk.f32.gmra.mrb[30].mxu1 %vm91_vm0, %v9603_v24 }
 0x46e   :  { %1381 = vmatprep.mubr.f32.mxu1 %v11448_v2 }
 0x471   :  { %7624 = vmatmul.mubr.msk.f32.gmra.mrb[32].mxu1 %vm91_vm0, %v9611_v25 }
 0x472   :  { %1387 = vmatprep.mubr.f32.mxu1 %v11448_v2 }
 0x475   :  { %7625 = vmatmul.mubr.msk.f32.gmra.mrb[34].mxu1 %vm91_vm0, %v9619_v26 }
 0x476   :  { %1393 = vmatprep.mubr.f32.mxu1 %v11448_v2 }
 0x479   :  { %7626 = vmatmul.mubr.msk.f32.gmra.mrb[36].mxu1 %vm91_vm0, %v9627_v27 }
 0x47a   :  { %1399 = vmatprep.mubr.f32.mxu1 %v11448_v2 }
 0x47d   :  { %7627 = vmatmul.mubr.msk.f32.gmra.mrb[38].mxu1 %vm91_vm0, %v9635_v28 }
 0x47e   :  { %1494 = vmatprep.mubr.f32.mxu1 %v11448_v2 }
 0x4a7   :  { %v773_v54 = vpop.permute.xlu1 %772 }
 0x4a8   :  { %v771_v55 = vpop.permute.xlu0 %770  ;;  %v836_v7 = vsel %vm834_vm2, %v827_v3, %v773_v54  ;;  %v1934_v3 = vld [vmem:[%s11423_s11 + $0x48] sm:$0xff] }
 0x4a9   :  { %v835_v4 = vsel %vm834_vm2, %v826_v0, %v771_v55 }
 0x4ab   :  { %v797_v1 = vpop.permute.xlu1 %796 }
 0x4ac   :  { %v795_v5 = vpop.permute.xlu0 %794  ;;  %v845_v10 = vsel %vm843_vm3, %v836_v7, %v797_v1  ;;  %v1928_v1 = vld [vmem:[%s11423_s11 + $0x18] sm:$0xff]  ;;  %v9837_v7 = vld [vmem:[%s11424_s7] ss:$0 sm:$0xff] }
 0x4ad   :  { %v844_v8 = vsel %vm843_vm3, %v835_v4, %v795_v5  ;;  %v9825_v4 = vpack.c.bf16 %v1934_v3, %v1928_v1  ;;  %v1003_v5 = vld [vmem:[%s11422_s8 + $0x20] sm:$0xff] }
 0x4ae   :  { %7961 = vmatprep.mubr.msk.f32.mxu0 %vm869_vm4, %v844_v8  ;;  %v1016_v8 = vld [vmem:[%s11422_s8 + $0x88] sm:$0xff] }
 0x4af   :  { %v777_v11 = vpop.permute.xlu1 %776  ;;  %7962 = vmatmul.mubr.msk.f32.vlgmr.msra.gmra.mrb[8].mxu0 %vm869_vm4, %v845_v10 }
 0x4b0   :  { %v775_v12 = vpop.permute.xlu0 %774  ;;  %8034 = vmatpush1.bf16.msra.mxu0 %v8033_v6  ;;  %v838_v30 = vsel %vm834_vm2, %v829_v20, %v777_v11  ;;  %v1009_v6 = vld [vmem:[%s11422_s8 + $0x50] sm:$0xff] }
 0x4b1   :  { %8048 = vmatprep.subr.bf16.mxu0 %v8047_v9  ;;  %v837_v22 = vsel %vm834_vm2, %v828_v18, %v775_v12  ;;  %v1022_v9 = vld [vmem:[%s11422_s8 + $0xb8] sm:$0xff]  ;;  %v1927_v11 = vld [vmem:[%s11423_s11 + $0x10] sm:$0xff]  ;;  %v1933_v12 = vld [vmem:[%s11423_s11 + $0x40] sm:$0xff]  ;;  %v8057_v15 = vpack.c.bf16 %v1009_v6, %v1003_v5 }
 0x4b2   :  { %v8059_v17 = vpack.c.bf16 %v1022_v9, %v1016_v8  ;;  %v1015_v18 = vld [vmem:[%s11422_s8 + $0x80] sm:$0xff]  ;;  %v9860_v20 = vpack.c.bf16 %v1933_v12, %v1927_v11 }
 0x4b3   :  { %v801_v19 = vpop.permute.xlu1 %800  ;;  %v10064_v5 = vld [vmem:[%s11425_s10] sm:$0x3f] }
 0x4b4   :  { %v799_v29 = vpop.permute.xlu0 %798  ;;  %v847_v32 = vsel %vm843_vm3, %v838_v30, %v801_v19  ;;  %v1021_v19 = vld [vmem:[%s11422_s8 + $0xb0] sm:$0xff] }
 0x4b5   :  { %v846_v31 = vsel %vm843_vm3, %v837_v22, %v799_v29  ;;  %v1940_v22 = vld [vmem:[%s11423_s11 + $0x78] sm:$0xff]  ;;  %v1946_v29 = vld [vmem:[%s11423_s11 + $0xa8] sm:$0xff]  ;;  %v1939_v30 = vld [vmem:[%s11423_s11 + $0x70] sm:$0xff] }
 0x4b6   :  { %7964 = vmatprep.mubr.msk.f32.mxu0 %vm869_vm4, %v846_v31  ;;  %v1945_v31 = vld [vmem:[%s11423_s11 + $0xa0] sm:$0xff]  ;;  %v9889_v37 = vpack.c.bf16 %v1946_v29, %v1940_v22 }
 0x4b7   :  { %7965 = vmatmul.mubr.msk.f32.gmra.mrb[10].mxu0 %vm869_vm4, %v847_v32  ;;  %v781_v33 = vpop.permute.xlu1 %780  ;;  %v1926_v32 = vld [vmem:[%s11423_s11 + $0x8] sm:$0xff]  ;;  %v9892_v41 = vpack.c.bf16 %v1945_v31, %v1939_v30 }
 0x4b8   :  { %v779_v34 = vpop.permute.xlu0 %778  ;;  %v840_v44 = vsel %vm834_vm2, %v831_v40, %v781_v33  ;;  %v1932_v33 = vld [vmem:[%s11423_s11 + $0x38] sm:$0xff] }
 0x4b9   :  { %v839_v42 = vsel %vm834_vm2, %v830_v38, %v779_v34  ;;  %v9894_v39 = vpack.c.bf16 %v1932_v33, %v1926_v32  ;;  %v1936_v38 = vld [vmem:[%s11423_s11 + $0x58] sm:$0xff] }
 0x4bb   :  { %v805_v35 = vpop.permute.xlu1 %804 }
 0x4bc   :  { %v803_v45 = vpop.permute.xlu0 %802  ;;  %v849_v48 = vsel %vm843_vm3, %v840_v44, %v805_v35  ;;  %v8061_v35 = vpack.c.bf16 %v1021_v19, %v1015_v18  ;;  %v9912_v44 = vpack.c.bf16 %v1936_v38, %v1930_v36 }
 0x4bd   :  { %v848_v46 = vsel %vm843_vm3, %v839_v42, %v803_v45 }
 0x4be   :  { %7967 = vmatprep.mubr.msk.f32.mxu0 %vm869_vm4, %v848_v46 }
 0x4bf   :  { %v785_v54 = vpop.permute.xlu1 %784  ;;  %7968 = vmatmul.mubr.msk.f32.gmra.mrb[12].mxu0 %vm869_vm4, %v849_v48 }
 0x4c0   :  { %v783_v55 = vpop.permute.xlu0 %782  ;;  %v842_v62 = vsel %vm834_vm2, %v833_v59, %v785_v54  ;;  %v1931_v59 = vld [vmem:[%s11423_s11 + $0x30] sm:$0xff] }
 0x4c1   :  { %v841_v60 = vsel %vm834_vm2, %v832_v57, %v783_v55 }
 0x4c3   :  { %v809_v58 = vpop.permute.xlu1 %808 }
 0x4c4   :  { %v807_v61 = vpop.permute.xlu0 %806  ;;  %v851_v47 = vsel %vm843_vm3, %v842_v62, %v809_v58  ;;  %v1925_v58 = vld [vmem:[%s11423_s11] sm:$0xff] }
 0x4c5   :  { %v850_v52 = vsel %vm843_vm3, %v841_v60, %v807_v61  ;;  %v1938_v60 = vld [vmem:[%s11423_s11 + $0x68] sm:$0xff]  ;;  %v1944_v61 = vld [vmem:[%s11423_s11 + $0x98] sm:$0xff]  ;;  %v1929_v62 = vld [vmem:[%s11423_s11 + $0x20] sm:$0xff]  ;;  %v9978_v63 = vpack.c.bf16 %v1931_v59, %v1925_v58 }
 0x4c6   :  { %7970 = vmatprep.mubr.msk.f32.mxu0 %vm869_vm4, %v850_v52  ;;  %v1935_v52 = vld [vmem:[%s11423_s11 + $0x50] sm:$0xff]  ;;  %v9980_v49 = vpack.c.bf16 %v1944_v61, %v1938_v60 }
 0x4c7   :  { %7971 = vmatmul.mubr.msk.f32.gmra.mrb[14].mxu0 %vm869_vm4, %v851_v47  ;;  %v1937_v47 = vld [vmem:[%s11423_s11 + $0x60] sm:$0xff] }
 0x4c8   :  { %1244 = vmatprep.mubr.f32.mxu0 %v11448_v2 }
 0x4cb   :  { %7612 = vmatmul.mubr.msk.f32.vlgmr.msra.gmra.mrb[16].mxu0 %vm91_vm0, %v9564_v14  ;;  %v1014_v14 = vld [vmem:[%s11422_s8 + $0x78] sm:$0xff] }
 0x4cc   :  { %1250 = vmatprep.mubr.f32.mxu0 %v11448_v2  ;;  %8050 = vmatpush1.bf16.msra.mxu0 %v8049_v53  ;;  %v1943_v53 = vld [vmem:[%s11423_s11 + $0x90] sm:$0xff] }
 0x4cf   :  { %7613 = vmatmul.mubr.msk.f32.gmra.mrb[18].mxu0 %vm91_vm0, %v9586_v21  ;;  %v1020_v21 = vld [vmem:[%s11422_s8 + $0xa8] sm:$0xff] }
 0x4d0   :  { %1256 = vmatprep.mubr.f32.mxu0 %v11448_v2 }
 0x4d3   :  { %7614 = vmatmul.mubr.msk.f32.gmra.mrb[20].mxu0 %vm91_vm0, %v9595_v23  ;;  %v8051_v23 = vpack.c.bf16 %v1020_v21, %v1014_v14  ;;  %v9988_v14 = vpack.c.bf16 %v1935_v52, %v1929_v62  ;;  %v1942_v21 = vld [vmem:[%s11423_s11 + $0x88] sm:$0xff] }
 0x4d4   :  { %1262 = vmatprep.mubr.f32.mxu0 %v11448_v2 }
 0x4d5   :  { %8052 = vmatprep.subr.bf16.mxu0 %v8051_v23  ;;  %v1948_v23 = vld [vmem:[%s11423_s11 + $0xb8] sm:$0xff] }
 0x4d7   :  { %7615 = vmatmul.mubr.msk.f32.gmra.mrb[22].mxu0 %vm91_vm0, %v9603_v24  ;;  %v1013_v24 = vld [vmem:[%s11422_s8 + $0x70] sm:$0xff] }
 0x4d8   :  { %1268 = vmatprep.mubr.f32.mxu0 %v11448_v2 }
 0x4db   :  { %7616 = vmatmul.mubr.msk.f32.gmra.mrb[24].mxu0 %vm91_vm0, %v9611_v25  ;;  %v1019_v25 = vld [vmem:[%s11422_s8 + $0xa0] sm:$0xff] }
 0x4dc   :  { %1274 = vmatprep.mubr.f32.mxu0 %v11448_v2 }
 0x4df   :  { %7617 = vmatmul.mubr.msk.f32.gmra.mrb[26].mxu0 %vm91_vm0, %v9619_v26  ;;  %v8053_v26 = vpack.c.bf16 %v1019_v25, %v1013_v24  ;;  %v1941_v24 = vld [vmem:[%s11423_s11 + $0x80] sm:$0xff]  ;;  %v1947_v25 = vld [vmem:[%s11423_s11 + $0xb0] sm:$0xff] }
 0x4e0   :  { %1280 = vmatprep.mubr.f32.mxu0 %v11448_v2 }
 0x4e1   :  { %8054 = vmatpush1.bf16.msra.mxu0 %v8053_v26  ;;  %v10007_v26 = vpack.c.bf16 %v1943_v53, %v1937_v47 }
 0x4e2   :  { %8072 = vmatprep.subr.bf16.mxu0 %v9825_v4 }
 0x4e3   :  { %7618 = vmatmul.mubr.msk.f32.gmra.mrb[28].mxu0 %vm91_vm0, %v9627_v27  ;;  %v1004_v27 = vld [vmem:[%s11422_s8 + $0x28] sm:$0xff] }
 0x4e4   :  { %1286 = vmatprep.mubr.f32.mxu0 %v11448_v2 }
 0x4e7   :  { %7619 = vmatmul.mubr.msk.f32.gmra.mrb[30].mxu0 %vm91_vm0, %v9635_v28  ;;  %v1010_v28 = vld [vmem:[%s11422_s8 + $0x58] sm:$0xff] }
 0x4e8   :  { %1607 = vmatprep.mubr.f32.mxu0 %v11448_v2  ;;  %v8055_v0 = vpack.c.bf16 %v1010_v28, %v1004_v27  ;;  %v10011_v27 = vpack.c.bf16 %v1948_v23, %v1942_v21  ;;  %v10014_v28 = vpack.c.bf16 %v1947_v25, %v1941_v24 }
 0x4ea   :  { %8056 = vmatprep.subr.bf16.mxu1 %v8055_v0  ;;  %v1771_v0 = vlaneseq }
 0x4ec   :  { %v10058_v1 = vshrl.u32 %v1771_v0, 7 }
 0x4ee   :  { %11470 = vst [vmem:[#allocation5_spill] sm:$0xff] %v10058_v1  ;;  %v11447_v3 = vsub.s32 3, %v10058_v1 }
 0x4f0   :  { %v1786_v6 = vrot.slane %v10064_v5, %v11447_v3 }
 0x582   :  { %v7963_v10 = vpop.f32.mrb[8].mxu0 }
 0x583   :  { %v960_v13 = vpop.f32.mrb[9].mxu0  ;;  %v9886_v34 = vadd.f32 %v7963_v10, %v9837_v7 }
 0x584   :  { %v9852_v16 = vadd.f32 %v9837_v7, %v960_v13 }
 0x586   :  { %7628 = vmatmul.mubr.msk.f32.vlgmr.msra.gmra.mrb[8].mxu1 %vm440_vm1, %v9852_v16  ;;  %7636 = vmatmul.mubr.msk.f32.vlgmr.msra.gmra.mrb[16].mxu0 %vm440_vm1, %v9852_v16 }
 0x587   :  { %8058 = vmatpush1.bf16.msra.mxu1 %v8057_v15  ;;  %1500 = vmatprep.mubr.f32.mxu1 %v11448_v2 }
 0x588   :  { %1613 = vmatprep.mubr.f32.mxu0 %v11448_v2  ;;  %8060 = vmatprep.subr.bf16.mxu1 %v8059_v17 }
 0x589   :  { %8074 = vmatpush1.bf16.msra.mxu0 %v9860_v20 }
 0x58a   :  { %v7966_v40 = vpop.f32.mrb[10].mxu0  ;;  %7629 = vmatmul.mubr.msk.f32.gmra.mrb[10].mxu1 %vm440_vm1, %v9886_v34  ;;  %7637 = vmatmul.mubr.msk.f32.gmra.mrb[18].mxu0 %vm440_vm1, %v9886_v34 }
 0x58b   :  { %v970_v42 = vpop.f32.mrb[11].mxu0  ;;  %1506 = vmatprep.mubr.f32.mxu1 %v11448_v2  ;;  %1619 = vmatprep.mubr.f32.mxu0 %v11448_v2  ;;  %v9923_v46 = vadd.f32 %v7966_v40, %v9837_v7 }
 0x58c   :  { %v9909_v45 = vadd.f32 %v9837_v7, %v970_v42  ;;  %8062 = vmatpush1.bf16.msra.mxu1 %v8061_v35  ;;  %8076 = vmatprep.subr.bf16.mxu0 %v9889_v37 }
 0x58d   :  { %8078 = vmatpush1.bf16.msra.mxu0 %v9892_v41  ;;  %8064 = vmatprep.subr.bf16.mxu1 %v9894_v39 }
 0x58e   :  { %7630 = vmatmul.mubr.msk.f32.gmra.mrb[12].mxu1 %vm440_vm1, %v9909_v45  ;;  %7638 = vmatmul.mubr.msk.f32.gmra.mrb[20].mxu0 %vm440_vm1, %v9909_v45 }
 0x58f   :  { %1512 = vmatprep.mubr.f32.mxu1 %v11448_v2  ;;  %1625 = vmatprep.mubr.f32.mxu0 %v11448_v2 }
 0x590   :  { %8080 = vmatprep.subr.bf16.mxu0 %v9912_v44 }
 0x592   :  { %7631 = vmatmul.mubr.msk.f32.gmra.mrb[14].mxu1 %vm440_vm1, %v9923_v46  ;;  %7639 = vmatmul.mubr.msk.f32.gmra.mrb[22].mxu0 %vm440_vm1, %v9923_v46  ;;  %v7969_v54 = vpop.f32.mrb[12].mxu0 }
 0x593   :  { %1518 = vmatprep.mubr.f32.mxu1 %v11448_v2  ;;  %1631 = vmatprep.mubr.f32.mxu0 %v11448_v2  ;;  %v980_v48 = vpop.f32.mrb[13].mxu0  ;;  %v9942_v43 = vadd.f32 %v7969_v54, %v9837_v7 }
 0x594   :  { %v9933_v55 = vadd.f32 %v9837_v7, %v980_v48 }
 0x596   :  { %7632 = vmatmul.mubr.msk.f32.gmra.mrb[16].mxu1 %vm440_vm1, %v9933_v55  ;;  %7640 = vmatmul.mubr.msk.f32.gmra.mrb[24].mxu0 %vm440_vm1, %v9933_v55 }
 0x597   :  { %1524 = vmatprep.mubr.f32.mxu1 %v11448_v2  ;;  %1637 = vmatprep.mubr.f32.mxu0 %v11448_v2 }
 0x59a   :  { %v7972_v50 = vpop.f32.mrb[14].mxu0  ;;  %7633 = vmatmul.mubr.msk.f32.gmra.mrb[18].mxu1 %vm440_vm1, %v9942_v43  ;;  %7641 = vmatmul.mubr.msk.f32.gmra.mrb[26].mxu0 %vm440_vm1, %v9942_v43 }
 0x59b   :  { %v990_v51 = vpop.f32.mrb[15].mxu0  ;;  %1530 = vmatprep.mubr.f32.mxu1 %v11448_v2  ;;  %1643 = vmatprep.mubr.f32.mxu0 %v11448_v2  ;;  %v996_v57 = vadd.f32 %v7972_v50, %v9837_v7  ;;  %v11444_v50 = vsub.s32 5, %v10058_v1 }
 0x59c   :  { %v991_v56 = vadd.f32 %v9837_v7, %v990_v51  ;;  %v11446_v7 = vsub.s32 2, %v10058_v1 }
 0x59d   :  { %v1794_v59 = vrot.slane %v10064_v5, %v11444_v50 }
 0x59e   :  { %7634 = vmatmul.mubr.msk.f32.gmra.mrb[20].mxu1 %vm440_vm1, %v991_v56  ;;  %7642 = vmatmul.mubr.msk.f32.gmra.mrb[28].mxu0 %vm440_vm1, %v991_v56  ;;  %v10077_v11 = vrot.slane %v10064_v5, %v11446_v7 }
 0x59f   :  { %1536 = vmatprep.mubr.f32.mxu1 %v11448_v2  ;;  %1649 = vmatprep.mubr.f32.mxu0 %v11448_v2 }
 0x5a2   :  { %7635 = vmatmul.mubr.msk.f32.gmra.mrb[22].mxu1 %vm440_vm1, %v996_v57  ;;  %7643 = vmatmul.mubr.msk.f32.gmra.mrb[30].mxu0 %vm440_vm1, %v996_v57 }
 0x5a3   :  { %1720 = vmatprep.mubr.f32.mxu1 %v11448_v2  ;;  %2091 = vmatprep.mubr.f32.mxu0 %v11448_v2 }
 0x5a6   :  { %7644 = vmatmul.mubr.msk.f32.vlgmr.msra.gmra.mrb[24].mxu1 %vm440_vm1, %v9852_v16  ;;  %2092 = vmatmul.mubr.f32.vlgmr.msra.gmra.mrb[32].mxu0 %v11448_v2 }
 0x5a7   :  { %8066 = vmatpush1.bf16.msra.mxu1 %v9978_v63  ;;  %1726 = vmatprep.mubr.f32.mxu1 %v11448_v2 }
 0x5a8   :  { %2096 = vmatprep.mubr.f32.mxu0 %v11448_v2  ;;  %8068 = vmatprep.subr.bf16.mxu1 %v9980_v49 }
 0x5a9   :  { %8082 = vmatpush1.bf16.msra.mxu0 %v9988_v14 }
 0x5aa   :  { %7645 = vmatmul.mubr.msk.f32.gmra.mrb[26].mxu1 %vm440_vm1, %v9886_v34  ;;  %2097 = vmatmul.mubr.f32.gmra.mrb[34].mxu0 %v11448_v2 }
 0x5ab   :  { %1732 = vmatprep.mubr.f32.mxu1 %v11448_v2  ;;  %8070 = vmatpush1.bf16.msra.mxu1 %v10007_v26 }
 0x5ac   :  { %8084 = vmatprep.subr.bf16.mxu0 %v10011_v27  ;;  %2166 = vmatprep.mubr.f32.mxu0 %v11448_v2 }
 0x5ad   :  { %8086 = vmatpush1.bf16.msra.mxu0 %v10014_v28  ;;  %8088 = vmatprep.subr.bf16.mxu1 %v9894_v39 }
 0x5ae   :  { %7646 = vmatmul.mubr.msk.f32.gmra.mrb[28].mxu1 %vm440_vm1, %v9909_v45  ;;  %8096 = vmatprep.subr.bf16.mxu0 %v9825_v4 }
 0x5af   :  { %1738 = vmatprep.mubr.f32.mxu1 %v11448_v2 }
 0x5b0   :  { %2167 = vmatmul.mubr.f32.vlgmr.msra.gmra.mrb[36].mxu0 %v11448_v2 }
 0x5b1   :  { %2170 = vmatprep.mubr.f32.mxu0 %v11448_v2  ;;  %8098 = vmatpush1.bf16.msra.mxu0 %v9860_v20 }
 0x5b2   :  { %7647 = vmatmul.mubr.msk.f32.gmra.mrb[30].mxu1 %vm440_vm1, %v9923_v46  ;;  %8100 = vmatprep.subr.bf16.mxu0 %v9889_v37 }
 0x5b3   :  { %1744 = vmatprep.mubr.f32.mxu1 %v11448_v2 }
 0x5b4   :  { %2171 = vmatmul.mubr.f32.gmra.mrb[38].mxu0 %v11448_v2 }
 0x5b5   :  { %8102 = vmatpush1.bf16.msra.mxu0 %v9892_v41  ;;  %2374 = vmatprep.mubr.f32.mxu0 %v11448_v2 }
 0x5b6   :  { %7648 = vmatmul.mubr.msk.f32.gmra.mrb[32].mxu1 %vm440_vm1, %v9933_v55  ;;  %8104 = vmatprep.subr.bf16.mxu0 %v9912_v44  ;;  %v11445_v55 = vsub.s32 4, %v10058_v1 }
 0x5b7   :  { %1750 = vmatprep.mubr.f32.mxu1 %v11448_v2 }
 0x5b8   :  { %v1790_v58 = vrot.slane %v10064_v5, %v11445_v55 }
 0x5ba   :  { %7649 = vmatmul.mubr.msk.f32.gmra.mrb[34].mxu1 %vm440_vm1, %v9942_v43 }
 0x5bb   :  { %1756 = vmatprep.mubr.f32.mxu1 %v11448_v2 }
 0x5be   :  { %7650 = vmatmul.mubr.msk.f32.gmra.mrb[36].mxu1 %vm440_vm1, %v991_v56 }
 0x5bf   :  { %1762 = vmatprep.mubr.f32.mxu1 %v11448_v2 }
 0x5c2   :  { %7651 = vmatmul.mubr.msk.f32.gmra.mrb[38].mxu1 %vm440_vm1, %v996_v57 }
 0x5c3   :  { %2016 = vmatprep.mubr.f32.mxu1 %v11448_v2 }
 0x5c6   :  { %2017 = vmatmul.mubr.f32.vlgmr.msra.gmra.mrb[8].mxu1 %v11448_v2 }
 0x5c7   :  { %8090 = vmatpush1.bf16.msra.mxu1 %v9978_v63  ;;  %2022 = vmatprep.mubr.f32.mxu1 %v11448_v2 }
 0x5c8   :  { %8092 = vmatprep.subr.bf16.mxu1 %v9980_v49 }
 0x5ca   :  { %2023 = vmatmul.mubr.f32.gmra.mrb[40].mxu1 %v11448_v2 }
 0x5cb   :  { %8094 = vmatpush1.bf16.msra.mxu1 %v10007_v26  ;;  %2299 = vmatprep.mubr.f32.mxu1 %v11448_v2 }
 0x5cc   :  { %8112 = vmatprep.subr.bf16.mxu1 %v9894_v39 }
 0x659   :  { %v10070_v8 = vpop.f32.mrb[16].mxu0 }
 0x65a   :  { %v1611_v9 = vpop.f32.mrb[17].mxu0 }
 0x65b   :  { %v10072_v10 = vadd.f32 %v1786_v6, %v1611_v9 }
 0x65d   :  { %v1615_v12 = vpop.f32.mrb[18].mxu0 }
 0x65e   :  { %v10080_v13 = vadd.f32 %v10077_v11, %v1615_v12  ;;  %v1617_v15 = vpop.f32.mrb[19].mxu0 }
 0x65f   :  { %v10082_v16 = vadd.f32 %v1786_v6, %v1617_v15 }
 0x661   :  { %v1621_v17 = vpop.f32.mrb[20].mxu0 }
 0x662   :  { %v10085_v18 = vadd.f32 %v10077_v11, %v1621_v17  ;;  %v1623_v19 = vpop.f32.mrb[21].mxu0 }
 0x663   :  { %v10087_v22 = vadd.f32 %v1786_v6, %v1623_v19 }
 0x665   :  { %v1627_v29 = vpop.f32.mrb[22].mxu0 }
 0x666   :  { %v10090_v30 = vadd.f32 %v10077_v11, %v1627_v29  ;;  %v1629_v31 = vpop.f32.mrb[23].mxu0 }
 0x667   :  { %v10092_v32 = vadd.f32 %v1786_v6, %v1629_v31 }
 0x669   :  { %v1633_v33 = vpop.f32.mrb[24].mxu0 }
 0x66a   :  { %v10095_v34 = vadd.f32 %v10077_v11, %v1633_v33  ;;  %v1635_v35 = vpop.f32.mrb[25].mxu0 }
 0x66b   :  { %v10097_v36 = vadd.f32 %v1786_v6, %v1635_v35 }
 0x66d   :  { %v1639_v38 = vpop.f32.mrb[26].mxu0 }
 0x66e   :  { %v10100_v40 = vadd.f32 %v10077_v11, %v1639_v38  ;;  %v1641_v42 = vpop.f32.mrb[27].mxu0 }
 0x66f   :  { %v10102_v45 = vadd.f32 %v1786_v6, %v1641_v42 }
 0x671   :  { %v1645_v46 = vpop.f32.mrb[28].mxu0 }
 0x672   :  { %v10105_v54 = vadd.f32 %v10077_v11, %v1645_v46  ;;  %v1647_v48 = vpop.f32.mrb[29].mxu0 }
 0x673   :  { %v10108_v43 = vadd.f32 %v1786_v6, %v1647_v48 }
 0x675   :  { %v1651_v51 = vpop.f32.mrb[30].mxu0 }
 0x676   :  { %v10112_v56 = vadd.f32 %v10077_v11, %v1651_v51  ;;  %v1653_v57 = vpop.f32.mrb[31].mxu0 }
 0x677   :  { %v1846_v21 = vadd.f32 %v1786_v6, %v1653_v57 }
 0x678   :  { %11471 = vst [vmem:[#allocation6_spill] sm:$0xff] %v10112_v56 }
 0x679   :  { %v1722_v60 = vpop.f32.mrb[24].mxu1  ;;  %v10120_v61 = vpop.f32.mrb[32].mxu0 }
 0x67a   :  { %v10122_v62 = vadd.f32 %v1790_v58, %v1722_v60  ;;  %v1724_v52 = vpop.f32.mrb[25].mxu1  ;;  %v2095_v47 = vpop.f32.mrb[33].mxu0 }
 0x67b   :  { %v10124_v53 = vadd.f32 %v1794_v59, %v1724_v52 }
 0x67d   :  { %11472 = vst [vmem:[#allocation7_spill] sm:$0xff] %v10124_v53  ;;  %v1728_v23 = vpop.f32.mrb[26].mxu1  ;;  %v2098_v24 = vpop.f32.mrb[34].mxu0 }
 0x67e   :  { %v10126_v25 = vadd.f32 %v1790_v58, %v1728_v23  ;;  %v1730_v0 = vpop.f32.mrb[27].mxu1  ;;  %v2099_v9 = vpop.f32.mrb[35].mxu0 }
 0x67f   :  { %v10128_v12 = vadd.f32 %v1794_v59, %v1730_v0  ;;  %v2205_v15 = vadd.f32 %v2099_v9, %v1846_v21 }
 0x681   :  { %v7658_v17 = vmul.f32 -1.442695, %v2205_v15  ;;  %v1734_v19 = vpop.f32.mrb[28].mxu1 }
 0x682   :  { %v10130_v29 = vadd.f32 %v1790_v58, %v1734_v19  ;;  %v1736_v31 = vpop.f32.mrb[29].mxu1 }
 0x683   :  { %8804 = vpow2.f32 %v7658_v17  ;;  %v10132_v33 = vadd.f32 %v1794_v59, %v1736_v31  ;;  %v2168_v35 = vpop.f32.mrb[36].mxu0 }
 0x684   :  { %v2169_v38 = vpop.f32.mrb[37].mxu0 }
 0x685   :  { %v1740_v6 = vpop.f32.mrb[30].mxu1  ;;  %v11450_v38 = vsub.s32 0, %v10058_v1 }
 0x686   :  { %v10134_v42 = vadd.f32 %v1790_v58, %v1740_v6  ;;  %v1742_v46 = vpop.f32.mrb[31].mxu1 }
 0x687   :  { %v10136_v48 = vadd.f32 %v1794_v59, %v1742_v46  ;;  %v2172_v51 = vpop.f32.mrb[38].mxu0  ;;  %v10154_v46 = vld [vmem:[%s11426_s13] ss:$0 sm:$0xff] }
 0x688   :  { %v2174_v57 = vpop.f32.mrb[39].mxu0 }
 0x689   :  { %v1746_v60 = vpop.f32.mrb[32].mxu1 }
 0x68a   :  { %v10138_v52 = vadd.f32 %v1790_v58, %v1746_v60  ;;  %v1748_v47 = vpop.f32.mrb[33].mxu1 }
 0x68b   :  { %v10140_v21 = vadd.f32 %v1794_v59, %v1748_v47  ;;  %v11453_v47 = vsub.s32 1, %v10058_v1 }
 0x68d   :  { %v8805_v23 = vpop.eup %8804  ;;  %v1752_v24 = vpop.f32.mrb[34].mxu1  ;;  %v10166_v50 = vrot.slane %v10064_v5, %v11453_v47 }
 0x68e   :  { %v2209_v0 = vadd.f32 1.0, %v8805_v23  ;;  %v10142_v9 = vadd.f32 %v1790_v58, %v1752_v24  ;;  %v1754_v15 = vpop.f32.mrb[35].mxu1 }
 0x68f   :  { %v10144_v17 = vadd.f32 %v1794_v59, %v1754_v15  ;;  %v2219_v15 = vadd.f32 %v10154_v46, %v2174_v57 }
 0x690   :  { %8806 = vrcp.f32 %v2209_v0  ;;  %v10160_v0 = vrot.slane %v10064_v5, %v11450_v38 }
 0x691   :  { %v1758_v19 = vpop.f32.mrb[36].mxu1 }
 0x692   :  { %v10146_v31 = vadd.f32 %v1790_v58, %v1758_v19  ;;  %v1760_v35 = vpop.f32.mrb[37].mxu1 }
 0x693   :  { %v10149_v6 = vadd.f32 %v1794_v59, %v1760_v35 }
 0x695   :  { %v1764_v60 = vpop.f32.mrb[38].mxu1 }
 0x696   :  { %v1847_v23 = vadd.f32 %v1790_v58, %v1764_v60  ;;  %v1766_v24 = vpop.f32.mrb[39].mxu1 }
 0x697   :  { %v1848_v60 = vadd.f32 %v1794_v59, %v1766_v24 }
 0x698   :  { %v2212_v19 = vadd.f32 %v2172_v51, %v1847_v23 }
 0x699   :  { %v2018_v35 = vpop.f32.mrb[8].mxu1 }
 0x69a   :  { %v8807_v55 = vpop.eup %8806  ;;  %v7659_v7 = vmul.f32 -1.442695, %v2212_v19  ;;  %v8507_v3 = vadd.f32 %v2018_v35, %v10160_v0  ;;  %v2020_v58 = vpop.f32.mrb[9].mxu1 }
 0x69b   :  { %v2220_v2 = vmul.f32 %v8807_v55, %v2219_v15  ;;  %v8508_v56 = vadd.f32 %v2020_v58, %v10166_v50 }
 0x69c   :  { %8808 = vpow2.f32 %v7659_v7  ;;  %v7656_v53 = vmul.f32 -1.442695, %v8507_v3  ;;  %v10173_v3 = vld [vmem:[%s11427_s12] ss:$0 sm:$0xff] }
 0x69d   :  { %v2221_v38 = vadd.f32 %v2220_v2, %v1848_v60  ;;  %v2024_v57 = vpop.f32.mrb[40].mxu1  ;;  %v7657_v23 = vmul.f32 -1.442695, %v8508_v56  ;;  %v2194_v56 = vadd.f32 %v10173_v3, %v10120_v61 }
 0x69e   :  { %8810 = vpow2.f32 %v7656_v53  ;;  %v2025_v51 = vpop.f32.mrb[41].mxu1 }
 0x69f   :  { %8812 = vpow2.f32 %v7657_v23 }
 0x6a6   :  { %v8809_v1 = vpop.eup %8808 }
 0x6a7   :  { %v2216_v5 = vadd.f32 1.0, %v8809_v1  ;;  %v1803_v1 = vadd.f32 %v10077_v11, %v10070_v8  ;;  %v11473_v8 = vmov 0.0  }
 0x6a8   :  { %v8811_v47 = vpop.eup %8810 }
 0x6a9   :  { %8814 = vrcp.f32 %v2216_v5  ;;  %v2184_v19 = vadd.f32 1.0, %v8811_v47  ;;  %v8813_v35 = vpop.eup %8812 }
 0x6aa   :  { %8816 = vtanh.f32 %v2221_v38  ;;  %v2191_v2 = vadd.f32 1.0, %v8813_v35 }
 0x6ab   :  { %8818 = vrcp.f32 %v2184_v19 }
 0x6ac   :  { %8820 = vrcp.f32 %v2191_v2 }
 0x6b3   :  { %v8815_v7 = vpop.eup %8814 }
 0x6b4   :  { %v8817_v55 = vpop.eup %8816  ;;  %v2223_v59 = vsub.f32 1.0, %v8815_v7  ;;  %v2225_v24 = vmul.f32 0.0, %v8815_v7 }
 0x6b5   :  { %v8819_v53 = vpop.eup %8818 }
 0x6b6   :  { %v2195_v47 = vmul.f32 %v8819_v53, %v2194_v56  ;;  %v2224_v38 = vmul.f32 %v8817_v55, %v2223_v59  ;;  %v8821_v60 = vpop.eup %8820 }
 0x6b7   :  { %v2198_v57 = vsub.f32 1.0, %v8821_v60  ;;  %v2200_v23 = vmul.f32 0.0, %v8821_v60 }
 0x6b8   :  { %v2196_v15 = vadd.f32 %v2195_v47, %v1803_v1  ;;  %v10179_v58 = vadd.f32 %v2225_v24, %v2224_v38 }
 0x6ba   :  { %8822 = vtanh.f32 %v2196_v15  ;;  %2228 = vst.msk [vmem:[#allocation4 + $0x38] sm:$0xff] %vm440_vm1, %v10179_v58 }
 0x6c4   :  { %v8823_v51 = vpop.eup %8822 }
 0x6c5   :  { %v2199_v61 = vmul.f32 %v8823_v51, %v2198_v57 }
 0x6c7   :  { %v10183_v5 = vadd.f32 %v2200_v23, %v2199_v61 }
 0x6c9   :  { %2227 = vst.msk [vmem:[#allocation3] sm:$0xff] %vm440_vm1, %v10183_v5  ;;  %7660 = vmatmul.mubr.msk.f32.vlgmr.msra.gmra.mrb[10].mxu1 %vm440_vm1, %v10183_v5  ;;  %7662 = vmatmul.mubr.msk.f32.vlgmr.msra.gmra.mrb[40].mxu0 %vm440_vm1, %v10183_v5 }
 0x6ca   :  { %8106 = vmatpush1.bf16.msra.mxu0 %v9988_v14  ;;  %2305 = vmatprep.mubr.f32.mxu1 %v11473_v8 }
 0x6cb   :  { %2379 = vmatprep.mubr.f32.mxu0 %v11473_v8  ;;  %8108 = vmatprep.subr.bf16.mxu0 %v10011_v27 }
 0x6cc   :  { %8114 = vmatpush1.bf16.msra.mxu1 %v9978_v63 }
 0x6cd   :  { %7661 = vmatmul.mubr.msk.f32.gmra.mrb[42].mxu1 %vm440_vm1, %v10179_v58  ;;  %7663 = vmatmul.mubr.msk.f32.gmra.mrb[42].mxu0 %vm440_vm1, %v10179_v58 }
 0x6ce   :  { %8110 = vmatpush1.bf16.msra.mxu0 %v10014_v28  ;;  %2449 = vmatprep.mubr.f32.mxu0 %v11473_v8 }
 0x6cf   :  { %8120 = vmatprep.subr.bf16.mxu0 %v9825_v4  ;;  %8116 = vmatprep.subr.bf16.mxu1 %v9980_v49 }
 0x6d0   :  { %8118 = vmatpush1.bf16.msra.mxu1 %v10007_v26  ;;  %2582 = vmatprep.mubr.f32.mxu1 %v11473_v8 }
 0x6d1   :  { %7664 = vmatmul.mubr.msk.f32.vlgmr.msra.gmra.mrb[44].mxu0 %vm440_vm1, %v10183_v5  ;;  %8136 = vmatprep.subr.bf16.mxu1 %v9894_v39 }
 0x6d2   :  { %2453 = vmatprep.mubr.f32.mxu0 %v11473_v8  ;;  %8122 = vmatpush1.bf16.msra.mxu0 %v9860_v20 }
 0x6d3   :  { %8124 = vmatprep.subr.bf16.mxu0 %v9889_v37 }
 0x6d5   :  { %7665 = vmatmul.mubr.msk.f32.gmra.mrb[46].mxu0 %vm440_vm1, %v10179_v58 }
 0x6d6   :  { %8126 = vmatpush1.bf16.msra.mxu0 %v9892_v41  ;;  %2657 = vmatprep.mubr.f32.mxu0 %v11473_v8 }
 0x6d7   :  { %8128 = vmatprep.subr.bf16.mxu0 %v9912_v44 }
 0x79c   :  { %v2301_v11 = vpop.f32.mrb[10].mxu1  ;;  %v2376_v19 = vpop.f32.mrb[40].mxu0 }
 0x79d   :  { %v8509_v35 = vadd.f32 %v2301_v11, %v10160_v0  ;;  %v2303_v2 = vpop.f32.mrb[11].mxu1  ;;  %v2378_v7 = vpop.f32.mrb[41].mxu0 }
 0x79e   :  { %v8510_v56 = vadd.f32 %v2303_v2, %v10166_v50 }
 0x79f   :  { %v7666_v55 = vmul.f32 -1.442695, %v8509_v35 }
 0x7a0   :  { %v2307_v59 = vpop.f32.mrb[42].mxu1  ;;  %v2381_v53 = vpop.f32.mrb[42].mxu0  ;;  %v7667_v24 = vmul.f32 -1.442695, %v8510_v56 }
 0x7a1   :  { %8824 = vpow2.f32 %v7666_v55  ;;  %v2308_v1 = vpop.f32.mrb[43].mxu1  ;;  %v2382_v47 = vpop.f32.mrb[43].mxu0  ;;  %v2477_v53 = vadd.f32 %v10173_v3, %v2376_v19 }
 0x7a2   :  { %v2488_v38 = vadd.f32 %v2382_v47, %v10108_v43 }
 0x7a4   :  { %v7668_v15 = vmul.f32 -1.442695, %v2488_v38  ;;  %v2451_v60 = vpop.f32.mrb[44].mxu0 }
 0x7a5   :  { %v2452_v57 = vpop.f32.mrb[45].mxu0 }
 0x7a6   :  { %8826 = vpow2.f32 %v7668_v15 }
 0x7a7   :  { %8828 = vpow2.f32 %v7667_v24 }
 0x7a8   :  { %v2455_v51 = vpop.f32.mrb[46].mxu0 }
 0x7a9   :  { %v2495_v61 = vadd.f32 %v2455_v51, %v10146_v31  ;;  %v2457_v23 = vpop.f32.mrb[47].mxu0 }
 0x7aa   :  { %v2502_v24 = vadd.f32 %v10154_v46, %v2457_v23 }
 0x7ab   :  { %v8825_v11 = vpop.eup %8824  ;;  %v7669_v35 = vmul.f32 -1.442695, %v2495_v61 }
 0x7ac   :  { %v2467_v2 = vadd.f32 1.0, %v8825_v11 }
 0x7ad   :  { %8830 = vpow2.f32 %v7669_v35 }
 0x7ae   :  { %8832 = vrcp.f32 %v2467_v2 }
 0x7b0   :  { %v8827_v7 = vpop.eup %8826 }
 0x7b1   :  { %v2492_v55 = vadd.f32 1.0, %v8827_v7  ;;  %v8829_v59 = vpop.eup %8828 }
 0x7b2   :  { %v2474_v43 = vadd.f32 1.0, %v8829_v59 }
 0x7b3   :  { %8834 = vrcp.f32 %v2492_v55 }
 0x7b4   :  { %8836 = vrcp.f32 %v2474_v43 }
 0x7b7   :  { %v8831_v56 = vpop.eup %8830 }
 0x7b8   :  { %v8833_v1 = vpop.eup %8832  ;;  %v2499_v38 = vadd.f32 1.0, %v8831_v56 }
 0x7b9   :  { %v2478_v47 = vmul.f32 %v8833_v1, %v2477_v53 }
 0x7bb   :  { %v2479_v31 = vadd.f32 %v2478_v47, %v10080_v13 }
 0x7bd   :  { %v8835_v15 = vpop.eup %8834  ;;  %8838 = vtanh.f32 %v2479_v31 }
 0x7be   :  { %8840 = vrcp.f32 %v2499_v38  ;;  %v2503_v60 = vmul.f32 %v8835_v15, %v2502_v24  ;;  %v8837_v51 = vpop.eup %8836 }
 0x7bf   :  { %v2481_v61 = vsub.f32 1.0, %v8837_v51  ;;  %v2483_v2 = vmul.f32 %v8837_v51, %v10183_v5 }
 0x7c0   :  { %v2504_v57 = vadd.f32 %v2503_v60, %v10149_v6 }
 0x7c2   :  { %8842 = vtanh.f32 %v2504_v57 }
 0x7c7   :  { %v8839_v11 = vpop.eup %8838 }
 0x7c8   :  { %v8841_v35 = vpop.eup %8840  ;;  %v2482_v19 = vmul.f32 %v8839_v11, %v2481_v61 }
 0x7c9   :  { %v2506_v55 = vsub.f32 1.0, %v8841_v35  ;;  %v2508_v5 = vmul.f32 %v8841_v35, %v10179_v58 }
 0x7ca   :  { %v10226_v7 = vadd.f32 %v2483_v2, %v2482_v19 }
 0x7cc   :  { %v8843_v13 = vpop.eup %8842  ;;  %2510 = vst.msk [vmem:[#allocation3 + $0x8] sm:$0xff] %vm440_vm1, %v10226_v7  ;;  %7670 = vmatmul.mubr.msk.f32.vlgmr.msra.gmra.mrb[12].mxu1 %vm440_vm1, %v10226_v7  ;;  %7672 = vmatmul.mubr.msk.f32.vlgmr.msra.gmra.mrb[48].mxu0 %vm440_vm1, %v10226_v7 }
 0x7cd   :  { %8130 = vmatpush1.bf16.msra.mxu0 %v9988_v14  ;;  %2588 = vmatprep.mubr.f32.mxu1 %v11473_v8  ;;  %v2507_v6 = vmul.f32 %v8843_v13, %v2506_v55 }
 0x7ce   :  { %2662 = vmatprep.mubr.f32.mxu0 %v11473_v8  ;;  %8132 = vmatprep.subr.bf16.mxu0 %v10011_v27 }
 0x7cf   :  { %v10239_v23 = vadd.f32 %v2508_v5, %v2507_v6  ;;  %8138 = vmatpush1.bf16.msra.mxu1 %v9978_v63 }
 0x7d0   :  { %8140 = vmatprep.subr.bf16.mxu1 %v9980_v49 }
 0x7d1   :  { %2511 = vst.msk [vmem:[#allocation4 + $0x30] sm:$0xff] %vm440_vm1, %v10239_v23  ;;  %7671 = vmatmul.mubr.msk.f32.gmra.mrb[44].mxu1 %vm440_vm1, %v10239_v23  ;;  %7673 = vmatmul.mubr.msk.f32.gmra.mrb[50].mxu0 %vm440_vm1, %v10239_v23 }
 0x7d2   :  { %8134 = vmatpush1.bf16.msra.mxu0 %v10014_v28  ;;  %2732 = vmatprep.mubr.f32.mxu0 %v11473_v8 }
 0x7d3   :  { %8144 = vmatprep.subr.bf16.mxu0 %v9825_v4  ;;  %8142 = vmatpush1.bf16.msra.mxu1 %v10007_v26 }
 0x7d4   :  { %2865 = vmatprep.mubr.f32.mxu1 %v11473_v8  ;;  %8160 = vmatprep.subr.bf16.mxu1 %v9894_v39 }
 0x7d5   :  { %7674 = vmatmul.mubr.msk.f32.vlgmr.msra.gmra.mrb[52].mxu0 %vm440_vm1, %v10226_v7 }
 0x7d6   :  { %2736 = vmatprep.mubr.f32.mxu0 %v11473_v8  ;;  %8146 = vmatpush1.bf16.msra.mxu0 %v9860_v20 }
 0x7d7   :  { %8148 = vmatprep.subr.bf16.mxu0 %v9889_v37 }
 0x7d9   :  { %7675 = vmatmul.mubr.msk.f32.gmra.mrb[54].mxu0 %vm440_vm1, %v10239_v23 }
 0x7da   :  { %8150 = vmatpush1.bf16.msra.mxu0 %v9892_v41  ;;  %2940 = vmatprep.mubr.f32.mxu0 %v11473_v8 }
 0x7db   :  { %8152 = vmatprep.subr.bf16.mxu0 %v9912_v44 }
 0x89f   :  { %v2584_v58 = vpop.f32.mrb[12].mxu1  ;;  %v2659_v59 = vpop.f32.mrb[48].mxu0 }
 0x8a0   :  { %v8511_v43 = vadd.f32 %v2584_v58, %v10160_v0  ;;  %v2586_v56 = vpop.f32.mrb[13].mxu1  ;;  %v2661_v53 = vpop.f32.mrb[49].mxu0 }
 0x8a1   :  { %v8512_v47 = vadd.f32 %v2586_v56, %v10166_v50  ;;  %v2760_v56 = vadd.f32 %v10173_v3, %v2659_v59 }
 0x8a2   :  { %v7676_v1 = vmul.f32 -1.442695, %v8511_v43 }
 0x8a3   :  { %v7677_v57 = vmul.f32 -1.442695, %v8512_v47 }
 0x8a4   :  { %8844 = vpow2.f32 %v7676_v1  ;;  %v2590_v38 = vpop.f32.mrb[44].mxu1  ;;  %v2664_v31 = vpop.f32.mrb[50].mxu0 }
 0x8a5   :  { %v2591_v24 = vpop.f32.mrb[45].mxu1  ;;  %v2665_v15 = vpop.f32.mrb[51].mxu0 }
 0x8a6   :  { %v2771_v60 = vadd.f32 %v2665_v15, %v10102_v45 }
 0x8a8   :  { %v7678_v51 = vmul.f32 -1.442695, %v2771_v60  ;;  %v2734_v61 = vpop.f32.mrb[52].mxu0 }
 0x8a9   :  { %v2735_v11 = vpop.f32.mrb[53].mxu0 }
 0x8aa   :  { %8846 = vpow2.f32 %v7678_v51 }
 0x8ab   :  { %8848 = vpow2.f32 %v7677_v57 }
 0x8ac   :  { %v2738_v35 = vpop.f32.mrb[54].mxu0 }
 0x8ad   :  { %v2778_v19 = vadd.f32 %v2738_v35, %v10142_v9  ;;  %v2740_v2 = vpop.f32.mrb[55].mxu0 }
 0x8ae   :  { %v8845_v55 = vpop.eup %8844  ;;  %v2785_v31 = vadd.f32 %v10154_v46, %v2740_v2 }
 0x8af   :  { %v2750_v13 = vadd.f32 1.0, %v8845_v55  ;;  %v7679_v6 = vmul.f32 -1.442695, %v2778_v19 }
 0x8b1   :  { %8850 = vrcp.f32 %v2750_v13 }
 0x8b2   :  { %8852 = vpow2.f32 %v7679_v6 }
 0x8b4   :  { %v8847_v5 = vpop.eup %8846 }
 0x8b5   :  { %v8849_v58 = vpop.eup %8848  ;;  %v2775_v43 = vadd.f32 1.0, %v8847_v5 }
 0x8b6   :  { %v2757_v45 = vadd.f32 1.0, %v8849_v58 }
 0x8b7   :  { %8854 = vrcp.f32 %v2775_v43 }
 0x8b8   :  { %8856 = vrcp.f32 %v2757_v45 }
 0x8bb   :  { %v8851_v53 = vpop.eup %8850 }
 0x8bc   :  { %v2761_v1 = vmul.f32 %v8851_v53, %v2760_v56  ;;  %v8853_v47 = vpop.eup %8852 }
 0x8bd   :  { %v2782_v9 = vadd.f32 1.0, %v8853_v47 }
 0x8be   :  { %v2762_v38 = vadd.f32 %v2761_v1, %v10085_v18 }
 0x8c0   :  { %8858 = vtanh.f32 %v2762_v38 }
 0x8c1   :  { %v8855_v24 = vpop.eup %8854  ;;  %8860 = vrcp.f32 %v2782_v9 }
 0x8c2   :  { %v2786_v15 = vmul.f32 %v8855_v24, %v2785_v31  ;;  %v8857_v57 = vpop.eup %8856 }
 0x8c3   :  { %v2764_v51 = vsub.f32 1.0, %v8857_v57  ;;  %v2766_v11 = vmul.f32 %v8857_v57, %v10226_v7 }
 0x8c4   :  { %v2787_v60 = vadd.f32 %v2786_v15, %v10144_v17 }
 0x8c6   :  { %8862 = vtanh.f32 %v2787_v60 }
 0x8ca   :  { %v8859_v61 = vpop.eup %8858 }
 0x8cb   :  { %v2765_v59 = vmul.f32 %v8859_v61, %v2764_v51  ;;  %v8861_v35 = vpop.eup %8860 }
 0x8cc   :  { %v2789_v18 = vsub.f32 1.0, %v8861_v35  ;;  %v2791_v2 = vmul.f32 %v8861_v35, %v10239_v23 }
 0x8cd   :  { %v10274_v19 = vadd.f32 %v2766_v11, %v2765_v59 }
 0x8cf   :  { %2793 = vst.msk [vmem:[#allocation3 + $0x10] sm:$0xff] %vm440_vm1, %v10274_v19  ;;  %7680 = vmatmul.mubr.msk.f32.vlgmr.msra.gmra.mrb[14].mxu1 %vm440_vm1, %v10274_v19  ;;  %7682 = vmatmul.mubr.msk.f32.vlgmr.msra.gmra.mrb[56].mxu0 %vm440_vm1, %v10274_v19 }
 0x8d0   :  { %v8863_v17 = vpop.eup %8862  ;;  %8154 = vmatpush1.bf16.msra.mxu0 %v9988_v14  ;;  %2871 = vmatprep.mubr.f32.mxu1 %v11473_v8 }
 0x8d1   :  { %2945 = vmatprep.mubr.f32.mxu0 %v11473_v8  ;;  %v2790_v7 = vmul.f32 %v8863_v17, %v2789_v18  ;;  %8156 = vmatprep.subr.bf16.mxu0 %v10011_v27 }
 0x8d2   :  { %8162 = vmatpush1.bf16.msra.mxu1 %v9978_v63 }
 0x8d3   :  { %v10288_v55 = vadd.f32 %v2791_v2, %v2790_v7  ;;  %8164 = vmatprep.subr.bf16.mxu1 %v9980_v49 }
 0x8d4   :  { %8158 = vmatpush1.bf16.msra.mxu0 %v10014_v28 }
 0x8d5   :  { %2794 = vst.msk [vmem:[#allocation4 + $0x28] sm:$0xff] %vm440_vm1, %v10288_v55  ;;  %7681 = vmatmul.mubr.msk.f32.gmra.mrb[46].mxu1 %vm440_vm1, %v10288_v55  ;;  %7683 = vmatmul.mubr.msk.f32.gmra.mrb[58].mxu0 %vm440_vm1, %v10288_v55 }
 0x8d6   :  { %3015 = vmatprep.mubr.f32.mxu0 %v11473_v8  ;;  %8168 = vmatprep.subr.bf16.mxu0 %v9825_v4 }
 0x8d7   :  { %8166 = vmatpush1.bf16.msra.mxu1 %v10007_v26  ;;  %3148 = vmatprep.mubr.f32.mxu1 %v11473_v8 }
 0x8d8   :  { %8184 = vmatprep.subr.bf16.mxu1 %v9894_v39 }
 0x8d9   :  { %7684 = vmatmul.mubr.msk.f32.vlgmr.msra.gmra.mrb[60].mxu0 %vm440_vm1, %v10274_v19 }
 0x8da   :  { %3019 = vmatprep.mubr.f32.mxu0 %v11473_v8  ;;  %8170 = vmatpush1.bf16.msra.mxu0 %v9860_v20 }
 0x8db   :  { %8172 = vmatprep.subr.bf16.mxu0 %v9889_v37 }
 0x8dd   :  { %7685 = vmatmul.mubr.msk.f32.gmra.mrb[62].mxu0 %vm440_vm1, %v10288_v55 }
 0x8de   :  { %8174 = vmatpush1.bf16.msra.mxu0 %v9892_v41  ;;  %3223 = vmatprep.mubr.f32.mxu0 %v11473_v8 }
 0x8df   :  { %8176 = vmatprep.subr.bf16.mxu0 %v9912_v44 }
 0x9a2   :  { %v2867_v23 = vpop.f32.mrb[14].mxu1  ;;  %v2942_v13 = vpop.f32.mrb[56].mxu0 }
 0x9a3   :  { %v8513_v6 = vadd.f32 %v2867_v23, %v10160_v0  ;;  %v2869_v5 = vpop.f32.mrb[15].mxu1  ;;  %v2944_v58 = vpop.f32.mrb[57].mxu0 }
 0x9a4   :  { %v8514_v45 = vadd.f32 %v2869_v5, %v10166_v50 }
 0x9a5   :  { %v7686_v43 = vmul.f32 -1.442695, %v8513_v6 }
 0x9a6   :  { %v7687_v1 = vmul.f32 -1.442695, %v8514_v45 }
 0x9a7   :  { %8864 = vpow2.f32 %v7686_v43 }
 0x9a8   :  { %v2873_v56 = vpop.f32.mrb[46].mxu1  ;;  %v2947_v53 = vpop.f32.mrb[58].mxu0  ;;  %8866 = vpow2.f32 %v7687_v1 }
 0x9a9   :  { %v2874_v47 = vpop.f32.mrb[47].mxu1  ;;  %v2948_v38 = vpop.f32.mrb[59].mxu0 }
 0x9aa   :  { %v3054_v9 = vadd.f32 %v2948_v38, %v10097_v36  ;;  %v3043_v36 = vadd.f32 %v10173_v3, %v2942_v13 }
 0x9ac   :  { %v7688_v31 = vmul.f32 -1.442695, %v3054_v9  ;;  %v3017_v24 = vpop.f32.mrb[60].mxu0 }
 0x9ad   :  { %v3018_v15 = vpop.f32.mrb[61].mxu0 }
 0x9ae   :  { %8868 = vpow2.f32 %v7688_v31 }
 0x9b0   :  { %v3021_v60 = vpop.f32.mrb[62].mxu0 }
 0x9b1   :  { %v8865_v57 = vpop.eup %8864  ;;  %v3061_v51 = vadd.f32 %v3021_v60, %v10138_v52  ;;  %v3023_v61 = vpop.f32.mrb[63].mxu0 }
 0x9b2   :  { %v3033_v59 = vadd.f32 1.0, %v8865_v57  ;;  %v8867_v35 = vpop.eup %8866  ;;  %v3068_v52 = vadd.f32 %v10154_v46, %v3023_v61 }
 0x9b3   :  { %v7689_v11 = vmul.f32 -1.442695, %v3061_v51  ;;  %v3040_v7 = vadd.f32 1.0, %v8867_v35 }
 0x9b4   :  { %8870 = vrcp.f32 %v3033_v59 }
 0x9b5   :  { %8872 = vpow2.f32 %v7689_v11 }
 0x9b8   :  { %v8869_v18 = vpop.eup %8868 }
 0x9b9   :  { %v3058_v17 = vadd.f32 1.0, %v8869_v18 }
 0x9bb   :  { %8874 = vrcp.f32 %v3058_v17 }
 0x9bc   :  { %8876 = vrcp.f32 %v3040_v7 }
 0x9be   :  { %v8871_v2 = vpop.eup %8870 }
 0x9bf   :  { %v3044_v23 = vmul.f32 %v8871_v2, %v3043_v36  ;;  %v8873_v6 = vpop.eup %8872 }
 0x9c0   :  { %v3065_v58 = vadd.f32 1.0, %v8873_v6 }
 0x9c1   :  { %v3045_v5 = vadd.f32 %v3044_v23, %v10090_v30 }
 0x9c3   :  { %8878 = vtanh.f32 %v3045_v5 }
 0x9c4   :  { %8880 = vrcp.f32 %v3065_v58 }
 0x9c5   :  { %v8875_v43 = vpop.eup %8874 }
 0x9c6   :  { %v3069_v45 = vmul.f32 %v8875_v43, %v3068_v52  ;;  %v8877_v53 = vpop.eup %8876 }
 0x9c7   :  { %v3047_v1 = vsub.f32 1.0, %v8877_v53  ;;  %v3049_v38 = vmul.f32 %v8877_v53, %v10274_v19 }
 0x9c8   :  { %v3070_v56 = vadd.f32 %v3069_v45, %v10140_v21 }
 0x9ca   :  { %8882 = vtanh.f32 %v3070_v56 }
 0x9cd   :  { %v8879_v47 = vpop.eup %8878 }
 0x9ce   :  { %v3048_v13 = vmul.f32 %v8879_v47, %v3047_v1  ;;  %v8881_v9 = vpop.eup %8880 }
 0x9cf   :  { %v3072_v30 = vsub.f32 1.0, %v8881_v9  ;;  %v3074_v24 = vmul.f32 %v8881_v9, %v10288_v55 }
 0x9d0   :  { %v10322_v31 = vadd.f32 %v3049_v38, %v3048_v13 }
 0x9d2   :  { %3076 = vst.msk [vmem:[#allocation3 + $0x18] sm:$0xff] %vm440_vm1, %v10322_v31  ;;  %7690 = vmatmul.mubr.msk.f32.vlgmr.msra.gmra.mrb[16].mxu1 %vm440_vm1, %v10322_v31  ;;  %7692 = vmatmul.mubr.msk.f32.vlgmr.msra.gmra.mrb[64].mxu0 %vm440_vm1, %v10322_v31 }
 0x9d3   :  { %8178 = vmatpush1.bf16.msra.mxu0 %v9988_v14  ;;  %3154 = vmatprep.mubr.f32.mxu1 %v11473_v8 }
 0x9d4   :  { %v8883_v21 = vpop.eup %8882  ;;  %3228 = vmatprep.mubr.f32.mxu0 %v11473_v8  ;;  %8180 = vmatprep.subr.bf16.mxu0 %v10011_v27 }
 0x9d5   :  { %v3073_v19 = vmul.f32 %v8883_v21, %v3072_v30  ;;  %8186 = vmatpush1.bf16.msra.mxu1 %v9978_v63 }
 0x9d6   :  { %8188 = vmatprep.subr.bf16.mxu1 %v9980_v49 }
 0x9d7   :  { %v10337_v15 = vadd.f32 %v3074_v24, %v3073_v19  ;;  %8182 = vmatpush1.bf16.msra.mxu0 %v10014_v28 }
 0x9d8   :  { %8192 = vmatprep.subr.bf16.mxu0 %v9825_v4 }
 0x9d9   :  { %3077 = vst.msk [vmem:[#allocation4 + $0x20] sm:$0xff] %vm440_vm1, %v10337_v15  ;;  %7691 = vmatmul.mubr.msk.f32.gmra.mrb[48].mxu1 %vm440_vm1, %v10337_v15  ;;  %7693 = vmatmul.mubr.msk.f32.gmra.mrb[66].mxu0 %vm440_vm1, %v10337_v15 }
 0x9da   :  { %3298 = vmatprep.mubr.f32.mxu0 %v11473_v8  ;;  %8190 = vmatpush1.bf16.msra.mxu1 %v10007_v26 }
 0x9db   :  { %3431 = vmatprep.mubr.f32.mxu1 %v11473_v8  ;;  %8208 = vmatprep.subr.bf16.mxu1 %v9894_v39 }
 0x9dd   :  { %7694 = vmatmul.mubr.msk.f32.vlgmr.msra.gmra.mrb[68].mxu0 %vm440_vm1, %v10322_v31 }
 0x9de   :  { %3302 = vmatprep.mubr.f32.mxu0 %v11473_v8  ;;  %8194 = vmatpush1.bf16.msra.mxu0 %v9860_v20 }
 0x9df   :  { %8196 = vmatprep.subr.bf16.mxu0 %v9889_v37 }
 0x9e1   :  { %7695 = vmatmul.mubr.msk.f32.gmra.mrb[70].mxu0 %vm440_vm1, %v10337_v15 }
 0x9e2   :  { %8198 = vmatpush1.bf16.msra.mxu0 %v9892_v41  ;;  %3506 = vmatprep.mubr.f32.mxu0 %v11473_v8 }
 0x9e3   :  { %8200 = vmatprep.subr.bf16.mxu0 %v9912_v44 }
 0xaa5   :  { %v3150_v55 = vpop.f32.mrb[16].mxu1  ;;  %v3225_v60 = vpop.f32.mrb[64].mxu0 }
 0xaa6   :  { %v8515_v57 = vadd.f32 %v3150_v55, %v10160_v0  ;;  %v3152_v51 = vpop.f32.mrb[17].mxu1  ;;  %v3227_v61 = vpop.f32.mrb[65].mxu0 }
 0xaa7   :  { %v8516_v11 = vadd.f32 %v3152_v51, %v10166_v50 }
 0xaa8   :  { %v7696_v59 = vmul.f32 -1.442695, %v8515_v57 }
 0xaa9   :  { %v7697_v17 = vmul.f32 -1.442695, %v8516_v11 }
 0xaaa   :  { %8884 = vpow2.f32 %v7696_v59 }
 0xaab   :  { %8886 = vpow2.f32 %v7697_v17 }
 0xaac   :  { %v3156_v35 = vpop.f32.mrb[48].mxu1  ;;  %v3230_v18 = vpop.f32.mrb[66].mxu0 }
 0xaad   :  { %v3157_v7 = vpop.f32.mrb[49].mxu1  ;;  %v3231_v36 = vpop.f32.mrb[67].mxu0 }
 0xaae   :  { %v3337_v2 = vadd.f32 %v3231_v36, %v10092_v32  ;;  %v3326_v32 = vadd.f32 %v10173_v3, %v3225_v60 }
 0xab0   :  { %v7698_v23 = vmul.f32 -1.442695, %v3337_v2  ;;  %v3300_v6 = vpop.f32.mrb[68].mxu0 }
 0xab1   :  { %v3301_v5 = vpop.f32.mrb[69].mxu0 }
 0xab2   :  { %8888 = vpow2.f32 %v7698_v23 }
 0xab4   :  { %v8885_v58 = vpop.eup %8884  ;;  %v3304_v52 = vpop.f32.mrb[70].mxu0 }
 0xab5   :  { %v3316_v43 = vadd.f32 1.0, %v8885_v58  ;;  %v3344_v45 = vadd.f32 %v3304_v52, %v10134_v42  ;;  %v3306_v56 = vpop.f32.mrb[71].mxu0  ;;  %v8887_v1 = vpop.eup %8886 }
 0xab6   :  { %v3323_v38 = vadd.f32 1.0, %v8887_v1  ;;  %v3351_v42 = vadd.f32 %v10154_v46, %v3306_v56 }
 0xab7   :  { %8890 = vrcp.f32 %v3316_v43  ;;  %v7699_v53 = vmul.f32 -1.442695, %v3344_v45 }
 0xab9   :  { %8892 = vpow2.f32 %v7699_v53 }
 0xabc   :  { %v8889_v47 = vpop.eup %8888 }
 0xabd   :  { %v3341_v13 = vadd.f32 1.0, %v8889_v47 }
 0xabf   :  { %8894 = vrcp.f32 %v3341_v13 }
 0xac0   :  { %8896 = vrcp.f32 %v3323_v38 }
 0xac1   :  { %v8891_v9 = vpop.eup %8890 }
 0xac2   :  { %v3327_v30 = vmul.f32 %v8891_v9, %v3326_v32 }
 0xac3   :  { %v8893_v21 = vpop.eup %8892 }
 0xac4   :  { %v3328_v19 = vadd.f32 %v3327_v30, %v10095_v34  ;;  %v3348_v24 = vadd.f32 1.0, %v8893_v21 }
 0xac6   :  { %8898 = vtanh.f32 %v3328_v19 }
 0xac7   :  { %8900 = vrcp.f32 %v3348_v24 }
 0xac9   :  { %v8895_v55 = vpop.eup %8894 }
 0xaca   :  { %v3352_v57 = vmul.f32 %v8895_v55, %v3351_v42  ;;  %v8897_v51 = vpop.eup %8896 }
 0xacb   :  { %v3330_v59 = vsub.f32 1.0, %v8897_v51  ;;  %v3332_v35 = vmul.f32 %v8897_v51, %v10322_v31 }
 0xacc   :  { %v3353_v61 = vadd.f32 %v3352_v57, %v10136_v48 }
 0xace   :  { %8902 = vtanh.f32 %v3353_v61 }
 0xad0   :  { %v8899_v11 = vpop.eup %8898 }
 0xad1   :  { %v3331_v60 = vmul.f32 %v8899_v11, %v3330_v59  ;;  %v8901_v17 = vpop.eup %8900 }
 0xad2   :  { %v3355_v34 = vsub.f32 1.0, %v8901_v17  ;;  %v3357_v7 = vmul.f32 %v8901_v17, %v10337_v15 }
 0xad3   :  { %v10370_v18 = vadd.f32 %v3332_v35, %v3331_v60 }
 0xad5   :  { %3359 = vst.msk [vmem:[#allocation3 + $0x20] sm:$0xff] %vm440_vm1, %v10370_v18  ;;  %7700 = vmatmul.mubr.msk.f32.vlgmr.msra.gmra.mrb[18].mxu1 %vm440_vm1, %v10370_v18  ;;  %7702 = vmatmul.mubr.msk.f32.vlgmr.msra.gmra.mrb[72].mxu0 %vm440_vm1, %v10370_v18 }
 0xad6   :  { %8202 = vmatpush1.bf16.msra.mxu0 %v9988_v14  ;;  %3437 = vmatprep.mubr.f32.mxu1 %v11473_v8 }
 0xad7   :  { %3511 = vmatprep.mubr.f32.mxu0 %v11473_v8  ;;  %8204 = vmatprep.subr.bf16.mxu0 %v10011_v27 }
 0xad8   :  { %v8903_v48 = vpop.eup %8902  ;;  %8210 = vmatpush1.bf16.msra.mxu1 %v9978_v63 }
 0xad9   :  { %v3356_v31 = vmul.f32 %v8903_v48, %v3355_v34  ;;  %8212 = vmatprep.subr.bf16.mxu1 %v9980_v49 }
 0xada   :  { %8206 = vmatpush1.bf16.msra.mxu0 %v10014_v28 }
 0xadb   :  { %v10386_v36 = vadd.f32 %v3357_v7, %v3356_v31  ;;  %8216 = vmatprep.subr.bf16.mxu0 %v9825_v4 }
 0xadc   :  { %8214 = vmatpush1.bf16.msra.mxu1 %v10007_v26 }
 0xadd   :  { %3360 = vst.msk [vmem:[#allocation4 + $0x18] sm:$0xff] %vm440_vm1, %v10386_v36  ;;  %7701 = vmatmul.mubr.msk.f32.gmra.mrb[50].mxu1 %vm440_vm1, %v10386_v36  ;;  %7703 = vmatmul.mubr.msk.f32.gmra.mrb[74].mxu0 %vm440_vm1, %v10386_v36 }
 0xade   :  { %3581 = vmatprep.mubr.f32.mxu0 %v11473_v8  ;;  %3714 = vmatprep.mubr.f32.mxu1 %v11473_v8 }
 0xadf   :  { %8232 = vmatprep.subr.bf16.mxu1 %v9894_v39 }
 0xae1   :  { %7704 = vmatmul.mubr.msk.f32.vlgmr.msra.gmra.mrb[76].mxu0 %vm440_vm1, %v10370_v18 }
 0xae2   :  { %3585 = vmatprep.mubr.f32.mxu0 %v11473_v8  ;;  %8218 = vmatpush1.bf16.msra.mxu0 %v9860_v20 }
 0xae3   :  { %8220 = vmatprep.subr.bf16.mxu0 %v9889_v37 }
 0xae5   :  { %7705 = vmatmul.mubr.msk.f32.gmra.mrb[78].mxu0 %vm440_vm1, %v10386_v36 }
 0xae6   :  { %8222 = vmatpush1.bf16.msra.mxu0 %v9892_v41  ;;  %3789 = vmatprep.mubr.f32.mxu0 %v11473_v8 }
 0xae7   :  { %8224 = vmatprep.subr.bf16.mxu0 %v9912_v44 }
 0xba8   :  { %v3433_v15 = vpop.f32.mrb[18].mxu1  ;;  %v3508_v39 = vpop.f32.mrb[72].mxu0 }
 0xba9   :  { %v8517_v2 = vadd.f32 %v3433_v15, %v10160_v0  ;;  %v3435_v23 = vpop.f32.mrb[19].mxu1  ;;  %v3510_v6 = vpop.f32.mrb[73].mxu0 }
 0xbaa   :  { %v8518_v58 = vadd.f32 %v3435_v23, %v10166_v50 }
 0xbab   :  { %v7706_v5 = vmul.f32 -1.442695, %v8517_v2 }
 0xbac   :  { %v7707_v52 = vmul.f32 -1.442695, %v8518_v58 }
 0xbad   :  { %8904 = vpow2.f32 %v7706_v5 }
 0xbae   :  { %8906 = vpow2.f32 %v7707_v52 }
 0xbb0   :  { %v3439_v43 = vpop.f32.mrb[50].mxu1  ;;  %v3513_v45 = vpop.f32.mrb[74].mxu0 }
 0xbb1   :  { %v3440_v56 = vpop.f32.mrb[51].mxu1  ;;  %v3514_v53 = vpop.f32.mrb[75].mxu0 }
 0xbb2   :  { %v3620_v1 = vadd.f32 %v3514_v53, %v10087_v22  ;;  %v3609_v22 = vadd.f32 %v10173_v3, %v3508_v39 }
 0xbb4   :  { %v7708_v47 = vmul.f32 -1.442695, %v3620_v1  ;;  %v3583_v13 = vpop.f32.mrb[76].mxu0 }
 0xbb5   :  { %v3584_v38 = vpop.f32.mrb[77].mxu0 }
 0xbb6   :  { %8908 = vpow2.f32 %v7708_v47 }
 0xbb7   :  { %v8905_v32 = vpop.eup %8904 }
 0xbb8   :  { %v3599_v9 = vadd.f32 1.0, %v8905_v32  ;;  %v3587_v30 = vpop.f32.mrb[78].mxu0  ;;  %v8907_v42 = vpop.eup %8906 }
 0xbb9   :  { %v3627_v21 = vadd.f32 %v3587_v30, %v10130_v29  ;;  %v3589_v19 = vpop.f32.mrb[79].mxu0  ;;  %v3606_v57 = vadd.f32 1.0, %v8907_v42 }
 0xbba   :  { %8910 = vrcp.f32 %v3599_v9  ;;  %v3634_v29 = vadd.f32 %v10154_v46, %v3589_v19 }
 0xbbb   :  { %v7709_v24 = vmul.f32 -1.442695, %v3627_v21 }
 0xbbd   :  { %8912 = vpow2.f32 %v7709_v24 }
 0xbc0   :  { %v8909_v55 = vpop.eup %8908 }
 0xbc1   :  { %v3624_v51 = vadd.f32 1.0, %v8909_v55 }
 0xbc3   :  { %8914 = vrcp.f32 %v3624_v51 }
 0xbc4   :  { %v8911_v61 = vpop.eup %8910  ;;  %8916 = vrcp.f32 %v3606_v57 }
 0xbc5   :  { %v3610_v59 = vmul.f32 %v8911_v61, %v3609_v22 }
 0xbc7   :  { %v8913_v11 = vpop.eup %8912  ;;  %v3611_v60 = vadd.f32 %v3610_v59, %v10100_v40 }
 0xbc8   :  { %v3631_v35 = vadd.f32 1.0, %v8913_v11 }
 0xbc9   :  { %8918 = vtanh.f32 %v3611_v60 }
 0xbca   :  { %8920 = vrcp.f32 %v3631_v35 }
 0xbcd   :  { %v8915_v17 = vpop.eup %8914 }
 0xbce   :  { %v3635_v34 = vmul.f32 %v8915_v17, %v3634_v29  ;;  %v8917_v48 = vpop.eup %8916 }
 0xbcf   :  { %v3613_v7 = vsub.f32 1.0, %v8917_v48  ;;  %v3615_v2 = vmul.f32 %v8917_v48, %v10370_v18 }
 0xbd0   :  { %v3636_v31 = vadd.f32 %v3635_v34, %v10132_v33 }
 0xbd2   :  { %8922 = vtanh.f32 %v3636_v31 }
 0xbd3   :  { %v8919_v15 = vpop.eup %8918 }
 0xbd4   :  { %v3614_v39 = vmul.f32 %v8919_v15, %v3613_v7  ;;  %v8921_v6 = vpop.eup %8920 }
 0xbd5   :  { %v3638_v40 = vsub.f32 1.0, %v8921_v6  ;;  %v3640_v18 = vmul.f32 %v8921_v6, %v10386_v36  ;;  %v4256_v6 = vld [vmem:[%s11428_s15 + $0x30] sm:$0xff] }
 0xbd6   :  { %v10418_v23 = vadd.f32 %v3615_v2, %v3614_v39 }
 0xbd8   :  { %3642 = vst.msk [vmem:[#allocation3 + $0x28] sm:$0xff] %vm440_vm1, %v10418_v23  ;;  %7710 = vmatmul.mubr.msk.f32.vlgmr.msra.gmra.mrb[20].mxu1 %vm440_vm1, %v10418_v23  ;;  %7712 = vmatmul.mubr.msk.f32.vlgmr.msra.gmra.mrb[80].mxu0 %vm440_vm1, %v10418_v23 }
 0xbd9   :  { %8226 = vmatpush1.bf16.msra.mxu0 %v9988_v14  ;;  %3720 = vmatprep.mubr.f32.mxu1 %v11473_v8 }
 0xbda   :  { %3794 = vmatprep.mubr.f32.mxu0 %v11473_v8  ;;  %8228 = vmatprep.subr.bf16.mxu0 %v10011_v27 }
 0xbdb   :  { %8234 = vmatpush1.bf16.msra.mxu1 %v9978_v63 }
 0xbdc   :  { %v8923_v33 = vpop.eup %8922  ;;  %8236 = vmatprep.subr.bf16.mxu1 %v9980_v49 }
 0xbdd   :  { %v3639_v46 = vmul.f32 %v8923_v33, %v3638_v40  ;;  %8230 = vmatpush1.bf16.msra.mxu0 %v10014_v28  ;;  %v4253_v40 = vld [vmem:[%s11428_s15 + $0x18] sm:$0xff]  ;;  %v4259_v33 = vld [vmem:[%s11428_s15 + $0x48] sm:$0xff] }
 0xbde   :  { %8240 = vmatprep.subr.bf16.mxu0 %v9825_v4 }
 0xbdf   :  { %v10435_v5 = vadd.f32 %v3640_v18, %v3639_v46  ;;  %8238 = vmatpush1.bf16.msra.mxu1 %v10007_v26  ;;  %v8263_v18 = vpack.c.bf16 %v4259_v33, %v4253_v40 }
 0xbe0   :  { %8248 = vmatprep.subr.bf16.mxu1 %v9912_v44 }
 0xbe1   :  { %3643 = vst.msk [vmem:[#allocation4 + $0x10] sm:$0xff] %vm440_vm1, %v10435_v5  ;;  %7711 = vmatmul.mubr.msk.f32.gmra.mrb[52].mxu1 %vm440_vm1, %v10435_v5  ;;  %7713 = vmatmul.mubr.msk.f32.gmra.mrb[82].mxu0 %vm440_vm1, %v10435_v5 }
 0xbe2   :  { %3864 = vmatprep.mubr.f32.mxu0 %v11473_v8  ;;  %3997 = vmatprep.mubr.f32.mxu1 %v11473_v8 }
 0xbe5   :  { %7714 = vmatmul.mubr.msk.f32.vlgmr.msra.gmra.mrb[84].mxu0 %vm440_vm1, %v10418_v23 }
 0xbe6   :  { %3868 = vmatprep.mubr.f32.mxu0 %v11473_v8  ;;  %8242 = vmatpush1.bf16.msra.mxu0 %v9860_v20 }
 0xbe7   :  { %8244 = vmatprep.subr.bf16.mxu0 %v9889_v37 }
 0xbe9   :  { %7715 = vmatmul.mubr.msk.f32.gmra.mrb[86].mxu0 %vm440_vm1, %v10435_v5 }
 0xbea   :  { %8246 = vmatpush1.bf16.msra.mxu0 %v9892_v41  ;;  %4072 = vmatprep.mubr.f32.mxu0 %v11473_v8 }
 0xcab   :  { %v3716_v4 = vpop.f32.mrb[20].mxu1  ;;  %v3791_v44 = vpop.f32.mrb[80].mxu0 }
 0xcac   :  { %v8519_v63 = vadd.f32 %v3716_v4, %v10160_v0  ;;  %v3718_v49 = vpop.f32.mrb[21].mxu1  ;;  %v3793_v26 = vpop.f32.mrb[81].mxu0  ;;  %v4258_v4 = vld [vmem:[%s11428_s15 + $0x40] sm:$0xff] }
 0xcad   :  { %v8520_v58 = vadd.f32 %v3718_v49, %v10166_v50  ;;  %v4269_v49 = vld [vmem:[%s11428_s15 + $0x98] sm:$0xff]  ;;  %v4262_v26 = vld [vmem:[%s11428_s15 + $0x60] sm:$0xff] }
 0xcae   :  { %v7716_v36 = vmul.f32 -1.442695, %v8519_v63 }
 0xcaf   :  { %v7717_v20 = vmul.f32 -1.442695, %v8520_v58 }
 0xcb0   :  { %8924 = vpow2.f32 %v7716_v36  ;;  %v4268_v36 = vld [vmem:[%s11428_s15 + $0x90] sm:$0xff] }
 0xcb1   :  { %8926 = vpow2.f32 %v7717_v20  ;;  %v8261_v20 = vpack.c.bf16 %v4268_v36, %v4262_v26 }
 0xcb4   :  { %v3722_v52 = vpop.f32.mrb[52].mxu1  ;;  %v3796_v37 = vpop.f32.mrb[82].mxu0 }
 0xcb5   :  { %v3723_v43 = vpop.f32.mrb[53].mxu1  ;;  %v3797_v45 = vpop.f32.mrb[83].mxu0  ;;  %v4265_v52 = vld [vmem:[%s11428_s15 + $0x78] sm:$0xff]  ;;  %v4271_v37 = vld [vmem:[%s11428_s15 + $0xa8] sm:$0xff] }
 0xcb6   :  { %v3903_v56 = vadd.f32 %v3797_v45, %v10082_v16  ;;  %v3892_v16 = vadd.f32 %v10173_v3, %v3791_v44  ;;  %v4263_v44 = vld [vmem:[%s11428_s15 + $0x68] sm:$0xff]  ;;  %v4264_v43 = vld [vmem:[%s11428_s15 + $0x70] sm:$0xff]  ;;  %v8267_v45 = vpack.c.bf16 %v4271_v37, %v4265_v52 }
 0xcb7   :  { %v8259_v58 = vpack.c.bf16 %v4269_v49, %v4263_v44 }
 0xcb8   :  { %v7718_v41 = vmul.f32 -1.442695, %v3903_v56  ;;  %v3866_v53 = vpop.f32.mrb[84].mxu0  ;;  %v4270_v56 = vld [vmem:[%s11428_s15 + $0xa0] sm:$0xff] }
 0xcb9   :  { %v3867_v1 = vpop.f32.mrb[85].mxu0  ;;  %v4261_v53 = vld [vmem:[%s11428_s15 + $0x58] sm:$0xff] }
 0xcba   :  { %v8925_v47 = vpop.eup %8924  ;;  %8928 = vpow2.f32 %v7718_v41  ;;  %v4255_v41 = vld [vmem:[%s11428_s15 + $0x28] sm:$0xff]  ;;  %v8269_v1 = vpack.c.bf16 %v4270_v56, %v4264_v43  ;;  %v4254_v43 = vld [vmem:[%s11428_s15 + $0x20] sm:$0xff]  ;;  %v4220_v56 = vld [vmem:[%s11429_s14 + $0x10] sm:$0xff] }
 0xcbb   :  { %v3882_v13 = vadd.f32 1.0, %v8925_v47  ;;  %v8927_v21 = vpop.eup %8926  ;;  %v8271_v47 = vpack.c.bf16 %v4261_v53, %v4255_v41  ;;  %v4226_v41 = vld [vmem:[%s11429_s14 + $0x40] sm:$0xff] }
 0xcbc   :  { %v3870_v38 = vpop.f32.mrb[86].mxu0  ;;  %v3889_v24 = vadd.f32 1.0, %v8927_v21 }
 0xcbd   :  { %8930 = vrcp.f32 %v3882_v13  ;;  %v3910_v32 = vadd.f32 %v3870_v38, %v10126_v25  ;;  %v3872_v9 = vpop.f32.mrb[87].mxu0  ;;  %v10465_v25 = vld [vmem:[%s11426_s13] ss:$0 sm:$0xff]  ;;  %v4221_v13 = vld [vmem:[%s11429_s14 + $0x18] sm:$0xff]  ;;  %v4227_v38 = vld [vmem:[%s11429_s14 + $0x48] sm:$0xff] }
 0xcbe   :  { %v3917_v59 = vadd.f32 %v10465_v25, %v3872_v9 }
 0xcbf   :  { %v7719_v30 = vmul.f32 -1.442695, %v3910_v32  ;;  %v8287_v32 = vpack.c.bf16 %v4227_v38, %v4221_v13  ;;  %v4272_v13 = vld [vmem:[%s11428_s15 + $0xb0] sm:$0xff]  ;;  %v4233_v38 = vld [vmem:[%s11429_s14 + $0x78] sm:$0xff] }
 0xcc1   :  { %8932 = vpow2.f32 %v7719_v30 }
 0xcc4   :  { %v8929_v19 = vpop.eup %8928 }
 0xcc5   :  { %v3907_v42 = vadd.f32 1.0, %v8929_v19 }
 0xcc7   :  { %v8931_v55 = vpop.eup %8930  ;;  %8934 = vrcp.f32 %v3907_v42 }
 0xcc8   :  { %v3893_v57 = vmul.f32 %v8931_v55, %v3892_v16  ;;  %8936 = vrcp.f32 %v3889_v24 }
 0xcca   :  { %v3894_v51 = vadd.f32 %v3893_v57, %v10105_v54 }
 0xccb   :  { %v8933_v22 = vpop.eup %8932 }
 0xccc   :  { %8938 = vtanh.f32 %v3894_v51  ;;  %v3914_v61 = vadd.f32 1.0, %v8933_v22 }
 0xcce   :  { %8940 = vrcp.f32 %v3914_v61 }
 0xcd1   :  { %v8935_v11 = vpop.eup %8934 }
 0xcd2   :  { %v8937_v60 = vpop.eup %8936  ;;  %v3918_v3 = vmul.f32 %v8935_v11, %v3917_v59 }
 0xcd3   :  { %v3896_v29 = vsub.f32 1.0, %v8937_v60  ;;  %v3898_v34 = vmul.f32 %v8937_v60, %v10418_v23 }
 0xcd4   :  { %v3919_v35 = vadd.f32 %v3918_v3, %v10128_v12 }
 0xcd6   :  { %v8939_v17 = vpop.eup %8938  ;;  %8942 = vtanh.f32 %v3919_v35 }
 0xcd7   :  { %v3897_v54 = vmul.f32 %v8939_v17, %v3896_v29 }
 0xcd8   :  { %v8941_v31 = vpop.eup %8940 }
 0xcd9   :  { %v10470_v48 = vadd.f32 %v3898_v34, %v3897_v54  ;;  %v3921_v12 = vsub.f32 1.0, %v8941_v31  ;;  %v3923_v39 = vmul.f32 %v8941_v31, %v10435_v5  ;;  %v4252_v5 = vld [vmem:[%s11428_s15 + $0x10] sm:$0xff] }
 0xcda   :  { %v8265_v63 = vpack.c.bf16 %v4258_v4, %v4252_v5  ;;  %v11475_v5 = vld [vmem:[#allocation7_spill] sm:$0xff] }
 0xcdb   :  { %3925 = vst.msk [vmem:[#allocation3 + $0x30] sm:$0xff] %vm440_vm1, %v10470_v48  ;;  %7720 = vmatmul.mubr.msk.f32.vlgmr.msra.gmra.mrb[22].mxu1 %vm440_vm1, %v10470_v48  ;;  %7722 = vmatmul.mubr.msk.f32.vlgmr.msra.gmra.mrb[88].mxu0 %vm440_vm1, %v10470_v48 }
 0xcdc   :  { %8250 = vmatpush1.bf16.msra.mxu1 %v9988_v14  ;;  %4003 = vmatprep.mubr.f32.mxu1 %v11473_v8  ;;  %v4251_v14 = vld [vmem:[%s11428_s15 + $0x8] sm:$0xff] }
 0xcdd   :  { %4077 = vmatprep.mubr.f32.mxu0 %v11473_v8  ;;  %8252 = vmatprep.subr.bf16.mxu1 %v10011_v27  ;;  %v4257_v27 = vld [vmem:[%s11428_s15 + $0x38] sm:$0xff] }
 0xcde   :  { %v8255_v23 = vpack.c.bf16 %v4257_v27, %v4251_v14  ;;  %v11474_v27 = vld [vmem:[#allocation6_spill] sm:$0xff] }
 0xce0   :  { %v8943_v7 = vpop.eup %8942  ;;  %8254 = vmatpush1.bf16.msra.mxu1 %v10014_v28  ;;  %v4250_v28 = vld [vmem:[%s11428_s15] sm:$0xff]  ;;  %8256 = vmatprep.subr.bf16.mxu0 %v8255_v23 }
 0xce1   :  { %v3922_v15 = vmul.f32 %v8943_v7, %v3921_v12  ;;  %v8257_v46 = vpack.c.bf16 %v4256_v6, %v4250_v28  ;;  %8264 = vmatprep.subr.bf16.mxu1 %v8263_v18 }
 0xce3   :  { %v10484_v2 = vadd.f32 %v3923_v39, %v3922_v15  ;;  %8258 = vmatpush1.bf16.msra.mxu0 %v8257_v46 }
 0xce4   :  { %8260 = vmatprep.subr.bf16.mxu0 %v8259_v58 }
 0xce5   :  { %3926 = vst.msk [vmem:[#allocation4 + $0x8] sm:$0xff] %vm440_vm1, %v10484_v2  ;;  %7721 = vmatmul.mubr.msk.f32.gmra.mrb[54].mxu1 %vm440_vm1, %v10484_v2  ;;  %7723 = vmatmul.mubr.msk.f32.gmra.mrb[90].mxu0 %vm440_vm1, %v10484_v2 }
 0xce6   :  { %4147 = vmatprep.mubr.f32.mxu1 %v11473_v8  ;;  %4362 = vmatprep.mubr.f32.mxu0 %v11473_v8 }
 0xce7   :  { %8262 = vmatpush1.bf16.msra.mxu0 %v8261_v20 }
 0xce8   :  { %8272 = vmatprep.subr.bf16.mxu0 %v8271_v47  ;;  %v4266_v47 = vld [vmem:[%s11428_s15 + $0x80] sm:$0xff] }
 0xce9   :  { %7724 = vmatmul.mubr.msk.f32.vlgmr.msra.gmra.mrb[56].mxu1 %vm440_vm1, %v10470_v48 }
 0xcea   :  { %4151 = vmatprep.mubr.f32.mxu1 %v11473_v8  ;;  %8266 = vmatpush1.bf16.msra.mxu1 %v8265_v63 }
 0xceb   :  { %8268 = vmatprep.subr.bf16.mxu1 %v8267_v45  ;;  %v4267_v45 = vld [vmem:[%s11428_s15 + $0x88] sm:$0xff] }
 0xced   :  { %7725 = vmatmul.mubr.msk.f32.gmra.mrb[58].mxu1 %vm440_vm1, %v10484_v2 }
 0xcee   :  { %4475 = vmatprep.mubr.f32.mxu1 %v11473_v8  ;;  %8270 = vmatpush1.bf16.msra.mxu1 %v8269_v1 }
 0xcef   :  { %8288 = vmatprep.subr.bf16.mxu1 %v8287_v32 }
 0xdae   :  { %v3999_v9 = vpop.f32.mrb[22].mxu1  ;;  %v4074_v30 = vpop.f32.mrb[88].mxu0 }
 0xdaf   :  { %v8521_v21 = vadd.f32 %v3999_v9, %v10160_v0  ;;  %v4001_v19 = vpop.f32.mrb[23].mxu1  ;;  %v4076_v24 = vpop.f32.mrb[89].mxu0  ;;  %v8289_v9 = vpack.c.bf16 %v4226_v41, %v4220_v56  ;;  %v4241_v56 = vld [vmem:[%s11429_s14 + $0xb8] sm:$0xff]  ;;  %v5132_v41 = vld [vmem:[%s11430_s17 + $0x20] sm:$0xff] }
 0xdb0   :  { %v8522_v16 = vadd.f32 %v4001_v19, %v10166_v50  ;;  %v4238_v19 = vld [vmem:[%s11429_s14 + $0xa0] sm:$0xff]  ;;  %v4219_v24 = vld [vmem:[%s11429_s14 + $0x8] sm:$0xff] }
 0xdb1   :  { %v7726_v42 = vmul.f32 -1.442695, %v8521_v21  ;;  %v4232_v21 = vld [vmem:[%s11429_s14 + $0x70] sm:$0xff] }
 0xdb2   :  { %v7727_v55 = vmul.f32 -1.442695, %v8522_v16  ;;  %v8277_v16 = vpack.c.bf16 %v4272_v13, %v4266_v47  ;;  %v4234_v13 = vld [vmem:[%s11429_s14 + $0x80] sm:$0xff] }
 0xdb3   :  { %8944 = vpow2.f32 %v7726_v42  ;;  %v4225_v42 = vld [vmem:[%s11429_s14 + $0x38] sm:$0xff] }
 0xdb4   :  { %8946 = vpow2.f32 %v7727_v55 }
 0xdb8   :  { %v4005_v57 = vpop.f32.mrb[54].mxu1  ;;  %v4079_v51 = vpop.f32.mrb[90].mxu0 }
 0xdb9   :  { %v4006_v22 = vpop.f32.mrb[55].mxu1  ;;  %v4080_v61 = vpop.f32.mrb[91].mxu0  ;;  %v10624_v57 = vld [vmem:[#allocation4 + $0x8] sm:$0xff]  ;;  %v8293_v51 = vpack.c.bf16 %v4238_v19, %v4232_v21  ;;  %v5144_v21 = vld [vmem:[%s11430_s17 + $0x80] sm:$0xff]  ;;  %v5150_v19 = vld [vmem:[%s11430_s17 + $0xb0] sm:$0xff] }
 0xdba   :  { %v4186_v59 = vadd.f32 %v4080_v61, %v10072_v10  ;;  %v9133_v10 = vld [vmem:[%s11427_s12] ss:$0 sm:$0xff]  ;;  %v8279_v22 = vpack.c.bf16 %v4225_v42, %v4219_v24  ;;  %v5131_v61 = vld [vmem:[%s11430_s17 + $0x18] sm:$0xff]  ;;  %v5129_v24 = vld [vmem:[%s11430_s17 + $0x8] sm:$0xff] }
 0xdbb   :  { %v4175_v7 = vadd.f32 %v9133_v10, %v4074_v30  ;;  %v4239_v30 = vld [vmem:[%s11429_s14 + $0xa8] sm:$0xff]  ;;  %v5136_v10 = vld [vmem:[%s11430_s17 + $0x40] sm:$0xff]  ;;  %v5135_v42 = vld [vmem:[%s11430_s17 + $0x38] sm:$0xff] }
 0xdbc   :  { %v7728_v11 = vmul.f32 -1.442695, %v4186_v59  ;;  %v4149_v60 = vpop.f32.mrb[56].mxu1  ;;  %v8291_v55 = vpack.c.bf16 %v4239_v30, %v4233_v38  ;;  %v5137_v59 = vld [vmem:[%s11430_s17 + $0x48] sm:$0xff]  ;;  %v4240_v38 = vld [vmem:[%s11429_s14 + $0xb0] sm:$0xff]  ;;  %v5151_v30 = vld [vmem:[%s11430_s17 + $0xb8] sm:$0xff] }
 0xdbd   :  { %v8945_v3 = vpop.eup %8944  ;;  %v4150_v35 = vpop.f32.mrb[57].mxu1  ;;  %v10640_v60 = vld [vmem:[#allocation4 + $0x10] sm:$0xff] }
 0xdbe   :  { %v4165_v29 = vadd.f32 1.0, %v8945_v3  ;;  %8948 = vpow2.f32 %v7728_v11  ;;  %v8947_v54 = vpop.eup %8946  ;;  %v10638_v11 = vpack.c.bf16 %v5137_v59, %v5131_v61  ;;  %v10649_v3 = vld [vmem:[#allocation4 + $0x18] sm:$0xff]  ;;  %v10657_v35 = vld [vmem:[#allocation4 + $0x20] sm:$0xff]  ;;  %v5134_v61 = vld [vmem:[%s11430_s17 + $0x30] sm:$0xff] }
 0xdbf   :  { %v4172_v31 = vadd.f32 1.0, %v8947_v54  ;;  %v10687_v54 = vld [vmem:[#allocation4 + $0x38] sm:$0xff]  ;;  %v5141_v59 = vld [vmem:[%s11430_s17 + $0x68] sm:$0xff] }
 0xdc0   :  { %8950 = vrcp.f32 %v4165_v29  ;;  %v4153_v0 = vpop.f32.mrb[58].mxu1  ;;  %v10665_v29 = vld [vmem:[#allocation4 + $0x28] sm:$0xff] }
 0xdc1   :  { %v4193_v17 = vadd.f32 %v4153_v0, %v10122_v62  ;;  %v4155_v50 = vpop.f32.mrb[59].mxu1  ;;  %v10673_v0 = vld [vmem:[#allocation4 + $0x30] sm:$0xff] }
 0xdc2   :  { %v4200_v40 = vadd.f32 %v10465_v25, %v4155_v50  ;;  %v4224_v50 = vld [vmem:[%s11429_s14 + $0x30] sm:$0xff] }
 0xdc3   :  { %v7729_v34 = vmul.f32 -1.442695, %v4193_v17  ;;  %v4218_v17 = vld [vmem:[%s11429_s14] sm:$0xff] }
 0xdc5   :  { %8952 = vpow2.f32 %v7729_v34  ;;  %v4231_v34 = vld [vmem:[%s11429_s14 + $0x68] sm:$0xff] }
 0xdc6   :  { %8954 = vrcp.f32 %v4172_v31  ;;  %v4237_v31 = vld [vmem:[%s11429_s14 + $0x98] sm:$0xff] }
 0xdc8   :  { %v8949_v12 = vpop.eup %8948 }
 0xdc9   :  { %v4190_v15 = vadd.f32 1.0, %v8949_v12  ;;  %v5130_v12 = vld [vmem:[%s11430_s17 + $0x10] sm:$0xff] }
 0xdca   :  { %v8951_v39 = vpop.eup %8950 }
 0xdcb   :  { %v4176_v14 = vmul.f32 %v8951_v39, %v4175_v7  ;;  %8956 = vrcp.f32 %v4190_v15  ;;  %v8281_v7 = vpack.c.bf16 %v4224_v50, %v4218_v17  ;;  %v10707_v15 = vld [vmem:[#allocation3] sm:$0xff]  ;;  %v8283_v39 = vpack.c.bf16 %v4237_v31, %v4231_v34 }
 0xdcc   :  { %v10967_v50 = vld [vmem:[%s11431_s16] sm:$0x3f] }
 0xdcd   :  { %v4177_v28 = vadd.f32 %v4176_v14, %v11474_v27  ;;  %v4230_v14 = vld [vmem:[%s11429_s14 + $0x60] sm:$0xff]  ;;  %v4236_v27 = vld [vmem:[%s11429_s14 + $0x90] sm:$0xff] }
 0xdcf   :  { %v8953_v23 = vpop.eup %8952  ;;  %8958 = vtanh.f32 %v4177_v28  ;;  %v10715_v28 = vpack.c.bf16 %v5136_v10, %v5130_v12 }
 0xdd0   :  { %v4197_v62 = vadd.f32 1.0, %v8953_v23  ;;  %v8955_v6 = vpop.eup %8954  ;;  %v5143_v23 = vld [vmem:[%s11430_s17 + $0x78] sm:$0xff] }
 0xdd1   :  { %v4179_v18 = vsub.f32 1.0, %v8955_v6  ;;  %v4181_v49 = vmul.f32 %v8955_v6, %v10470_v48  ;;  %v4260_v48 = vld [vmem:[%s11428_s15 + $0x50] sm:$0xff] }
 0xdd2   :  { %8960 = vrcp.f32 %v4197_v62  ;;  %v8273_v53 = vpack.c.bf16 %v4260_v48, %v4254_v43  ;;  %v5149_v62 = vld [vmem:[%s11430_s17 + $0xa8] sm:$0xff]  ;;  %v5142_v6 = vld [vmem:[%s11430_s17 + $0x70] sm:$0xff]  ;;  %v4222_v43 = vld [vmem:[%s11429_s14 + $0x20] sm:$0xff] }
 0xdd3   :  { %v4228_v48 = vld [vmem:[%s11429_s14 + $0x50] sm:$0xff] }
 0xdd5   :  { %v8957_v33 = vpop.eup %8956 }
 0xdd6   :  { %v4201_v46 = vmul.f32 %v8957_v33, %v4200_v40  ;;  %v5148_v40 = vld [vmem:[%s11430_s17 + $0xa0] sm:$0xff]  ;;  %v4223_v33 = vld [vmem:[%s11429_s14 + $0x28] sm:$0xff] }
 0xdd8   :  { %v4202_v4 = vadd.f32 %v4201_v46, %v11475_v5  ;;  %v4229_v46 = vld [vmem:[%s11429_s14 + $0x58] sm:$0xff]  ;;  %v10741_v5 = vpack.c.bf16 %v5149_v62, %v5143_v23 }
 0xdd9   :  { %v8959_v44 = vpop.eup %8958 }
 0xdda   :  { %v4180_v63 = vmul.f32 %v8959_v44, %v4179_v18  ;;  %8962 = vtanh.f32 %v4202_v4  ;;  %v8285_v18 = vpack.c.bf16 %v4236_v27, %v4230_v14  ;;  %v10743_v4 = vld [vmem:[#allocation3 + $0x8] sm:$0xff]  ;;  %v10746_v44 = vpack.c.bf16 %v5148_v40, %v5142_v6 }
 0xddc   :  { %v4182_v26 = vadd.f32 %v4181_v49, %v4180_v63  ;;  %v8961_v36 = vpop.eup %8960  ;;  %v8295_v63 = vpack.c.bf16 %v4229_v46, %v4223_v33  ;;  %v5133_v49 = vld [vmem:[%s11430_s17 + $0x28] sm:$0xff] }
 0xddd   :  { %v4204_v58 = vsub.f32 1.0, %v8961_v36  ;;  %v4206_v52 = vmul.f32 %v8961_v36, %v10484_v2  ;;  %v4273_v2 = vld [vmem:[%s11428_s15 + $0xb8] sm:$0xff] }
 0xdde   :  { %4208 = vst.msk [vmem:[#allocation3 + $0x38] sm:$0xff] %vm440_vm1, %v4182_v26  ;;  %v8275_v1 = vpack.c.bf16 %v4273_v2, %v4267_v45  ;;  %v5139_v26 = vld [vmem:[%s11430_s17 + $0x58] sm:$0xff]  ;;  %v4235_v2 = vld [vmem:[%s11429_s14 + $0x88] sm:$0xff] }
 0xddf   :  { %v10761_v36 = vpack.c.bf16 %v5139_v26, %v5133_v49  ;;  %v8299_v47 = vpack.c.bf16 %v4241_v56, %v4235_v2 }
 0xde4   :  { %v8963_v20 = vpop.eup %8962 }
 0xde5   :  { %v4205_v25 = vmul.f32 %v8963_v20, %v4204_v58  ;;  %v10763_v58 = vld [vmem:[#allocation3 + $0x10] sm:$0xff]  ;;  %v10773_v20 = vld [vmem:[#allocation3 + $0x18] sm:$0xff] }
 0xde6   :  { %v10811_v45 = vld [vmem:[#allocation3 + $0x38] sm:$0xff] }
 0xde7   :  { %v4207_v37 = vadd.f32 %v4206_v52, %v4205_v25  ;;  %v10781_v52 = vld [vmem:[#allocation3 + $0x20] sm:$0xff]  ;;  %v10789_v25 = vld [vmem:[#allocation3 + $0x28] sm:$0xff] }
 0xde9   :  { %4209 = vst.msk [vmem:[#allocation4] sm:$0xff] %vm440_vm1, %v4207_v37  ;;  %v10797_v37 = vld [vmem:[#allocation3 + $0x30] sm:$0xff] }
 0xdf0   :  { %v10601_v32 = vld [vmem:[#allocation4] sm:$0xff] }
 0xdf1   :  { %7730 = vmatmul.mubr.msk.f32.vlgmr.msra.gmra.mrb[92].mxu0 %vm440_vm1, %v10601_v32  ;;  %7738 = vmatmul.mubr.msk.f32.vlgmr.msra.gmra.mrb[60].mxu1 %vm440_vm1, %v10601_v32 }
 0xdf2   :  { %8274 = vmatpush1.bf16.msra.mxu0 %v8273_v53  ;;  %4368 = vmatprep.mubr.f32.mxu0 %v11473_v8  ;;  %v5138_v53 = vld [vmem:[%s11430_s17 + $0x50] sm:$0xff] }
 0xdf3   :  { %4481 = vmatprep.mubr.f32.mxu1 %v11473_v8  ;;  %8276 = vmatprep.subr.bf16.mxu0 %v8275_v1  ;;  %v8297_v1 = vpack.c.bf16 %v4228_v48, %v4222_v43 }
 0xdf4   :  { %8290 = vmatpush1.bf16.msra.mxu1 %v8289_v9  ;;  %v5145_v9 = vld [vmem:[%s11430_s17 + $0x88] sm:$0xff] }
 0xdf5   :  { %7731 = vmatmul.mubr.msk.f32.gmra.mrb[94].mxu0 %vm440_vm1, %v10624_v57  ;;  %7739 = vmatmul.mubr.msk.f32.gmra.mrb[62].mxu1 %vm440_vm1, %v10624_v57 }
 0xdf6   :  { %4374 = vmatprep.mubr.f32.mxu0 %v11473_v8  ;;  %4487 = vmatprep.mubr.f32.mxu1 %v11473_v8 }
 0xdf7   :  { %8278 = vmatpush1.bf16.msra.mxu0 %v8277_v16  ;;  %8292 = vmatprep.subr.bf16.mxu1 %v8291_v55  ;;  %v8301_v16 = vpack.c.bf16 %v4240_v38, %v4234_v13  ;;  %v10862_v55 = vpack.c.bf16 %v5151_v30, %v5145_v9 }
 0xdf8   :  { %8294 = vmatpush1.bf16.msra.mxu1 %v8293_v51  ;;  %8280 = vmatprep.subr.bf16.mxu0 %v8279_v22  ;;  %v10867_v51 = vpack.c.bf16 %v5135_v42, %v5129_v24  ;;  %v5128_v22 = vld [vmem:[%s11430_s17] sm:$0xff] }
 0xdf9   :  { %7732 = vmatmul.mubr.msk.f32.gmra.mrb[96].mxu0 %vm440_vm1, %v10640_v60  ;;  %7740 = vmatmul.mubr.msk.f32.gmra.mrb[64].mxu1 %vm440_vm1, %v10640_v60 }
 0xdfa   :  { %4380 = vmatprep.mubr.f32.mxu0 %v11473_v8  ;;  %4493 = vmatprep.mubr.f32.mxu1 %v11473_v8 }
 0xdfb   :  { %8312 = vmatprep.subr.bf16.mxu1 %v10638_v11 }
 0xdfd   :  { %7733 = vmatmul.mubr.msk.f32.gmra.mrb[98].mxu0 %vm440_vm1, %v10649_v3  ;;  %7741 = vmatmul.mubr.msk.f32.gmra.mrb[66].mxu1 %vm440_vm1, %v10649_v3 }
 0xdfe   :  { %4386 = vmatprep.mubr.f32.mxu0 %v11473_v8  ;;  %4499 = vmatprep.mubr.f32.mxu1 %v11473_v8 }
 0xe01   :  { %7734 = vmatmul.mubr.msk.f32.gmra.mrb[100].mxu0 %vm440_vm1, %v10657_v35  ;;  %7742 = vmatmul.mubr.msk.f32.gmra.mrb[68].mxu1 %vm440_vm1, %v10657_v35 }
 0xe02   :  { %4392 = vmatprep.mubr.f32.mxu0 %v11473_v8  ;;  %4505 = vmatprep.mubr.f32.mxu1 %v11473_v8 }
 0xe05   :  { %7735 = vmatmul.mubr.msk.f32.gmra.mrb[102].mxu0 %vm440_vm1, %v10665_v29  ;;  %7743 = vmatmul.mubr.msk.f32.gmra.mrb[70].mxu1 %vm440_vm1, %v10665_v29 }
 0xe06   :  { %4398 = vmatprep.mubr.f32.mxu0 %v11473_v8  ;;  %4511 = vmatprep.mubr.f32.mxu1 %v11473_v8 }
 0xe09   :  { %7736 = vmatmul.mubr.msk.f32.gmra.mrb[104].mxu0 %vm440_vm1, %v10673_v0  ;;  %7744 = vmatmul.mubr.msk.f32.gmra.mrb[72].mxu1 %vm440_vm1, %v10673_v0 }
 0xe0a   :  { %4404 = vmatprep.mubr.f32.mxu0 %v11473_v8  ;;  %4517 = vmatprep.mubr.f32.mxu1 %v11473_v8 }
 0xe0d   :  { %7737 = vmatmul.mubr.msk.f32.gmra.mrb[106].mxu0 %vm440_vm1, %v10687_v54  ;;  %7745 = vmatmul.mubr.msk.f32.gmra.mrb[74].mxu1 %vm440_vm1, %v10687_v54 }
 0xe0e   :  { %4588 = vmatprep.mubr.f32.mxu0 %v11473_v8  ;;  %4838 = vmatprep.mubr.f32.mxu1 %v11473_v8 }
 0xe11   :  { %7746 = vmatmul.mubr.msk.f32.vlgmr.msra.gmra.mrb[108].mxu0 %vm440_vm1, %v10601_v32  ;;  %7762 = vmatmul.mubr.msk.f32.vlgmr.msra.gmra.mrb[60].mxu1 %vm440_vm1, %v10707_v15  ;;  %v10837_v32 = vpack.c.bf16 %v5138_v53, %v5132_v41 }
 0xe12   :  { %8282 = vmatpush1.bf16.msra.mxu0 %v8281_v7  ;;  %4594 = vmatprep.mubr.f32.mxu0 %v11473_v8 }
 0xe13   :  { %4844 = vmatprep.mubr.f32.mxu1 %v11473_v8  ;;  %8284 = vmatprep.subr.bf16.mxu0 %v8283_v39 }
 0xe14   :  { %8314 = vmatpush1.bf16.msra.mxu1 %v10715_v28 }
 0xe15   :  { %7747 = vmatmul.mubr.msk.f32.gmra.mrb[110].mxu0 %vm440_vm1, %v10624_v57  ;;  %7763 = vmatmul.mubr.msk.f32.gmra.mrb[62].mxu1 %vm440_vm1, %v10743_v4  ;;  %v10865_v57 = vpack.c.bf16 %v5150_v19, %v5144_v21 }
 0xe16   :  { %4600 = vmatprep.mubr.f32.mxu0 %v11473_v8  ;;  %4850 = vmatprep.mubr.f32.mxu1 %v11473_v8 }
 0xe17   :  { %8286 = vmatpush1.bf16.msra.mxu0 %v8285_v18  ;;  %8316 = vmatprep.subr.bf16.mxu1 %v10741_v5 }
 0xe18   :  { %8318 = vmatpush1.bf16.msra.mxu1 %v10746_v44  ;;  %8296 = vmatprep.subr.bf16.mxu0 %v8295_v63 }
 0xe19   :  { %7748 = vmatmul.mubr.msk.f32.gmra.mrb[112].mxu0 %vm440_vm1, %v10640_v60  ;;  %7764 = vmatmul.mubr.msk.f32.gmra.mrb[64].mxu1 %vm440_vm1, %v10763_v58  ;;  %v5147_v60 = vld [vmem:[%s11430_s17 + $0x98] sm:$0xff] }
 0xe1a   :  { %4606 = vmatprep.mubr.f32.mxu0 %v11473_v8  ;;  %4856 = vmatprep.mubr.f32.mxu1 %v11473_v8 }
 0xe1b   :  { %8320 = vmatprep.subr.bf16.mxu1 %v10761_v36 }
 0xe1d   :  { %7749 = vmatmul.mubr.msk.f32.gmra.mrb[114].mxu0 %vm440_vm1, %v10649_v3  ;;  %7765 = vmatmul.mubr.msk.f32.gmra.mrb[66].mxu1 %vm440_vm1, %v10773_v20  ;;  %v10916_v3 = vpack.c.bf16 %v5134_v61, %v5128_v22 }
 0xe1e   :  { %4612 = vmatprep.mubr.f32.mxu0 %v11473_v8  ;;  %4862 = vmatprep.mubr.f32.mxu1 %v11473_v8 }
 0xe21   :  { %7750 = vmatmul.mubr.msk.f32.gmra.mrb[116].mxu0 %vm440_vm1, %v10657_v35  ;;  %7766 = vmatmul.mubr.msk.f32.gmra.mrb[68].mxu1 %vm440_vm1, %v10781_v52  ;;  %v10918_v35 = vpack.c.bf16 %v5147_v60, %v5141_v59 }
 0xe22   :  { %4618 = vmatprep.mubr.f32.mxu0 %v11473_v8  ;;  %4868 = vmatprep.mubr.f32.mxu1 %v11473_v8 }
 0xe25   :  { %7751 = vmatmul.mubr.msk.f32.gmra.mrb[118].mxu0 %vm440_vm1, %v10665_v29  ;;  %7767 = vmatmul.mubr.msk.f32.gmra.mrb[70].mxu1 %vm440_vm1, %v10789_v25  ;;  %v5140_v29 = vld [vmem:[%s11430_s17 + $0x60] sm:$0xff] }
 0xe26   :  { %4624 = vmatprep.mubr.f32.mxu0 %v11473_v8  ;;  %4874 = vmatprep.mubr.f32.mxu1 %v11473_v8 }
 0xe29   :  { %7752 = vmatmul.mubr.msk.f32.gmra.mrb[120].mxu0 %vm440_vm1, %v10673_v0  ;;  %7768 = vmatmul.mubr.msk.f32.gmra.mrb[72].mxu1 %vm440_vm1, %v10797_v37  ;;  %v5146_v0 = vld [vmem:[%s11430_s17 + $0x90] sm:$0xff] }
 0xe2a   :  { %4630 = vmatprep.mubr.f32.mxu0 %v11473_v8  ;;  %4880 = vmatprep.mubr.f32.mxu1 %v11473_v8  ;;  %v10930_v17 = vpack.c.bf16 %v5146_v0, %v5140_v29  ;;  %v11019_v29 = vld [vmem:[%s11432_s19] ss:$0 sm:$0xff] }
 0xe2d   :  { %7753 = vmatmul.mubr.msk.f32.gmra.mrb[122].mxu0 %vm440_vm1, %v10687_v54  ;;  %7769 = vmatmul.mubr.msk.f32.gmra.mrb[74].mxu1 %vm440_vm1, %v10811_v45  ;;  %v11476_v54 = vld [vmem:[#allocation5_spill] sm:$0xff] }
 0xe2e   :  { %4725 = vmatprep.mubr.f32.mxu0 %v11473_v8  ;;  %5291 = vmatprep.mubr.f32.mxu1 %v11473_v8  ;;  %v11477_v34 = vsub.s32 3, %v11476_v54  ;;  %v11480_v0 = vsub.s32 4, %v11476_v54 }
 0xe30   :  { %v5017_v31 = vrot.slane %v10967_v50, %v11477_v34  ;;  %v5021_v34 = vrot.slane %v10967_v50, %v11480_v0 }
 0xe31   :  { %7754 = vmatmul.mubr.msk.f32.vlgmr.msra.gmra.mrb[92].mxu0 %vm440_vm1, %v10707_v15  ;;  %5292 = vmatmul.mubr.f32.vlgmr.msra.gmra.mrb[76].mxu1 %v11473_v8 }
 0xe32   :  { %8298 = vmatpush1.bf16.msra.mxu0 %v8297_v1  ;;  %4731 = vmatprep.mubr.f32.mxu0 %v11473_v8 }
 0xe33   :  { %5296 = vmatprep.mubr.f32.mxu1 %v11473_v8  ;;  %8300 = vmatprep.subr.bf16.mxu0 %v8299_v47 }
 0xe34   :  { %8322 = vmatpush1.bf16.msra.mxu1 %v10837_v32 }
 0xe35   :  { %7755 = vmatmul.mubr.msk.f32.gmra.mrb[94].mxu0 %vm440_vm1, %v10743_v4  ;;  %5297 = vmatmul.mubr.f32.gmra.mrb[78].mxu1 %v11473_v8 }
 0xe36   :  { %4737 = vmatprep.mubr.f32.mxu0 %v11473_v8  ;;  %8302 = vmatpush1.bf16.msra.mxu0 %v8301_v16 }
 0xe37   :  { %8324 = vmatprep.subr.bf16.mxu1 %v10862_v55  ;;  %5366 = vmatprep.mubr.f32.mxu1 %v11473_v8 }
 0xe38   :  { %8326 = vmatpush1.bf16.msra.mxu1 %v10865_v57  ;;  %8304 = vmatprep.subr.bf16.mxu0 %v10867_v51 }
 0xe39   :  { %7756 = vmatmul.mubr.msk.f32.gmra.mrb[96].mxu0 %vm440_vm1, %v10763_v58  ;;  %8336 = vmatprep.subr.bf16.mxu1 %v10638_v11 }
 0xe3a   :  { %4743 = vmatprep.mubr.f32.mxu0 %v11473_v8 }
 0xe3b   :  { %5367 = vmatmul.mubr.f32.vlgmr.msra.gmra.mrb[80].mxu1 %v11473_v8 }
 0xe3c   :  { %5370 = vmatprep.mubr.f32.mxu1 %v11473_v8  ;;  %8338 = vmatpush1.bf16.msra.mxu1 %v10715_v28 }
 0xe3d   :  { %7757 = vmatmul.mubr.msk.f32.gmra.mrb[98].mxu0 %vm440_vm1, %v10773_v20  ;;  %8340 = vmatprep.subr.bf16.mxu1 %v10741_v5 }
 0xe3e   :  { %4749 = vmatprep.mubr.f32.mxu0 %v11473_v8 }
 0xe3f   :  { %5371 = vmatmul.mubr.f32.gmra.mrb[82].mxu1 %v11473_v8 }
 0xe40   :  { %8342 = vmatpush1.bf16.msra.mxu1 %v10746_v44  ;;  %5572 = vmatprep.mubr.f32.mxu1 %v11473_v8 }
 0xe41   :  { %7758 = vmatmul.mubr.msk.f32.gmra.mrb[100].mxu0 %vm440_vm1, %v10781_v52  ;;  %8344 = vmatprep.subr.bf16.mxu1 %v10761_v36 }
 0xe42   :  { %4755 = vmatprep.mubr.f32.mxu0 %v11473_v8 }
 0xe45   :  { %7759 = vmatmul.mubr.msk.f32.gmra.mrb[102].mxu0 %vm440_vm1, %v10789_v25 }
 0xe46   :  { %4761 = vmatprep.mubr.f32.mxu0 %v11473_v8 }
 0xe49   :  { %7760 = vmatmul.mubr.msk.f32.gmra.mrb[104].mxu0 %vm440_vm1, %v10797_v37 }
 0xe4a   :  { %4767 = vmatprep.mubr.f32.mxu0 %v11473_v8 }
 0xe4d   :  { %7761 = vmatmul.mubr.msk.f32.gmra.mrb[106].mxu0 %vm440_vm1, %v10811_v45 }
 0xe4e   :  { %4951 = vmatprep.mubr.f32.mxu0 %v11473_v8 }
 0xe51   :  { %7770 = vmatmul.mubr.msk.f32.vlgmr.msra.gmra.mrb[108].mxu0 %vm440_vm1, %v10707_v15  ;;  %v11478_v15 = vsub.s32 2, %v11476_v54 }
 0xe52   :  { %8306 = vmatpush1.bf16.msra.mxu0 %v10916_v3  ;;  %4957 = vmatprep.mubr.f32.mxu0 %v11473_v8 }
 0xe53   :  { %8308 = vmatprep.subr.bf16.mxu0 %v10918_v35  ;;  %v10979_v39 = vrot.slane %v10967_v50, %v11478_v15 }
 0xe55   :  { %7771 = vmatmul.mubr.msk.f32.gmra.mrb[110].mxu0 %vm440_vm1, %v10743_v4 }
 0xe56   :  { %4963 = vmatprep.mubr.f32.mxu0 %v11473_v8  ;;  %8310 = vmatpush1.bf16.msra.mxu0 %v10930_v17 }
 0xe57   :  { %8328 = vmatprep.subr.bf16.mxu0 %v10867_v51 }
 0xe59   :  { %7772 = vmatmul.mubr.msk.f32.gmra.mrb[112].mxu0 %vm440_vm1, %v10763_v58 }
 0xe5a   :  { %4969 = vmatprep.mubr.f32.mxu0 %v11473_v8 }
 0xe5d   :  { %7773 = vmatmul.mubr.msk.f32.gmra.mrb[114].mxu0 %vm440_vm1, %v10773_v20 }
 0xe5e   :  { %4975 = vmatprep.mubr.f32.mxu0 %v11473_v8 }
 0xe61   :  { %7774 = vmatmul.mubr.msk.f32.gmra.mrb[116].mxu0 %vm440_vm1, %v10781_v52 }
 0xe62   :  { %4981 = vmatprep.mubr.f32.mxu0 %v11473_v8 }
 0xe65   :  { %7775 = vmatmul.mubr.msk.f32.gmra.mrb[118].mxu0 %vm440_vm1, %v10789_v25 }
 0xe66   :  { %4987 = vmatprep.mubr.f32.mxu0 %v11473_v8 }
 0xe69   :  { %7776 = vmatmul.mubr.msk.f32.gmra.mrb[120].mxu0 %vm440_vm1, %v10797_v37 }
 0xe6a   :  { %4993 = vmatprep.mubr.f32.mxu0 %v11473_v8 }
 0xe6d   :  { %7777 = vmatmul.mubr.msk.f32.gmra.mrb[122].mxu0 %vm440_vm1, %v10811_v45 }
 0xe6e   :  { %5216 = vmatprep.mubr.f32.mxu0 %v11473_v8 }
 0xe71   :  { %5217 = vmatmul.mubr.f32.vlgmr.msra.gmra.mrb[92].mxu0 %v11473_v8 }
 0xe72   :  { %8330 = vmatpush1.bf16.msra.mxu0 %v10916_v3  ;;  %5222 = vmatprep.mubr.f32.mxu0 %v11473_v8 }
 0xe73   :  { %8332 = vmatprep.subr.bf16.mxu0 %v10918_v35 }
 0xe75   :  { %5223 = vmatmul.mubr.f32.gmra.mrb[124].mxu0 %v11473_v8 }
 0xe76   :  { %8334 = vmatpush1.bf16.msra.mxu0 %v10930_v17  ;;  %5497 = vmatprep.mubr.f32.mxu0 %v11473_v8 }
 0xe77   :  { %8352 = vmatprep.subr.bf16.mxu0 %v10867_v51 }
 0xee4   :  { %v10972_v12 = vpop.f32.mrb[60].mxu1 }
 0xee5   :  { %v4842_v10 = vpop.f32.mrb[61].mxu1 }
 0xee6   :  { %v10974_v7 = vadd.f32 %v5017_v31, %v4842_v10  ;;  %v11481_v10 = vsub.s32 5, %v11476_v54 }
 0xee8   :  { %v4846_v14 = vpop.f32.mrb[62].mxu1  ;;  %v5025_v15 = vrot.slane %v10967_v50, %v11481_v10 }
 0xee9   :  { %v10982_v27 = vadd.f32 %v10979_v39, %v4846_v14  ;;  %v4848_v23 = vpop.f32.mrb[63].mxu1 }
 0xeea   :  { %v10984_v62 = vadd.f32 %v5017_v31, %v4848_v23 }
 0xeec   :  { %v4852_v6 = vpop.f32.mrb[64].mxu1 }
 0xeed   :  { %v10987_v40 = vadd.f32 %v10979_v39, %v4852_v6  ;;  %v4854_v33 = vpop.f32.mrb[65].mxu1 }
 0xeee   :  { %v10989_v46 = vadd.f32 %v5017_v31, %v4854_v33 }
 0xef0   :  { %v4858_v18 = vpop.f32.mrb[66].mxu1 }
 0xef1   :  { %v10992_v4 = vadd.f32 %v10979_v39, %v4858_v18  ;;  %v4860_v63 = vpop.f32.mrb[67].mxu1 }
 0xef2   :  { %v10994_v49 = vadd.f32 %v5017_v31, %v4860_v63 }
 0xef4   :  { %v4864_v26 = vpop.f32.mrb[68].mxu1 }
 0xef5   :  { %v10997_v58 = vadd.f32 %v10979_v39, %v4864_v26  ;;  %v4866_v20 = vpop.f32.mrb[69].mxu1 }
 0xef6   :  { %v10999_v52 = vadd.f32 %v5017_v31, %v4866_v20 }
 0xef8   :  { %v4870_v25 = vpop.f32.mrb[70].mxu1 }
 0xef9   :  { %v11002_v37 = vadd.f32 %v10979_v39, %v4870_v25  ;;  %v4872_v43 = vpop.f32.mrb[71].mxu1 }
 0xefa   :  { %v11004_v48 = vadd.f32 %v5017_v31, %v4872_v43 }
 0xefc   :  { %v4876_v45 = vpop.f32.mrb[72].mxu1 }
 0xefd   :  { %v11007_v2 = vadd.f32 %v10979_v39, %v4876_v45  ;;  %v4878_v56 = vpop.f32.mrb[73].mxu1 }
 0xefe   :  { %v11009_v41 = vadd.f32 %v5017_v31, %v4878_v56 }
 0xf00   :  { %v4882_v53 = vpop.f32.mrb[74].mxu1 }
 0xf01   :  { %v11012_v1 = vadd.f32 %v10979_v39, %v4882_v53  ;;  %v4884_v47 = vpop.f32.mrb[75].mxu1 }
 0xf02   :  { %v5077_v9 = vadd.f32 %v5017_v31, %v4884_v47 }
 0xf03   :  { %11479 = vst [vmem:[#allocation6_spill] sm:$0xff] %v11012_v1 }
 0xf04   :  { %v11014_v13 = vpop.f32.mrb[76].mxu1 }
 0xf05   :  { %v5295_v38 = vpop.f32.mrb[77].mxu1 }
 0xf08   :  { %v5298_v30 = vpop.f32.mrb[78].mxu1 }
 0xf09   :  { %v5299_v21 = vpop.f32.mrb[79].mxu1 }
 0xf0a   :  { %v5405_v19 = vadd.f32 %v5299_v21, %v5077_v9 }
 0xf0c   :  { %v7780_v24 = vmul.f32 -1.442695, %v5405_v19 }
 0xf0e   :  { %8964 = vpow2.f32 %v7780_v24  ;;  %v5368_v42 = vpop.f32.mrb[80].mxu1 }
 0xf0f   :  { %v5369_v16 = vpop.f32.mrb[81].mxu1 }
 0xf12   :  { %v5372_v22 = vpop.f32.mrb[82].mxu1 }
 0xf13   :  { %v5374_v61 = vpop.f32.mrb[83].mxu1 }
 0xf14   :  { %v5419_v31 = vadd.f32 %v11019_v29, %v5374_v61 }
 0xf18   :  { %v8965_v59 = vpop.eup %8964 }
 0xf19   :  { %v5409_v60 = vadd.f32 1.0, %v8965_v59 }
 0xf1b   :  { %8966 = vrcp.f32 %v5409_v60 }
 0xf24   :  { %v4953_v14 = vpop.f32.mrb[108].mxu0 }
 0xf25   :  { %v8967_v23 = vpop.eup %8966  ;;  %v11028_v6 = vadd.f32 %v5021_v34, %v4953_v14  ;;  %v4955_v33 = vpop.f32.mrb[109].mxu0 }
 0xf26   :  { %v5420_v18 = vmul.f32 %v8967_v23, %v5419_v31  ;;  %v11030_v63 = vadd.f32 %v5025_v15, %v4955_v33 }
 0xf28   :  { %11482 = vst [vmem:[#allocation7_spill] sm:$0xff] %v11030_v63  ;;  %v4959_v26 = vpop.f32.mrb[110].mxu0 }
 0xf29   :  { %v11032_v20 = vadd.f32 %v5021_v34, %v4959_v26  ;;  %v4961_v25 = vpop.f32.mrb[111].mxu0 }
 0xf2a   :  { %v11034_v43 = vadd.f32 %v5025_v15, %v4961_v25 }
 0xf2c   :  { %v4965_v45 = vpop.f32.mrb[112].mxu0 }
 0xf2d   :  { %v11036_v56 = vadd.f32 %v5021_v34, %v4965_v45  ;;  %v4967_v53 = vpop.f32.mrb[113].mxu0  ;;  %v11483_v45 = vsub.s32 0, %v11476_v54 }
 0xf2e   :  { %v11038_v47 = vadd.f32 %v5025_v15, %v4967_v53 }
 0xf2f   :  { %v11059_v53 = vrot.slane %v10967_v50, %v11483_v45 }
 0xf30   :  { %v4971_v38 = vpop.f32.mrb[114].mxu0 }
 0xf31   :  { %v11040_v9 = vadd.f32 %v5021_v34, %v4971_v38  ;;  %v4973_v30 = vpop.f32.mrb[115].mxu0 }
 0xf32   :  { %v11042_v21 = vadd.f32 %v5025_v15, %v4973_v30 }
 0xf34   :  { %v4977_v19 = vpop.f32.mrb[116].mxu0 }
 0xf35   :  { %v11044_v24 = vadd.f32 %v5021_v34, %v4977_v19  ;;  %v4979_v42 = vpop.f32.mrb[117].mxu0 }
 0xf36   :  { %v11046_v16 = vadd.f32 %v5025_v15, %v4979_v42 }
 0xf38   :  { %v4983_v61 = vpop.f32.mrb[118].mxu0 }
 0xf39   :  { %v11048_v59 = vadd.f32 %v5021_v34, %v4983_v61  ;;  %v4985_v60 = vpop.f32.mrb[119].mxu0  ;;  %v11484_v61 = vsub.s32 1, %v11476_v54 }
 0xf3a   :  { %v11050_v0 = vadd.f32 %v5025_v15, %v4985_v60 }
 0xf3b   :  { %v11064_v60 = vrot.slane %v10967_v50, %v11484_v61 }
 0xf3c   :  { %v4989_v31 = vpop.f32.mrb[120].mxu0 }
 0xf3d   :  { %v11052_v10 = vadd.f32 %v5021_v34, %v4989_v31  ;;  %v4991_v14 = vpop.f32.mrb[121].mxu0 }
 0xf3e   :  { %v11054_v23 = vadd.f32 %v5025_v15, %v4991_v14 }
 0xf40   :  { %v4995_v33 = vpop.f32.mrb[122].mxu0 }
 0xf41   :  { %v5078_v26 = vadd.f32 %v5021_v34, %v4995_v33  ;;  %v4997_v25 = vpop.f32.mrb[123].mxu0 }
 0xf42   :  { %v5079_v38 = vadd.f32 %v5025_v15, %v4997_v25  ;;  %v11071_v25 = vld [vmem:[%s11433_s18] ss:$0 sm:$0xff] }
 0xf43   :  { %v5412_v30 = vadd.f32 %v5372_v22, %v5078_v26 }
 0xf44   :  { %v5421_v19 = vadd.f32 %v5420_v18, %v5079_v38  ;;  %v5218_v42 = vpop.f32.mrb[92].mxu0 }
 0xf45   :  { %v7781_v31 = vmul.f32 -1.442695, %v5412_v30  ;;  %v8523_v14 = vadd.f32 %v5218_v42, %v11059_v53  ;;  %v5220_v63 = vpop.f32.mrb[93].mxu0  ;;  %v5394_v30 = vadd.f32 %v11071_v25, %v11014_v13 }
 0xf46   :  { %v8524_v33 = vadd.f32 %v5220_v63, %v11064_v60 }
 0xf47   :  { %8968 = vpow2.f32 %v7781_v31  ;;  %v7778_v34 = vmul.f32 -1.442695, %v8523_v14  ;;  %v5034_v31 = vadd.f32 %v10979_v39, %v10972_v12 }
 0xf48   :  { %v5224_v1 = vpop.f32.mrb[124].mxu0  ;;  %v7779_v15 = vmul.f32 -1.442695, %v8524_v33 }
 0xf49   :  { %8970 = vpow2.f32 %v7778_v34  ;;  %v5225_v45 = vpop.f32.mrb[125].mxu0 }
 0xf4a   :  { %8972 = vpow2.f32 %v7779_v15 }
 0xf51   :  { %v8969_v22 = vpop.eup %8968 }
 0xf52   :  { %v5416_v18 = vadd.f32 1.0, %v8969_v22 }
 0xf53   :  { %v8971_v26 = vpop.eup %8970 }
 0xf54   :  { %8974 = vrcp.f32 %v5416_v18  ;;  %v5384_v54 = vadd.f32 1.0, %v8971_v26  ;;  %v8973_v50 = vpop.eup %8972 }
 0xf55   :  { %8976 = vtanh.f32 %v5421_v19  ;;  %v5391_v38 = vadd.f32 1.0, %v8973_v50 }
 0xf56   :  { %8978 = vrcp.f32 %v5384_v54 }
 0xf57   :  { %8980 = vrcp.f32 %v5391_v38 }
 0xf5e   :  { %v8975_v63 = vpop.eup %8974 }
 0xf5f   :  { %v8977_v1 = vpop.eup %8976  ;;  %v5423_v42 = vsub.f32 1.0, %v8975_v63  ;;  %v5425_v34 = vmul.f32 0.0, %v8975_v63 }
 0xf60   :  { %v8979_v61 = vpop.eup %8978 }
 0xf61   :  { %v5395_v14 = vmul.f32 %v8979_v61, %v5394_v30  ;;  %v5424_v19 = vmul.f32 %v8977_v1, %v5423_v42  ;;  %v8981_v15 = vpop.eup %8980 }
 0xf62   :  { %v5398_v22 = vsub.f32 1.0, %v8981_v15  ;;  %v5400_v54 = vmul.f32 0.0, %v8981_v15 }
 0xf63   :  { %v5396_v33 = vadd.f32 %v5395_v14, %v5034_v31  ;;  %v11077_v45 = vadd.f32 %v5425_v34, %v5424_v19 }
 0xf65   :  { %8982 = vtanh.f32 %v5396_v33 }
 0xf6f   :  { %v8983_v18 = vpop.eup %8982 }
 0xf70   :  { %v5399_v26 = vmul.f32 %v8983_v18, %v5398_v22 }
 0xf72   :  { %v11079_v50 = vadd.f32 %v5400_v54, %v5399_v26 }
 0xf74   :  { %7782 = vmatmul.mubr.msk.f32.vlgmr.msra.gmra.mrb[94].mxu0 %vm440_vm1, %v11079_v50  ;;  %7784 = vmatmul.mubr.msk.f32.vlgmr.msra.gmra.mrb[84].mxu1 %vm440_vm1, %v11079_v50 }
 0xf75   :  { %8346 = vmatpush1.bf16.msra.mxu1 %v10837_v32  ;;  %5503 = vmatprep.mubr.f32.mxu0 %v11473_v8 }
 0xf76   :  { %5577 = vmatprep.mubr.f32.mxu1 %v11473_v8  ;;  %8348 = vmatprep.subr.bf16.mxu1 %v10862_v55 }
 0xf77   :  { %8354 = vmatpush1.bf16.msra.mxu0 %v10916_v3 }
 0xf78   :  { %7783 = vmatmul.mubr.msk.f32.gmra.mrb[126].mxu0 %vm440_vm1, %v11077_v45  ;;  %7785 = vmatmul.mubr.msk.f32.gmra.mrb[86].mxu1 %vm440_vm1, %v11077_v45 }
 0xf79   :  { %8350 = vmatpush1.bf16.msra.mxu1 %v10865_v57  ;;  %5647 = vmatprep.mubr.f32.mxu1 %v11473_v8 }
 0xf7a   :  { %8360 = vmatprep.subr.bf16.mxu1 %v10638_v11  ;;  %8356 = vmatprep.subr.bf16.mxu0 %v10918_v35 }
 0xf7b   :  { %8358 = vmatpush1.bf16.msra.mxu0 %v10930_v17  ;;  %5778 = vmatprep.mubr.f32.mxu0 %v11473_v8 }
 0xf7c   :  { %7786 = vmatmul.mubr.msk.f32.vlgmr.msra.gmra.mrb[88].mxu1 %vm440_vm1, %v11079_v50  ;;  %8376 = vmatprep.subr.bf16.mxu0 %v10867_v51 }
 0xf7d   :  { %5651 = vmatprep.mubr.f32.mxu1 %v11473_v8  ;;  %8362 = vmatpush1.bf16.msra.mxu1 %v10715_v28 }
 0xf7e   :  { %8364 = vmatprep.subr.bf16.mxu1 %v10741_v5 }
 0xf80   :  { %7787 = vmatmul.mubr.msk.f32.gmra.mrb[90].mxu1 %vm440_vm1, %v11077_v45 }
 0xf81   :  { %8366 = vmatpush1.bf16.msra.mxu1 %v10746_v44  ;;  %5853 = vmatprep.mubr.f32.mxu1 %v11473_v8 }
 0xf82   :  { %8368 = vmatprep.subr.bf16.mxu1 %v10761_v36 }
0x1047   :  { %v5499_v12 = vpop.f32.mrb[94].mxu0  ;;  %v5574_v39 = vpop.f32.mrb[84].mxu1 }
0x1048   :  { %v8525_v13 = vadd.f32 %v5499_v12, %v11059_v53  ;;  %v5501_v38 = vpop.f32.mrb[95].mxu0  ;;  %v5576_v63 = vpop.f32.mrb[85].mxu1 }
0x1049   :  { %v8526_v30 = vadd.f32 %v5501_v38, %v11064_v60 }
0x104a   :  { %v7788_v1 = vmul.f32 -1.442695, %v8525_v13 }
0x104b   :  { %v5505_v42 = vpop.f32.mrb[126].mxu0  ;;  %v5579_v61 = vpop.f32.mrb[86].mxu1  ;;  %v7789_v34 = vmul.f32 -1.442695, %v8526_v30 }
0x104c   :  { %8984 = vpow2.f32 %v7788_v1  ;;  %v5506_v31 = vpop.f32.mrb[127].mxu0  ;;  %v5580_v14 = vpop.f32.mrb[87].mxu1  ;;  %v5675_v61 = vadd.f32 %v11071_v25, %v5574_v39 }
0x104d   :  { %v5686_v19 = vadd.f32 %v5580_v14, %v11009_v41 }
0x104f   :  { %v7790_v33 = vmul.f32 -1.442695, %v5686_v19  ;;  %v5649_v15 = vpop.f32.mrb[88].mxu1 }
0x1050   :  { %v5650_v22 = vpop.f32.mrb[89].mxu1 }
0x1051   :  { %8986 = vpow2.f32 %v7790_v33 }
0x1052   :  { %8988 = vpow2.f32 %v7789_v34 }
0x1053   :  { %v5653_v18 = vpop.f32.mrb[90].mxu1 }
0x1054   :  { %v5693_v26 = vadd.f32 %v5653_v18, %v11052_v10  ;;  %v5655_v54 = vpop.f32.mrb[91].mxu1 }
0x1055   :  { %v5700_v34 = vadd.f32 %v11019_v29, %v5655_v54 }
0x1056   :  { %v8985_v12 = vpop.eup %8984  ;;  %v7791_v13 = vmul.f32 -1.442695, %v5693_v26 }
0x1057   :  { %v5665_v38 = vadd.f32 1.0, %v8985_v12 }
0x1058   :  { %8990 = vpow2.f32 %v7791_v13 }
0x1059   :  { %8992 = vrcp.f32 %v5665_v38 }
0x105b   :  { %v8987_v63 = vpop.eup %8986 }
0x105c   :  { %v5690_v1 = vadd.f32 1.0, %v8987_v63  ;;  %v8989_v42 = vpop.eup %8988 }
0x105d   :  { %v5672_v41 = vadd.f32 1.0, %v8989_v42 }
0x105e   :  { %8994 = vrcp.f32 %v5690_v1 }
0x105f   :  { %8996 = vrcp.f32 %v5672_v41 }
0x1062   :  { %v8991_v30 = vpop.eup %8990 }
0x1063   :  { %v8993_v31 = vpop.eup %8992  ;;  %v5697_v19 = vadd.f32 1.0, %v8991_v30 }
0x1064   :  { %v5676_v14 = vmul.f32 %v8993_v31, %v5675_v61 }
0x1066   :  { %v5677_v10 = vadd.f32 %v5676_v14, %v10982_v27 }
0x1068   :  { %v8995_v33 = vpop.eup %8994  ;;  %8998 = vtanh.f32 %v5677_v10 }
0x1069   :  { %9000 = vrcp.f32 %v5697_v19  ;;  %v5701_v15 = vmul.f32 %v8995_v33, %v5700_v34  ;;  %v8997_v18 = vpop.eup %8996 }
0x106a   :  { %v5679_v26 = vsub.f32 1.0, %v8997_v18  ;;  %v5681_v38 = vmul.f32 %v8997_v18, %v11079_v50 }
0x106b   :  { %v5702_v22 = vadd.f32 %v5701_v15, %v11054_v23 }
0x106d   :  { %9002 = vtanh.f32 %v5702_v22 }
0x1072   :  { %v8999_v12 = vpop.eup %8998 }
0x1073   :  { %v9001_v13 = vpop.eup %9000  ;;  %v5680_v39 = vmul.f32 %v8999_v12, %v5679_v26 }
0x1074   :  { %v5704_v1 = vsub.f32 1.0, %v9001_v13  ;;  %v5706_v54 = vmul.f32 %v9001_v13, %v11077_v45 }
0x1075   :  { %v11120_v63 = vadd.f32 %v5681_v38, %v5680_v39 }
0x1077   :  { %v9003_v27 = vpop.eup %9002  ;;  %7792 = vmatmul.mubr.msk.f32.vlgmr.msra.gmra.mrb[96].mxu0 %vm440_vm1, %v11120_v63  ;;  %7794 = vmatmul.mubr.msk.f32.vlgmr.msra.gmra.mrb[92].mxu1 %vm440_vm1, %v11120_v63 }
0x1078   :  { %8370 = vmatpush1.bf16.msra.mxu1 %v10837_v32  ;;  %5784 = vmatprep.mubr.f32.mxu0 %v11473_v8  ;;  %v5705_v23 = vmul.f32 %v9003_v27, %v5704_v1 }
0x1079   :  { %5858 = vmatprep.mubr.f32.mxu1 %v11473_v8  ;;  %8372 = vmatprep.subr.bf16.mxu1 %v10862_v55 }
0x107a   :  { %v11131_v50 = vadd.f32 %v5706_v54, %v5705_v23  ;;  %8378 = vmatpush1.bf16.msra.mxu0 %v10916_v3 }
0x107b   :  { %8380 = vmatprep.subr.bf16.mxu0 %v10918_v35 }
0x107c   :  { %7793 = vmatmul.mubr.msk.f32.gmra.mrb[128].mxu0 %vm440_vm1, %v11131_v50  ;;  %7795 = vmatmul.mubr.msk.f32.gmra.mrb[94].mxu1 %vm440_vm1, %v11131_v50 }
0x107d   :  { %8374 = vmatpush1.bf16.msra.mxu1 %v10865_v57  ;;  %5928 = vmatprep.mubr.f32.mxu1 %v11473_v8 }
0x107e   :  { %8384 = vmatprep.subr.bf16.mxu1 %v10638_v11  ;;  %8382 = vmatpush1.bf16.msra.mxu0 %v10930_v17 }
0x107f   :  { %6059 = vmatprep.mubr.f32.mxu0 %v11473_v8  ;;  %8400 = vmatprep.subr.bf16.mxu0 %v10867_v51 }
0x1080   :  { %7796 = vmatmul.mubr.msk.f32.vlgmr.msra.gmra.mrb[96].mxu1 %vm440_vm1, %v11120_v63 }
0x1081   :  { %5932 = vmatprep.mubr.f32.mxu1 %v11473_v8  ;;  %8386 = vmatpush1.bf16.msra.mxu1 %v10715_v28 }
0x1082   :  { %8388 = vmatprep.subr.bf16.mxu1 %v10741_v5 }
0x1084   :  { %7797 = vmatmul.mubr.msk.f32.gmra.mrb[98].mxu1 %vm440_vm1, %v11131_v50 }
0x1085   :  { %8390 = vmatpush1.bf16.msra.mxu1 %v10746_v44  ;;  %6134 = vmatprep.mubr.f32.mxu1 %v11473_v8 }
0x1086   :  { %8392 = vmatprep.subr.bf16.mxu1 %v10761_v36 }
0x114a   :  { %v5780_v45 = vpop.f32.mrb[96].mxu0  ;;  %v5855_v42 = vpop.f32.mrb[92].mxu1 }
0x114b   :  { %v8527_v41 = vadd.f32 %v5780_v45, %v11059_v53  ;;  %v5782_v30 = vpop.f32.mrb[97].mxu0  ;;  %v5857_v61 = vpop.f32.mrb[93].mxu1 }
0x114c   :  { %v8528_v14 = vadd.f32 %v5782_v30, %v11064_v60  ;;  %v5956_v30 = vadd.f32 %v11071_v25, %v5855_v42 }
0x114d   :  { %v7798_v31 = vmul.f32 -1.442695, %v8527_v41 }
0x114e   :  { %v7799_v22 = vmul.f32 -1.442695, %v8528_v14 }
0x114f   :  { %9004 = vpow2.f32 %v7798_v31  ;;  %v5786_v19 = vpop.f32.mrb[128].mxu0  ;;  %v5860_v10 = vpop.f32.mrb[94].mxu1 }
0x1150   :  { %v5787_v34 = vpop.f32.mrb[129].mxu0  ;;  %v5861_v33 = vpop.f32.mrb[95].mxu1 }
0x1151   :  { %v5967_v15 = vadd.f32 %v5861_v33, %v11004_v48 }
0x1153   :  { %v7800_v18 = vmul.f32 -1.442695, %v5967_v15  ;;  %v5930_v26 = vpop.f32.mrb[96].mxu1 }
0x1154   :  { %v5931_v12 = vpop.f32.mrb[97].mxu1 }
0x1155   :  { %9006 = vpow2.f32 %v7800_v18 }
0x1156   :  { %9008 = vpow2.f32 %v7799_v22 }
0x1157   :  { %v5934_v13 = vpop.f32.mrb[98].mxu1 }
0x1158   :  { %v5974_v39 = vadd.f32 %v5934_v13, %v11048_v59  ;;  %v5936_v38 = vpop.f32.mrb[99].mxu1 }
0x1159   :  { %v9005_v1 = vpop.eup %9004  ;;  %v5981_v10 = vadd.f32 %v11019_v29, %v5936_v38 }
0x115a   :  { %v5946_v27 = vadd.f32 1.0, %v9005_v1  ;;  %v7801_v23 = vmul.f32 -1.442695, %v5974_v39 }
0x115c   :  { %9010 = vrcp.f32 %v5946_v27 }
0x115d   :  { %9012 = vpow2.f32 %v7801_v23 }
0x115f   :  { %v9007_v54 = vpop.eup %9006 }
0x1160   :  { %v9009_v45 = vpop.eup %9008  ;;  %v5971_v41 = vadd.f32 1.0, %v9007_v54 }
0x1161   :  { %v5953_v48 = vadd.f32 1.0, %v9009_v45 }
0x1162   :  { %9014 = vrcp.f32 %v5971_v41 }
0x1163   :  { %9016 = vrcp.f32 %v5953_v48 }
0x1166   :  { %v9011_v61 = vpop.eup %9010 }
0x1167   :  { %v5957_v31 = vmul.f32 %v9011_v61, %v5956_v30  ;;  %v9013_v14 = vpop.eup %9012 }
0x1168   :  { %v5978_v59 = vadd.f32 1.0, %v9013_v14 }
0x1169   :  { %v5958_v19 = vadd.f32 %v5957_v31, %v10987_v40 }
0x116b   :  { %9018 = vtanh.f32 %v5958_v19 }
0x116c   :  { %v9015_v34 = vpop.eup %9014  ;;  %9020 = vrcp.f32 %v5978_v59 }
0x116d   :  { %v5982_v33 = vmul.f32 %v9015_v34, %v5981_v10  ;;  %v9017_v22 = vpop.eup %9016 }
0x116e   :  { %v5960_v18 = vsub.f32 1.0, %v9017_v22  ;;  %v5962_v12 = vmul.f32 %v9017_v22, %v11120_v63 }
0x116f   :  { %v5983_v15 = vadd.f32 %v5982_v33, %v11050_v0 }
0x1171   :  { %9022 = vtanh.f32 %v5983_v15 }
0x1175   :  { %v9019_v26 = vpop.eup %9018 }
0x1176   :  { %v5961_v42 = vmul.f32 %v9019_v26, %v5960_v18  ;;  %v9021_v13 = vpop.eup %9020 }
0x1177   :  { %v5985_v40 = vsub.f32 1.0, %v9021_v13  ;;  %v5987_v63 = vmul.f32 %v9021_v13, %v11131_v50 }
0x1178   :  { %v11164_v39 = vadd.f32 %v5962_v12, %v5961_v42 }
0x117a   :  { %7802 = vmatmul.mubr.msk.f32.vlgmr.msra.gmra.mrb[98].mxu0 %vm440_vm1, %v11164_v39  ;;  %7804 = vmatmul.mubr.msk.f32.vlgmr.msra.gmra.mrb[100].mxu1 %vm440_vm1, %v11164_v39 }
0x117b   :  { %v9023_v38 = vpop.eup %9022  ;;  %8394 = vmatpush1.bf16.msra.mxu1 %v10837_v32  ;;  %6065 = vmatprep.mubr.f32.mxu0 %v11473_v8 }
0x117c   :  { %6139 = vmatprep.mubr.f32.mxu1 %v11473_v8  ;;  %v5986_v0 = vmul.f32 %v9023_v38, %v5985_v40  ;;  %8396 = vmatprep.subr.bf16.mxu1 %v10862_v55 }
0x117d   :  { %8402 = vmatpush1.bf16.msra.mxu0 %v10916_v3 }
0x117e   :  { %v11176_v1 = vadd.f32 %v5987_v63, %v5986_v0  ;;  %8404 = vmatprep.subr.bf16.mxu0 %v10918_v35 }
0x117f   :  { %8398 = vmatpush1.bf16.msra.mxu1 %v10865_v57 }
0x1180   :  { %7803 = vmatmul.mubr.msk.f32.gmra.mrb[130].mxu0 %vm440_vm1, %v11176_v1  ;;  %7805 = vmatmul.mubr.msk.f32.gmra.mrb[102].mxu1 %vm440_vm1, %v11176_v1 }
0x1181   :  { %6209 = vmatprep.mubr.f32.mxu1 %v11473_v8  ;;  %8408 = vmatprep.subr.bf16.mxu1 %v10638_v11 }
0x1182   :  { %8406 = vmatpush1.bf16.msra.mxu0 %v10930_v17  ;;  %6340 = vmatprep.mubr.f32.mxu0 %v11473_v8 }
0x1183   :  { %8424 = vmatprep.subr.bf16.mxu0 %v10867_v51 }
0x1184   :  { %7806 = vmatmul.mubr.msk.f32.vlgmr.msra.gmra.mrb[104].mxu1 %vm440_vm1, %v11164_v39 }
0x1185   :  { %6213 = vmatprep.mubr.f32.mxu1 %v11473_v8  ;;  %8410 = vmatpush1.bf16.msra.mxu1 %v10715_v28 }
0x1186   :  { %8412 = vmatprep.subr.bf16.mxu1 %v10741_v5 }
0x1188   :  { %7807 = vmatmul.mubr.msk.f32.gmra.mrb[106].mxu1 %vm440_vm1, %v11176_v1 }
0x1189   :  { %8414 = vmatpush1.bf16.msra.mxu1 %v10746_v44  ;;  %6415 = vmatprep.mubr.f32.mxu1 %v11473_v8 }
0x118a   :  { %8416 = vmatprep.subr.bf16.mxu1 %v10761_v36 }
0x124d   :  { %v6061_v50 = vpop.f32.mrb[98].mxu0  ;;  %v6136_v27 = vpop.f32.mrb[100].mxu1 }
0x124e   :  { %v8529_v23 = vadd.f32 %v6061_v50, %v11059_v53  ;;  %v6063_v54 = vpop.f32.mrb[99].mxu0  ;;  %v6138_v45 = vpop.f32.mrb[101].mxu1 }
0x124f   :  { %v8530_v48 = vadd.f32 %v6063_v54, %v11064_v60 }
0x1250   :  { %v7808_v41 = vmul.f32 -1.442695, %v8529_v23 }
0x1251   :  { %v7809_v31 = vmul.f32 -1.442695, %v8530_v48 }
0x1252   :  { %9024 = vpow2.f32 %v7808_v41 }
0x1253   :  { %v6067_v30 = vpop.f32.mrb[130].mxu0  ;;  %v6141_v61 = vpop.f32.mrb[102].mxu1  ;;  %9026 = vpow2.f32 %v7809_v31 }
0x1254   :  { %v6068_v14 = vpop.f32.mrb[131].mxu0  ;;  %v6142_v19 = vpop.f32.mrb[103].mxu1 }
0x1255   :  { %v6248_v59 = vadd.f32 %v6142_v19, %v10999_v52  ;;  %v6237_v52 = vadd.f32 %v11071_v25, %v6136_v27 }
0x1257   :  { %v7810_v10 = vmul.f32 -1.442695, %v6248_v59  ;;  %v6211_v34 = vpop.f32.mrb[104].mxu1 }
0x1258   :  { %v6212_v33 = vpop.f32.mrb[105].mxu1 }
0x1259   :  { %9028 = vpow2.f32 %v7810_v10 }
0x125b   :  { %v6215_v15 = vpop.f32.mrb[106].mxu1 }
0x125c   :  { %v9025_v22 = vpop.eup %9024  ;;  %v6255_v18 = vadd.f32 %v6215_v15, %v11044_v24  ;;  %v6217_v26 = vpop.f32.mrb[107].mxu1 }
0x125d   :  { %v6227_v42 = vadd.f32 1.0, %v9025_v22  ;;  %v9027_v13 = vpop.eup %9026  ;;  %v6262_v24 = vadd.f32 %v11019_v29, %v6217_v26 }
0x125e   :  { %v7811_v12 = vmul.f32 -1.442695, %v6255_v18  ;;  %v6234_v0 = vadd.f32 1.0, %v9027_v13 }
0x125f   :  { %9030 = vrcp.f32 %v6227_v42 }
0x1260   :  { %9032 = vpow2.f32 %v7811_v12 }
0x1263   :  { %v9029_v40 = vpop.eup %9028 }
0x1264   :  { %v6252_v38 = vadd.f32 1.0, %v9029_v40 }
0x1266   :  { %9034 = vrcp.f32 %v6252_v38 }
0x1267   :  { %9036 = vrcp.f32 %v6234_v0 }
0x1269   :  { %v9031_v63 = vpop.eup %9030 }
0x126a   :  { %v6238_v50 = vmul.f32 %v9031_v63, %v6237_v52  ;;  %v9033_v23 = vpop.eup %9032 }
0x126b   :  { %v6259_v45 = vadd.f32 1.0, %v9033_v23 }
0x126c   :  { %v6239_v54 = vadd.f32 %v6238_v50, %v10992_v4 }
0x126e   :  { %9038 = vtanh.f32 %v6239_v54 }
0x126f   :  { %9040 = vrcp.f32 %v6259_v45 }
0x1270   :  { %v9035_v41 = vpop.eup %9034 }
0x1271   :  { %v6263_v48 = vmul.f32 %v9035_v41, %v6262_v24  ;;  %v9037_v61 = vpop.eup %9036 }
0x1272   :  { %v6241_v31 = vsub.f32 1.0, %v9037_v61  ;;  %v6243_v19 = vmul.f32 %v9037_v61, %v11164_v39 }
0x1273   :  { %v6264_v30 = vadd.f32 %v6263_v48, %v11046_v16 }
0x1275   :  { %9042 = vtanh.f32 %v6264_v30 }
0x1278   :  { %v9039_v14 = vpop.eup %9038 }
0x1279   :  { %v6242_v27 = vmul.f32 %v9039_v14, %v6241_v31  ;;  %v9041_v59 = vpop.eup %9040 }
0x127a   :  { %v6266_v4 = vsub.f32 1.0, %v9041_v59  ;;  %v6268_v34 = vmul.f32 %v9041_v59, %v11176_v1 }
0x127b   :  { %v11208_v10 = vadd.f32 %v6243_v19, %v6242_v27 }
0x127d   :  { %7812 = vmatmul.mubr.msk.f32.vlgmr.msra.gmra.mrb[100].mxu0 %vm440_vm1, %v11208_v10  ;;  %7814 = vmatmul.mubr.msk.f32.vlgmr.msra.gmra.mrb[108].mxu1 %vm440_vm1, %v11208_v10 }
0x127e   :  { %8418 = vmatpush1.bf16.msra.mxu1 %v10837_v32  ;;  %6346 = vmatprep.mubr.f32.mxu0 %v11473_v8 }
0x127f   :  { %v9043_v16 = vpop.eup %9042  ;;  %6420 = vmatprep.mubr.f32.mxu1 %v11473_v8  ;;  %8420 = vmatprep.subr.bf16.mxu1 %v10862_v55 }
0x1280   :  { %v6267_v39 = vmul.f32 %v9043_v16, %v6266_v4  ;;  %8426 = vmatpush1.bf16.msra.mxu0 %v10916_v3 }
0x1281   :  { %8428 = vmatprep.subr.bf16.mxu0 %v10918_v35 }
0x1282   :  { %v11221_v33 = vadd.f32 %v6268_v34, %v6267_v39  ;;  %8422 = vmatpush1.bf16.msra.mxu1 %v10865_v57 }
0x1283   :  { %8432 = vmatprep.subr.bf16.mxu1 %v10638_v11 }
0x1284   :  { %7813 = vmatmul.mubr.msk.f32.gmra.mrb[132].mxu0 %vm440_vm1, %v11221_v33  ;;  %7815 = vmatmul.mubr.msk.f32.gmra.mrb[110].mxu1 %vm440_vm1, %v11221_v33 }
0x1285   :  { %6490 = vmatprep.mubr.f32.mxu1 %v11473_v8  ;;  %8430 = vmatpush1.bf16.msra.mxu0 %v10930_v17 }
0x1286   :  { %6621 = vmatprep.mubr.f32.mxu0 %v11473_v8  ;;  %8448 = vmatprep.subr.bf16.mxu0 %v10867_v51 }
0x1288   :  { %7816 = vmatmul.mubr.msk.f32.vlgmr.msra.gmra.mrb[112].mxu1 %vm440_vm1, %v11208_v10 }
0x1289   :  { %6494 = vmatprep.mubr.f32.mxu1 %v11473_v8  ;;  %8434 = vmatpush1.bf16.msra.mxu1 %v10715_v28 }
0x128a   :  { %8436 = vmatprep.subr.bf16.mxu1 %v10741_v5 }
0x128c   :  { %7817 = vmatmul.mubr.msk.f32.gmra.mrb[114].mxu1 %vm440_vm1, %v11221_v33 }
0x128d   :  { %8438 = vmatpush1.bf16.msra.mxu1 %v10746_v44  ;;  %6696 = vmatprep.mubr.f32.mxu1 %v11473_v8 }
0x128e   :  { %8440 = vmatprep.subr.bf16.mxu1 %v10761_v36 }
0x1350   :  { %v6342_v1 = vpop.f32.mrb[100].mxu0  ;;  %v6417_v15 = vpop.f32.mrb[108].mxu1 }
0x1351   :  { %v8531_v22 = vadd.f32 %v6342_v1, %v11059_v53  ;;  %v6344_v18 = vpop.f32.mrb[101].mxu0  ;;  %v6419_v26 = vpop.f32.mrb[109].mxu1 }
0x1352   :  { %v8532_v12 = vadd.f32 %v6344_v18, %v11064_v60 }
0x1353   :  { %v7818_v42 = vmul.f32 -1.442695, %v8531_v22 }
0x1354   :  { %v7819_v38 = vmul.f32 -1.442695, %v8532_v12 }
0x1355   :  { %9044 = vpow2.f32 %v7818_v42 }
0x1356   :  { %9046 = vpow2.f32 %v7819_v38 }
0x1357   :  { %v6348_v13 = vpop.f32.mrb[132].mxu0  ;;  %v6422_v40 = vpop.f32.mrb[110].mxu1 }
0x1358   :  { %v6349_v0 = vpop.f32.mrb[133].mxu0  ;;  %v6423_v52 = vpop.f32.mrb[111].mxu1 }
0x1359   :  { %v6529_v63 = vadd.f32 %v6423_v52, %v10994_v49  ;;  %v6518_v49 = vadd.f32 %v11071_v25, %v6417_v15 }
0x135b   :  { %v7820_v50 = vmul.f32 -1.442695, %v6529_v63  ;;  %v6492_v23 = vpop.f32.mrb[112].mxu1 }
0x135c   :  { %v6493_v54 = vpop.f32.mrb[113].mxu1 }
0x135d   :  { %9048 = vpow2.f32 %v7820_v50 }
0x135f   :  { %v9045_v45 = vpop.eup %9044  ;;  %v6496_v24 = vpop.f32.mrb[114].mxu1 }
0x1360   :  { %v6508_v41 = vadd.f32 1.0, %v9045_v45  ;;  %v6536_v48 = vadd.f32 %v6496_v24, %v11040_v9  ;;  %v6498_v30 = vpop.f32.mrb[115].mxu1  ;;  %v9047_v31 = vpop.eup %9046 }
0x1361   :  { %v6515_v19 = vadd.f32 1.0, %v9047_v31  ;;  %v6543_v9 = vadd.f32 %v11019_v29, %v6498_v30 }
0x1362   :  { %9050 = vrcp.f32 %v6508_v41  ;;  %v7821_v61 = vmul.f32 -1.442695, %v6536_v48 }
0x1364   :  { %9052 = vpow2.f32 %v7821_v61 }
0x1367   :  { %v9049_v14 = vpop.eup %9048 }
0x1368   :  { %v6533_v27 = vadd.f32 1.0, %v9049_v14 }
0x136a   :  { %9054 = vrcp.f32 %v6533_v27 }
0x136b   :  { %9056 = vrcp.f32 %v6515_v19 }
0x136c   :  { %v9051_v59 = vpop.eup %9050 }
0x136d   :  { %v6519_v4 = vmul.f32 %v9051_v59, %v6518_v49 }
0x136e   :  { %v9053_v16 = vpop.eup %9052 }
0x136f   :  { %v6520_v39 = vadd.f32 %v6519_v4, %v10997_v58  ;;  %v6540_v34 = vadd.f32 1.0, %v9053_v16 }
0x1371   :  { %9058 = vtanh.f32 %v6520_v39 }
0x1372   :  { %9060 = vrcp.f32 %v6540_v34 }
0x1374   :  { %v9055_v1 = vpop.eup %9054 }
0x1375   :  { %v6544_v22 = vmul.f32 %v9055_v1, %v6543_v9  ;;  %v9057_v18 = vpop.eup %9056 }
0x1376   :  { %v6522_v42 = vsub.f32 1.0, %v9057_v18  ;;  %v6524_v13 = vmul.f32 %v9057_v18, %v11208_v10 }
0x1377   :  { %v6545_v26 = vadd.f32 %v6544_v22, %v11042_v21 }
0x1379   :  { %9062 = vtanh.f32 %v6545_v26 }
0x137b   :  { %v9059_v12 = vpop.eup %9058 }
0x137c   :  { %v6523_v15 = vmul.f32 %v9059_v12, %v6522_v42  ;;  %v9061_v38 = vpop.eup %9060 }
0x137d   :  { %v6547_v58 = vsub.f32 1.0, %v9061_v38  ;;  %v6549_v0 = vmul.f32 %v9061_v38, %v11221_v33 }
0x137e   :  { %v11252_v40 = vadd.f32 %v6524_v13, %v6523_v15 }
0x1380   :  { %7822 = vmatmul.mubr.msk.f32.vlgmr.msra.gmra.mrb[102].mxu0 %vm440_vm1, %v11252_v40  ;;  %7824 = vmatmul.mubr.msk.f32.vlgmr.msra.gmra.mrb[116].mxu1 %vm440_vm1, %v11252_v40 }
0x1381   :  { %8442 = vmatpush1.bf16.msra.mxu1 %v10837_v32  ;;  %6627 = vmatprep.mubr.f32.mxu0 %v11473_v8 }
0x1382   :  { %6701 = vmatprep.mubr.f32.mxu1 %v11473_v8  ;;  %8444 = vmatprep.subr.bf16.mxu1 %v10862_v55 }
0x1383   :  { %v9063_v21 = vpop.eup %9062  ;;  %8450 = vmatpush1.bf16.msra.mxu0 %v10916_v3 }
0x1384   :  { %v6548_v10 = vmul.f32 %v9063_v21, %v6547_v58  ;;  %8452 = vmatprep.subr.bf16.mxu0 %v10918_v35 }
0x1385   :  { %8446 = vmatpush1.bf16.msra.mxu1 %v10865_v57 }
0x1386   :  { %v11266_v52 = vadd.f32 %v6549_v0, %v6548_v10  ;;  %8456 = vmatprep.subr.bf16.mxu1 %v10638_v11 }
0x1387   :  { %8454 = vmatpush1.bf16.msra.mxu0 %v10930_v17 }
0x1388   :  { %7823 = vmatmul.mubr.msk.f32.gmra.mrb[134].mxu0 %vm440_vm1, %v11266_v52  ;;  %7825 = vmatmul.mubr.msk.f32.gmra.mrb[118].mxu1 %vm440_vm1, %v11266_v52 }
0x1389   :  { %6771 = vmatprep.mubr.f32.mxu1 %v11473_v8  ;;  %6902 = vmatprep.mubr.f32.mxu0 %v11473_v8 }
0x138a   :  { %8472 = vmatprep.subr.bf16.mxu0 %v10867_v51 }
0x138c   :  { %7826 = vmatmul.mubr.msk.f32.vlgmr.msra.gmra.mrb[120].mxu1 %vm440_vm1, %v11252_v40 }
0x138d   :  { %6775 = vmatprep.mubr.f32.mxu1 %v11473_v8  ;;  %8458 = vmatpush1.bf16.msra.mxu1 %v10715_v28 }
0x138e   :  { %8460 = vmatprep.subr.bf16.mxu1 %v10741_v5 }
0x1390   :  { %7827 = vmatmul.mubr.msk.f32.gmra.mrb[122].mxu1 %vm440_vm1, %v11266_v52 }
0x1391   :  { %8462 = vmatpush1.bf16.msra.mxu1 %v10746_v44  ;;  %6977 = vmatprep.mubr.f32.mxu1 %v11473_v8 }
0x1392   :  { %8464 = vmatprep.subr.bf16.mxu1 %v10761_v36 }
0x1453   :  { %v6623_v33 = vpop.f32.mrb[102].mxu0  ;;  %v6698_v51 = vpop.f32.mrb[116].mxu1 }
0x1454   :  { %v8533_v63 = vadd.f32 %v6623_v33, %v11059_v53  ;;  %v6625_v50 = vpop.f32.mrb[103].mxu0  ;;  %v6700_v23 = vpop.f32.mrb[117].mxu1 }
0x1455   :  { %v8534_v45 = vadd.f32 %v6625_v50, %v11064_v60 }
0x1456   :  { %v7828_v54 = vmul.f32 -1.442695, %v8533_v63 }
0x1457   :  { %v7829_v24 = vmul.f32 -1.442695, %v8534_v45 }
0x1458   :  { %9064 = vpow2.f32 %v7828_v54 }
0x1459   :  { %9066 = vpow2.f32 %v7829_v24 }
0x145b   :  { %v6629_v41 = vpop.f32.mrb[134].mxu0  ;;  %v6703_v48 = vpop.f32.mrb[118].mxu1 }
0x145c   :  { %v6630_v30 = vpop.f32.mrb[135].mxu0  ;;  %v6704_v61 = vpop.f32.mrb[119].mxu1 }
0x145d   :  { %v6810_v31 = vadd.f32 %v6704_v61, %v10989_v46  ;;  %v6799_v46 = vadd.f32 %v11071_v25, %v6698_v51 }
0x145f   :  { %v7830_v14 = vmul.f32 -1.442695, %v6810_v31  ;;  %v6773_v27 = vpop.f32.mrb[120].mxu1 }
0x1460   :  { %v6774_v19 = vpop.f32.mrb[121].mxu1 }
0x1461   :  { %9068 = vpow2.f32 %v7830_v14 }
0x1462   :  { %v9065_v49 = vpop.eup %9064 }
0x1463   :  { %v6789_v59 = vadd.f32 1.0, %v9065_v49  ;;  %v6777_v4 = vpop.f32.mrb[122].mxu1  ;;  %v9067_v9 = vpop.eup %9066 }
0x1464   :  { %v6817_v16 = vadd.f32 %v6777_v4, %v11036_v56  ;;  %v6779_v39 = vpop.f32.mrb[123].mxu1  ;;  %v6796_v22 = vadd.f32 1.0, %v9067_v9 }
0x1465   :  { %9070 = vrcp.f32 %v6789_v59  ;;  %v6824_v56 = vadd.f32 %v11019_v29, %v6779_v39 }
0x1466   :  { %v7831_v34 = vmul.f32 -1.442695, %v6817_v16 }
0x1468   :  { %9072 = vpow2.f32 %v7831_v34 }
0x146b   :  { %v9069_v1 = vpop.eup %9068 }
0x146c   :  { %v6814_v18 = vadd.f32 1.0, %v9069_v1 }
0x146e   :  { %9074 = vrcp.f32 %v6814_v18 }
0x146f   :  { %v9071_v26 = vpop.eup %9070  ;;  %9076 = vrcp.f32 %v6796_v22 }
0x1470   :  { %v6800_v42 = vmul.f32 %v9071_v26, %v6799_v46 }
0x1472   :  { %v9073_v12 = vpop.eup %9072  ;;  %v6801_v15 = vadd.f32 %v6800_v42, %v11002_v37 }
0x1473   :  { %v6821_v13 = vadd.f32 1.0, %v9073_v12 }
0x1474   :  { %9078 = vtanh.f32 %v6801_v15 }
0x1475   :  { %9080 = vrcp.f32 %v6821_v13 }
0x1478   :  { %v9075_v38 = vpop.eup %9074 }
0x1479   :  { %v6825_v58 = vmul.f32 %v9075_v38, %v6824_v56  ;;  %v9077_v21 = vpop.eup %9076 }
0x147a   :  { %v6803_v0 = vsub.f32 1.0, %v9077_v21  ;;  %v6805_v63 = vmul.f32 %v9077_v21, %v11252_v40 }
0x147b   :  { %v6826_v10 = vadd.f32 %v6825_v58, %v11038_v47 }
0x147d   :  { %9082 = vtanh.f32 %v6826_v10 }
0x147e   :  { %v9079_v33 = vpop.eup %9078 }
0x147f   :  { %v6804_v51 = vmul.f32 %v9079_v33, %v6803_v0  ;;  %v9081_v23 = vpop.eup %9080 }
0x1480   :  { %v6828_v37 = vsub.f32 1.0, %v9081_v23  ;;  %v6830_v40 = vmul.f32 %v9081_v23, %v11266_v52  ;;  %v7396_v23 = vld [vmem:[%s11434_s20 + $0x10] sm:$0xff] }
0x1481   :  { %v11296_v50 = vadd.f32 %v6805_v63, %v6804_v51 }
0x1483   :  { %7832 = vmatmul.mubr.msk.f32.vlgmr.msra.gmra.mrb[104].mxu0 %vm440_vm1, %v11296_v50  ;;  %7834 = vmatmul.mubr.msk.f32.vlgmr.msra.gmra.mrb[124].mxu1 %vm440_vm1, %v11296_v50 }
0x1484   :  { %8466 = vmatpush1.bf16.msra.mxu1 %v10837_v32  ;;  %6908 = vmatprep.mubr.f32.mxu0 %v11473_v8 }
0x1485   :  { %6982 = vmatprep.mubr.f32.mxu1 %v11473_v8  ;;  %8468 = vmatprep.subr.bf16.mxu1 %v10862_v55 }
0x1486   :  { %8474 = vmatpush1.bf16.msra.mxu0 %v10916_v3 }
0x1487   :  { %v9083_v29 = vpop.eup %9082  ;;  %8476 = vmatprep.subr.bf16.mxu0 %v10918_v35 }
0x1488   :  { %v6829_v47 = vmul.f32 %v9083_v29, %v6828_v37  ;;  %8470 = vmatpush1.bf16.msra.mxu1 %v10865_v57  ;;  %v7397_v37 = vld [vmem:[%s11434_s20 + $0x18] sm:$0xff] }
0x1489   :  { %8480 = vmatprep.subr.bf16.mxu1 %v10638_v11  ;;  %v8505_v29 = vpack.c.bf16 %v7397_v37, %v7396_v23 }
0x148a   :  { %v11311_v54 = vadd.f32 %v6830_v40, %v6829_v47  ;;  %8478 = vmatpush1.bf16.msra.mxu0 %v10930_v17  ;;  %v7398_v47 = vld [vmem:[%s11435_s21] sm:$0xff]  ;;  %v7399_v40 = vld [vmem:[%s11435_s21 + $0x8] sm:$0xff] }
0x148c   :  { %7833 = vmatmul.mubr.msk.f32.gmra.mrb[136].mxu0 %vm440_vm1, %v11311_v54  ;;  %7835 = vmatmul.mubr.msk.f32.gmra.mrb[126].mxu1 %vm440_vm1, %v11311_v54 }
0x148d   :  { %7052 = vmatprep.mubr.f32.mxu1 %v11473_v8  ;;  %7183 = vmatprep.mubr.f32.mxu0 %v11473_v8 }
0x1490   :  { %7836 = vmatmul.mubr.msk.f32.vlgmr.msra.gmra.mrb[128].mxu1 %vm440_vm1, %v11296_v50 }
0x1491   :  { %7056 = vmatprep.mubr.f32.mxu1 %v11473_v8  ;;  %8482 = vmatpush1.bf16.msra.mxu1 %v10715_v28 }
0x1492   :  { %8484 = vmatprep.subr.bf16.mxu1 %v10741_v5 }
0x1494   :  { %7837 = vmatmul.mubr.msk.f32.gmra.mrb[130].mxu1 %vm440_vm1, %v11311_v54 }
0x1495   :  { %8486 = vmatpush1.bf16.msra.mxu1 %v10746_v44  ;;  %7258 = vmatprep.mubr.f32.mxu1 %v11473_v8 }
0x1496   :  { %8488 = vmatprep.subr.bf16.mxu1 %v10761_v36 }
0x1556   :  { %v6904_v11 = vpop.f32.mrb[104].mxu0  ;;  %v6979_v3 = vpop.f32.mrb[124].mxu1 }
0x1557   :  { %v8535_v35 = vadd.f32 %v6904_v11, %v11059_v53  ;;  %v6906_v17 = vpop.f32.mrb[105].mxu0  ;;  %v6981_v52 = vpop.f32.mrb[125].mxu1  ;;  %v7400_v11 = vld [vmem:[%s11435_s21 + $0x10] sm:$0xff] }
0x1558   :  { %v8536_v28 = vadd.f32 %v6906_v17, %v11064_v60 }
0x1559   :  { %v7838_v45 = vmul.f32 -1.442695, %v8535_v35 }
0x155a   :  { %v7839_v5 = vmul.f32 -1.442695, %v8536_v28 }
0x155b   :  { %9084 = vpow2.f32 %v7838_v45 }
0x155c   :  { %9086 = vpow2.f32 %v7839_v5 }
0x155f   :  { %v6910_v24 = vpop.f32.mrb[136].mxu0  ;;  %v6984_v41 = vpop.f32.mrb[126].mxu1 }
0x1560   :  { %v6911_v48 = vpop.f32.mrb[137].mxu0  ;;  %v6985_v30 = vpop.f32.mrb[127].mxu1 }
0x1561   :  { %v7091_v44 = vadd.f32 %v6985_v30, %v10984_v62  ;;  %v7080_v62 = vadd.f32 %v11071_v25, %v6979_v3  ;;  %v7401_v3 = vld [vmem:[%s11435_s21 + $0x18] sm:$0xff] }
0x1563   :  { %v7840_v61 = vmul.f32 -1.442695, %v7091_v44  ;;  %v7054_v36 = vpop.f32.mrb[128].mxu1 }
0x1564   :  { %v7055_v31 = vpop.f32.mrb[129].mxu1 }
0x1565   :  { %v9085_v14 = vpop.eup %9084  ;;  %9088 = vpow2.f32 %v7840_v61 }
0x1566   :  { %v7070_v27 = vadd.f32 1.0, %v9085_v14  ;;  %v9087_v16 = vpop.eup %9086 }
0x1567   :  { %v7058_v19 = vpop.f32.mrb[130].mxu1  ;;  %v7077_v34 = vadd.f32 1.0, %v9087_v16 }
0x1568   :  { %9090 = vrcp.f32 %v7070_v27  ;;  %v7098_v49 = vadd.f32 %v7058_v19, %v11032_v20  ;;  %v7060_v59 = vpop.f32.mrb[131].mxu1  ;;  %v11339_v20 = vld [vmem:[%s11432_s19] ss:$0 sm:$0xff] }
0x1569   :  { %v7105_v42 = vadd.f32 %v11339_v20, %v7060_v59 }
0x156a   :  { %v7841_v4 = vmul.f32 -1.442695, %v7098_v49 }
0x156c   :  { %9092 = vpow2.f32 %v7841_v4 }
0x156f   :  { %v9089_v39 = vpop.eup %9088 }
0x1570   :  { %v7095_v9 = vadd.f32 1.0, %v9089_v39 }
0x1572   :  { %v9091_v1 = vpop.eup %9090  ;;  %9094 = vrcp.f32 %v7095_v9 }
0x1573   :  { %v7081_v22 = vmul.f32 %v9091_v1, %v7080_v62  ;;  %9096 = vrcp.f32 %v7077_v34 }
0x1575   :  { %v7082_v18 = vadd.f32 %v7081_v22, %v11007_v2 }
0x1576   :  { %v9093_v46 = vpop.eup %9092 }
0x1577   :  { %9098 = vtanh.f32 %v7082_v18  ;;  %v7102_v26 = vadd.f32 1.0, %v9093_v46  ;;  %v11485_v18 = vld [vmem:[#allocation6_spill] sm:$0xff] }
0x1579   :  { %9100 = vrcp.f32 %v7102_v26 }
0x157c   :  { %v9095_v12 = vpop.eup %9094 }
0x157d   :  { %v9097_v15 = vpop.eup %9096  ;;  %v7106_v25 = vmul.f32 %v9095_v12, %v7105_v42 }
0x157e   :  { %v7084_v56 = vsub.f32 1.0, %v9097_v15  ;;  %v7086_v58 = vmul.f32 %v9097_v15, %v11296_v50  ;;  %v9143_v50 = vmov 0.0|0.0  }
0x157f   :  { %v7107_v13 = vadd.f32 %v7106_v25, %v11034_v43  ;;  %8495 = vmatprep.subr.bf16.mxu0 %v9143_v50 }
0x1581   :  { %v9099_v38 = vpop.eup %9098  ;;  %9102 = vtanh.f32 %v7107_v13 }
0x1582   :  { %v7085_v2 = vmul.f32 %v9099_v38, %v7084_v56  ;;  %v11486_v56 = vld [vmem:[#allocation7_spill] sm:$0xff] }
0x1583   :  { %v9101_v10 = vpop.eup %9100 }
0x1584   :  { %v11344_v21 = vadd.f32 %v7086_v58, %v7085_v2  ;;  %v7109_v43 = vsub.f32 1.0, %v9101_v10  ;;  %v7111_v51 = vmul.f32 %v9101_v10, %v11311_v54  ;;  %v8496_v54 = vpack.c.bf16 %v7399_v40, %v7398_v47 }
0x1586   :  { %7842 = vmatmul.mubr.msk.f32.vlgmr.msra.gmra.mrb[106].mxu0 %vm440_vm1, %v11344_v21  ;;  %7844 = vmatmul.mubr.msk.f32.vlgmr.msra.gmra.mrb[132].mxu1 %vm440_vm1, %v11344_v21 }
0x1587   :  { %8490 = vmatpush1.bf16.msra.mxu1 %v10837_v32  ;;  %7189 = vmatprep.mubr.f32.mxu0 %v11473_v8  ;;  %v7394_v32 = vld [vmem:[%s11434_s20] sm:$0xff] }
0x1588   :  { %7263 = vmatprep.mubr.f32.mxu1 %v11473_v8  ;;  %8492 = vmatprep.subr.bf16.mxu1 %v10862_v55  ;;  %v7395_v55 = vld [vmem:[%s11434_s20 + $0x8] sm:$0xff] }
0x1589   :  { %8497 = vmatpush3.bf16.msra.mxu0 %v8496_v54 }
0x158a   :  { %8498 = vmatprep.subr.bf16.mxu0 %v9143_v50 }
0x158b   :  { %v9103_v0 = vpop.eup %9102  ;;  %8494 = vmatpush1.bf16.msra.mxu1 %v10865_v57  ;;  %v8502_v57 = vpack.c.bf16 %v7395_v55, %v7394_v32 }
0x158c   :  { %v7110_v33 = vmul.f32 %v9103_v0, %v7109_v43  ;;  %8501 = vmatprep.subr.bf16.mxu1 %v9143_v50 }
0x158e   :  { %v11356_v63 = vadd.f32 %v7111_v51, %v7110_v33 }
0x1590   :  { %7843 = vmatmul.mubr.msk.f32.gmra.mrb[138].mxu0 %vm440_vm1, %v11356_v63  ;;  %7845 = vmatmul.mubr.msk.f32.gmra.mrb[134].mxu1 %vm440_vm1, %v11356_v63 }
0x1591   :  { %7333 = vmatprep.mubr.f32.mxu1 %v11473_v8  ;;  %7981 = vmatprep.mubr.msk.f32.mxu0 %vm9144_vm5, %v11473_v8 }
0x1594   :  { %7846 = vmatmul.mubr.msk.f32.vlgmr.msra.gmra.mrb[136].mxu1 %vm440_vm1, %v11344_v21 }
0x1595   :  { %7337 = vmatprep.mubr.f32.mxu1 %v11473_v8  ;;  %8503 = vmatpush3.bf16.msra.mxu1 %v8502_v57 }
0x1596   :  { %8504 = vmatprep.subr.bf16.mxu1 %v9143_v50 }
0x1598   :  { %7847 = vmatmul.mubr.msk.f32.gmra.mrb[138].mxu1 %vm440_vm1, %v11356_v63 }
0x1599   :  { %8506 = vmatpush3.bf16.msra.mxu1 %v8505_v29  ;;  %7992 = vmatprep.mubr.msk.f32.mxu1 %vm9144_vm5, %v11473_v8  ;;  %v8499_v8 = vpack.c.bf16 %v7401_v3, %v7400_v11 }
0x159b   :  { %8500 = vmatpush3.bf16.msra.mxu0 %v8499_v8 }
0x1659   :  { %v7185_v35 = vpop.f32.mrb[106].mxu0  ;;  %v7260_v17 = vpop.f32.mrb[132].mxu1 }
0x165a   :  { %v8537_v52 = vadd.f32 %v7185_v35, %v11059_v53  ;;  %v7187_v45 = vpop.f32.mrb[107].mxu0  ;;  %v7262_v28 = vpop.f32.mrb[133].mxu1 }
0x165b   :  { %v8538_v24 = vadd.f32 %v7187_v45, %v11064_v60 }
0x165c   :  { %v7848_v5 = vmul.f32 -1.442695, %v8537_v52 }
0x165d   :  { %v7849_v41 = vmul.f32 -1.442695, %v8538_v24 }
0x165e   :  { %9104 = vpow2.f32 %v7848_v5 }
0x165f   :  { %9106 = vpow2.f32 %v7849_v41 }
0x1663   :  { %v7191_v48 = vpop.f32.mrb[138].mxu0  ;;  %v7265_v30 = vpop.f32.mrb[134].mxu1 }
0x1664   :  { %v7192_v44 = vpop.f32.mrb[139].mxu0  ;;  %v7266_v61 = vpop.f32.mrb[135].mxu1 }
0x1665   :  { %v7372_v36 = vadd.f32 %v7266_v61, %v10974_v7  ;;  %v9135_v7 = vld [vmem:[%s11433_s18] ss:$0 sm:$0xff] }
0x1666   :  { %v7361_v9 = vadd.f32 %v9135_v7, %v7260_v17 }
0x1667   :  { %v7850_v31 = vmul.f32 -1.442695, %v7372_v36  ;;  %v7335_v14 = vpop.f32.mrb[136].mxu1 }
0x1668   :  { %v9105_v27 = vpop.eup %9104  ;;  %v7336_v19 = vpop.f32.mrb[137].mxu1 }
0x1669   :  { %v7351_v49 = vadd.f32 1.0, %v9105_v27  ;;  %9108 = vpow2.f32 %v7850_v31  ;;  %v9107_v4 = vpop.eup %9106 }
0x166a   :  { %v7358_v39 = vadd.f32 1.0, %v9107_v4 }
0x166b   :  { %9110 = vrcp.f32 %v7351_v49  ;;  %v7339_v53 = vpop.f32.mrb[138].mxu1 }
0x166c   :  { %v7379_v59 = vadd.f32 %v7339_v53, %v11028_v6  ;;  %v7341_v60 = vpop.f32.mrb[139].mxu1 }
0x166d   :  { %v7386_v12 = vadd.f32 %v11339_v20, %v7341_v60 }
0x166e   :  { %v7851_v16 = vmul.f32 -1.442695, %v7379_v59 }
0x1670   :  { %9112 = vpow2.f32 %v7851_v16 }
0x1671   :  { %9114 = vrcp.f32 %v7358_v39 }
0x1673   :  { %v9109_v34 = vpop.eup %9108 }
0x1674   :  { %v7376_v62 = vadd.f32 1.0, %v9109_v34 }
0x1675   :  { %v9111_v1 = vpop.eup %9110 }
0x1676   :  { %v7362_v22 = vmul.f32 %v9111_v1, %v7361_v9  ;;  %9116 = vrcp.f32 %v7376_v62 }
0x1678   :  { %v7363_v46 = vadd.f32 %v7362_v22, %v11485_v18 }
0x167a   :  { %v9113_v26 = vpop.eup %9112  ;;  %9118 = vtanh.f32 %v7363_v46 }
0x167b   :  { %v7383_v6 = vadd.f32 1.0, %v9113_v26  ;;  %v9115_v42 = vpop.eup %9114 }
0x167c   :  { %v7365_v13 = vsub.f32 1.0, %v9115_v42  ;;  %v7367_v10 = vmul.f32 %v9115_v42, %v11344_v21  ;;  %v7854_v21 = vld [vmem:[%s11436_s22] ss:$0 sm:$0xff] }
0x167d   :  { %9120 = vrcp.f32 %v7383_v6 }
0x1680   :  { %v9117_v15 = vpop.eup %9116 }
0x1681   :  { %v7387_v25 = vmul.f32 %v9117_v15, %v7386_v12 }
0x1683   :  { %v7388_v38 = vadd.f32 %v7387_v25, %v11486_v56 }
0x1684   :  { %v9119_v2 = vpop.eup %9118 }
0x1685   :  { %v7366_v58 = vmul.f32 %v9119_v2, %v7365_v13  ;;  %9122 = vtanh.f32 %v7388_v38 }
0x1687   :  { %v7368_v43 = vadd.f32 %v7367_v10, %v7366_v58  ;;  %v9121_v0 = vpop.eup %9120 }
0x1688   :  { %v7390_v33 = vsub.f32 1.0, %v9121_v0  ;;  %v7392_v32 = vmul.f32 %v9121_v0, %v11356_v63 }
0x1689   :  { %7993 = vmatmul.mubr.msk.f32.vlgmr.msra.gmra.mrb[140].mxu1 %vm440_vm1, %v7368_v43 }
0x168f   :  { %v9123_v51 = vpop.eup %9122 }
0x1690   :  { %v7391_v20 = vmul.f32 %v9123_v51, %v7390_v33 }
0x1692   :  { %v7393_v55 = vadd.f32 %v7392_v32, %v7391_v20 }
0x1694   :  { %7982 = vmatmul.mubr.msk.f32.vlgmr.msra.gmra.mrb[140].mxu0 %vm440_vm1, %v7393_v55 }
0x175c   :  { %v7544_v57 = vpop.f32.mrb[140].mxu1 }
0x175d   :  { %v7994_v50 = vpop.f32.mrb[141].mxu1 }
0x1767   :  { %v7471_v23 = vpop.f32.mrb[140].mxu0 }
0x1768   :  { %v7545_v37 = vadd.f32 %v7544_v57, %v7471_v23  ;;  %v7983_v29 = vpop.f32.mrb[141].mxu0 }
0x176a   :  { %v7555_v47 = vadd.f32 %v7854_v21, %v7545_v37 }
0x176c   :  { %7556 = vst [vmem:[%s11437_s23] sm:$0xff] %v7555_v47 }

</bundles_post_ra>
